<compile_context>
chip_gen: v5e
topology: v5e:2x2
jax: 0.10.0
libtpu: 0.0.40
codegen_flags: <defaults>
</compile_context>

<pallas_src>
import jax
import jax.numpy as jnp
from jax.experimental import pallas as pl
from jax.experimental.pallas import tpu as pltpu


# ----------------------------- Pallas kernel -------------------------------

def _make_gcn_kernel(use_weight: bool, use_bias: bool):
    """GraphConvolution kernel body for a (Bt, S, *) batch tile.

    Ref order: text (Bt,S,D) bf16, adj (Bt,S,S) bf16,
               [weight (D,D) bf16], [bias (1,D) f32], out (Bt,S,D).
    """

    def kernel(*refs):
        refs = list(refs)
        text_ref = refs.pop(0)
        adj_ref = refs.pop(0)
        w_ref = refs.pop(0) if use_weight else None
        b_ref = refs.pop(0) if use_bias else None
        o_ref = refs.pop(0)

        text = text_ref[...]                      # (Bt, S, D) bf16
        adj = adj_ref[...]                        # (Bt, S, S) bf16
        bt, s, d = text.shape

        # denom = rowsum(adj) + 1 (f32 accumulation); divide via EUP approx
        # reciprocal + one Newton step (denom >= 1, so always safe).
        denom = jnp.sum(adj.astype(jnp.float32), axis=-1, keepdims=True) + 1.0
        inv = pl.reciprocal(denom, approx=True)
        inv = inv * (2.0 - denom * inv)           # near-exact 1/denom

        # hidden = text @ W: one big (Bt*S, D) x (D, D) MXU dot (skipped when
        # the parameter is still the eye(768) init).
        if use_weight:
            h = jnp.dot(text.reshape(bt * s, d), w_ref[...],
                        preferred_element_type=jnp.float32)
            hidden = h.reshape(bt, s, d).astype(jnp.bfloat16)
        else:
            hidden = text                         # already bf16

        # out = (adj @ hidden) / denom  -- bf16 MXU inputs, f32 accumulate.
        out = jnp.einsum('bij,bjd->bid', adj, hidden,
                         preferred_element_type=jnp.float32) * inv

        if use_bias:
            out = out + b_ref[...]                # (1, D) broadcasts over (Bt,S,D)

        o_ref[...] = out.astype(o_ref.dtype)

    return kernel


# ------------------------------- wrapper ------------------------------------

def graph_convolution(text, adj, weight, bias=None, *,
                      identity_weight=False, batch_tile=None,
                      out_dtype=jnp.float32, input_dtype=jnp.bfloat16):
    """GraphConvolution forward.

    text:   (B, S, D) float
    adj:    (B, S, S) float (0/1 adjacency; bf16 input cast is exact for 0/1)
    weight: (D, D)    float (PyTorch init: eye(768))
    bias:   optional (D,) float
    identity_weight: pass True to skip text@W when weight is known to be eye
                     (no per-call detection -> no host sync, jit-friendly).
    out_dtype: f32 by default (matches PyTorch `.float()` semantics); pass
               bf16 to halve output writeback if downstream tolerates it.
    """
    B, S, D = text.shape
    assert adj.shape == (B, S, S)
    assert weight.shape == (D, D)

    # bf16 on the DMA path: halves text/adj HBM traffic; MXU consumed bf16
    # anyway (f32 accumulation).  If a weighted (non-0/1) adjacency must stay
    # exact, pass input_dtype=jnp.float32.
    text = text.astype(input_dtype)
    adj = adj.astype(input_dtype)

    # Batch tile: largest divisor of B up to 4 (keeps several grid steps per
    # TensorCore and fits comfortably inside v7x's 64 MiB VMEM).
    if batch_tile is None:
        batch_tile = 1
        for cand in range(1, min(4, B) + 1):
            if B % cand == 0:
                batch_tile = cand
    Bt = batch_tile
    assert B % Bt == 0, "batch_tile must divide the batch size"
    grid = (B // Bt,)

    use_weight = not identity_weight
    use_bias = bias is not None

    in_arrays = [text, adj]
    in_specs = [pl.BlockSpec((Bt, S, D), lambda i: (i, 0, 0)),
                pl.BlockSpec((Bt, S, S), lambda i: (i, 0, 0))]
    if use_weight:
        # Pre-cast once on the host: halves weight VMEM + HBM->VMEM DMA bytes.
        in_arrays.append(weight.astype(jnp.bfloat16))
        in_specs.append(pl.BlockSpec((D, D), lambda i: (0, 0)))   # VMEM-resident
    if use_bias:
        in_arrays.append(bias.astype(jnp.float32).reshape(1, D))
        in_specs.append(pl.BlockSpec((1, D), lambda i: (0, 0)))

    # VMEM budget from actual block sizes (double-buffered blocks + resident
    # weight/bias + headroom), not a hard-coded constant.
    isz = lambda dt: jnp.dtype(dt).itemsize
    blk_bytes = (Bt * S * D * isz(input_dtype)        # text block
                 + Bt * S * S * isz(input_dtype)      # adj block
                 + Bt * S * D * isz(out_dtype))       # out block
    fixed_bytes = (D * D * 2 if use_weight else 0) + (D * 4 if use_bias else 0)
    vmem_needed = 2 * blk_bytes + 2 * fixed_bytes + (4 << 20)
    vmem_limit = int(min(max(vmem_needed, 32 << 20), 100 << 20))

    kernel = _make_gcn_kernel(use_weight=use_weight, use_bias=use_bias)

    return pl.pallas_call(
        kernel,
        out_shape=jax.ShapeDtypeStruct((B, S, D), out_dtype),
        grid=grid,
        in_specs=in_specs,
        out_specs=pl.BlockSpec((Bt, S, D), lambda i: (i, 0, 0)),
        compiler_params=pltpu.CompilerParams(
            dimension_semantics=("parallel",),       # v7x: shard batch over 2 TCs
            vmem_limit_bytes=vmem_limit),
    )(*in_arrays)


# --------------------------------- main --------------------------------------

if __name__ == "__main__":
    # The module hardcodes eye(768), so D=768; keep batch/seq modest.
    B, S, D = 8, 128, 768

    key = jax.random.PRNGKey(0)
    k1, k2, k3, k4 = jax.random.split(key, 4)
    text = jax.random.normal(k1, (B, S, D), jnp.float32)
    adj = (jax.random.uniform(k2, (B, S, S)) > 0.5).astype(jnp.float32)

    def reference(text, adj, w, b=None):
        hidden = jnp.matmul(text, w)
        denom = jnp.sum(adj, axis=2, keepdims=True) + 1.0
        out = jnp.matmul(adj, hidden) / denom
        return out if b is None else out + b

    # 1) default module state: weight == eye(768) -> identity fast path
    #    (caller-provided flag, no per-call host sync).
    w_eye = jnp.eye(D, dtype=jnp.float32)
    out_eye = jax.block_until_ready(
        graph_convolution(text, adj, w_eye, identity_weight=True))

    # 2) a "trained" (non-identity) weight -> general bf16 MXU path.
    w_gen = w_eye + 0.01 * jax.random.normal(k3, (D, D), jnp.float32)
    out_gen = jax.block_until_ready(graph_convolution(text, adj, w_gen))

    # 3) bias=True branch of the module.
    bias_vec = 0.1 * jax.random.normal(k4, (D,), jnp.float32)
    out_bias = jax.block_until_ready(
        graph_convolution(text, adj, w_gen, bias=bias_vec))

    ref_eye = reference(text, adj, w_eye)
    ref_gen = reference(text, adj, w_gen)
    ref_bias = reference(text, adj, w_gen, bias_vec)

    for got, ref in ((out_eye, ref_eye), (out_gen, ref_gen), (out_bias, ref_bias)):
        assert got.shape == (B, S, D)
        assert bool(jnp.all(jnp.isfinite(got)))
        err = float(jnp.max(jnp.abs(got - ref)))
        assert err < 5e-2, f"max abs error {err} too large (bf16 tolerance)"

    print("KERNEL_OK")
</pallas_src>

<mosaic_0001>
module attributes {stable_mosaic.version = 11 : i64} {
  func.func @kernel(%arg0: i32, %arg1: memref<4x128x768xbf16, #tpu.memory_space<vmem>>, %arg2: memref<4x128x128xbf16, #tpu.memory_space<vmem>>, %arg3: memref<4x128x768xf32, #tpu.memory_space<vmem>>) attributes {dimension_semantics = [#tpu.dimension_semantics<parallel>], iteration_bounds = array<i64: 2>, scalar_prefetch = 0 : i64, scratch_operands = 0 : i64, tpu.core_type = #tpu.core_type<tc>, window_params = [{transform_indices = @transform_0, window_bounds = array<i64: 4, 128, 768>}, {transform_indices = @transform_1, window_bounds = array<i64: 4, 128, 128>}, {transform_indices = @transform_2, window_bounds = array<i64: 4, 128, 768>}]} {
    %c0 = arith.constant 0 : index
    %c0_0 = arith.constant 0 : index
    %c0_1 = arith.constant 0 : index
    %0 = vector.load %arg1[%c0, %c0_0, %c0_1] : memref<4x128x768xbf16, #tpu.memory_space<vmem>>, vector<4x128x768xbf16>
    %c0_2 = arith.constant 0 : index
    %c0_3 = arith.constant 0 : index
    %c0_4 = arith.constant 0 : index
    %1 = vector.load %arg2[%c0_2, %c0_3, %c0_4] : memref<4x128x128xbf16, #tpu.memory_space<vmem>>, vector<4x128x128xbf16>
    %2 = arith.extf %1 : vector<4x128x128xbf16> to vector<4x128x128xf32>
    %cst = arith.constant dense<0.000000e+00> : vector<4x128xf32>
    %3 = vector.multi_reduction <add>, %2, %cst [2] : vector<4x128x128xf32> to vector<4x128xf32>
    %4 = vector.shape_cast %3 : vector<4x128xf32> to vector<4x128x1xf32>
    %cst_5 = arith.constant 1.000000e+00 : f32
    %5 = vector.broadcast %cst_5 : f32 to vector<4x128x1xf32>
    %6 = arith.addf %4, %5 : vector<4x128x1xf32>
    %7 = tpu.reciprocal %6 {approx = true} : vector<4x128x1xf32> -> vector<4x128x1xf32>
    %8 = arith.mulf %6, %7 : vector<4x128x1xf32>
    %cst_6 = arith.constant 2.000000e+00 : f32
    %9 = vector.broadcast %cst_6 : f32 to vector<4x128x1xf32>
    %10 = arith.subf %9, %8 : vector<4x128x1xf32>
    %11 = arith.mulf %7, %10 : vector<4x128x1xf32>
    "tpu.trace_start"() <{level = 10 : i32, message = "bij,bjd->bid"}> : () -> ()
    %cst_7 = arith.constant dense<0.000000e+00> : vector<4x128x768xf32>
    %12 = tpu.matmul %1, %0, %cst_7 {dimension_numbers = #tpu.dot_dimension_numbers<[2], [1], [1], [2], [0, 0, 0, 1, 1, 2], [0], [0]>} : vector<4x128x128xbf16>, vector<4x128x768xbf16>, vector<4x128x768xf32> -> vector<4x128x768xf32>
    "tpu.trace_stop"() : () -> ()
    %13 = vector.broadcast %11 : vector<4x128x1xf32> to vector<4x128x768xf32>
    %14 = arith.mulf %12, %13 : vector<4x128x768xf32>
    %c0_8 = arith.constant 0 : index
    %c0_9 = arith.constant 0 : index
    %c0_10 = arith.constant 0 : index
    %15 = vector.load %arg3[%c0_8, %c0_9, %c0_10] : memref<4x128x768xf32, #tpu.memory_space<vmem>>, vector<4x128x768xf32>
    tpu.vector_store %arg3[%c0_8, %c0_9, %c0_10], %14 {strides = array<i32>} : memref<4x128x768xf32, #tpu.memory_space<vmem>>, vector<4x128x768xf32>,
    return
  }
  func.func @transform_0(%arg0: i32) -> (i32, i32, i32) {
    %c0_i32 = arith.constant 0 : i32
    %c0_i32_0 = arith.constant 0 : i32
    %c0_i32_1 = arith.constant 0 : i32
    return %arg0, %c0_i32, %c0_i32_0 : i32, i32, i32
  }
  func.func @transform_1(%arg0: i32) -> (i32, i32, i32) {
    %c0_i32 = arith.constant 0 : i32
    %c0_i32_0 = arith.constant 0 : i32
    %c0_i32_1 = arith.constant 0 : i32
    return %arg0, %c0_i32, %c0_i32_0 : i32, i32, i32
  }
  func.func @transform_2(%arg0: i32) -> (i32, i32, i32) {
    %c0_i32 = arith.constant 0 : i32
    %c0_i32_0 = arith.constant 0 : i32
    %c0_i32_1 = arith.constant 0 : i32
    return %arg0, %c0_i32, %c0_i32_0 : i32, i32, i32
  }
}

</mosaic_0001>

<bundles_post_ra>
// kernel: tpu_custom_call.1
= control target key start
LH: loop header
LB: loop body
LE: loop exit
PB: predicated region body
PF: predicated region fallthrough
CT: control target
= control target key end

     0   :  { %7 = vsyncpa [#allocation3], 0  ;;  %s7430_s0 = inlined_call_operand.hbm [shape: bf16[8,128,768], index: 0, kind: input, shape index: {}]   ;;  %s7431_s1 = inlined_call_operand.hbm [shape: bf16[8,128,128], index: 1, kind: input, shape index: {}]   ;;  %s7432_s2 = inlined_call_operand.hbm [shape: f32[8,128,768], index: 2, kind: output, shape index: {}]  }
   0x1   :  { %9 = vsyncpa [#allocation3 + $0x1], 0 }
   0x2   :  { %10 = vsyncpa [#allocation6], 0 }
   0x3   :  { %12 = vsyncpa [#allocation6 + $0x1], 0 }
   0x4   :  { %13 = vsyncpa [#allocation4], 0 }
   0x5   :  { %15 = vsyncpa [#allocation4 + $0x1], 0  ;;  %s5672_s9 = smov 0   ;;  %s5674_s10 = smov 0  }
   0x6   :  { %s5676_s11 = smov 0   ;;  %s5678_s12 = smov 0  }
   0x7 LB: > { %s5693_s13 = sadd.s32 4294967295, %s5649_s12   ;;  %s4188_s14 = sadd.s32 4294967294, %s5649_s12   ;;  %s5649_s12 = sphi %s5678_s12, %s7441_s12   ;;  %s5645_s11 = sphi %s5676_s11, %s7440_s11   ;;  %s5641_s10 = sphi %s5674_s10, %s7439_s10   ;;  %s5637_s9 = sphi %s5672_s9, %s7438_s9  }
   0x8   : > { %s5697_s15 = sadd.s32 1, %s5649_s12   ;;  %s28_s16 = sadd.s32 1, %s5645_s11 }
   0x9   : > { %s25_s17 = ssub.s32 %s5649_s12, %s5697_s15  ;;  %p35_p0 = scmp.ne.s32.totalorder %s5645_s11, %s5641_s10 }
   0xa   : > { %p26_p1 = scmp.eq.s32.totalorder %s25_s17, 0  ;;  %p36_p2 = scmp.eq.s32.totalorder %s5649_s12, 0 }
   0xb   : > { %p41_p3 = scmp.ne.s32.totalorder %s5641_s10, %s5637_s9  ;;  %p42_p4 = scmp.eq.s32.totalorder %s5693_s13, 0 }
   0xc   : > { %s5709_s18 = scalar_select %p26_p1, %s5645_s11, %s28_s16  }
   0xd   : > { %p37_p5 = por %p36_p2, %p35_p0  ;;  %p5711_p6 = por %p42_p4, %p41_p3 }
   0xe   : > { %p91_p7 = scmp.eq.s32.totalorder %s5693_s13, 1  ;;  %p97_p8 = scmp.eq.s32.totalorder %s4188_s14, 1 }
   0xf   : > { %p4190_p9 = scmp.ge.s32.totalorder %s5649_s12, 2  ;;  %p5349_p10 = scmp.lt.s32.totalorder %s5649_s12, 2 }
  0x10   : > { %p5718_p11 = por %p91_p7, %p35_p0  ;;  %p5722_p12 = por %p97_p8, %p41_p3 }
  0x11   : > { %s5727_s22 = sand.u32 1, %s5645_s11   ;;  %s5328_s23 = smul.u32 1536, %s5649_s12 }
  0x12   : > { %s5327_s24 = smul.u32 1536, %s5727_s22  ;;  %p5734_p13 = pnand %p5349_p10, %p37_p5 }
  0x13   : > { %s127_s27 = scalar_lea.hbm %s7430_s0, %s5328_s23  ;;  %s118_s4 = scalar_lea.sflag [#allocation3], %s5727_s22 }
  0x14   : > { %s128_s29 = sshll.u32 %s127_s27, 4  ;;  %s121_s30 = scalar_lea.vmem [#allocation2], %s5327_s24  ;;  %s129_s29 = int_to_ptr.hbm [resolvable:$true] %s128_s29 }
  0x15   : > { %s130_s3 = sshll.u32 %s121_s30, 4  ;;  %s5519_s5 = sshra.s32 %s129_s29, 4  ;;  %s131_s3 = int_to_ptr.vmem [resolvable:$true] %s130_s3  ;;  %s5520_s5 = int_to_ptr.hbm [resolvable:$true] %s5519_s5 }
  0x16   : > { %s5521_s6 = scalar_lea.hbm %s5520_s5, 1536  ;;  %p5523_p1 = pneg %p5734_p13 }
  0x17   : > { %p5522_p0 = scmp.ne.s32.totalorder %s5520_s5, %s5521_s6  ;;  %s5526_s14 = scalar_lea.hbm %s7430_s0, 3072 }
  0x18   : > { %p5527_p4 = scmp.lt.s32.totalorder %s5520_s5, %s7430_s0  ;;  %p5528_p5 = scmp.lt.s32.totalorder %s5526_s14, %s5521_s6 }
  0x19   : > { %p5524_p2 = pnand %p5523_p1, %p5522_p0 }
  0x1a   : > { %p5529_p7 = por %p5528_p5, %p5527_p4 }
  0x1b   : > { %p5525_p3 = pneg %p5524_p2 }
  0x1d   : > { %p5530_p8 = pnand %p5529_p7, %p5525_p3 }
  0x1f   : > { %5533 = shalt.err (!%p5530_p8)
}
  0x20   : > { %s5651_s23 = smov 384   ;;  %s5652_s24 = smov 24  }
  0x21   : > { %5341 = dma.hbm_to_vmem [thread:$0]  (!%p5734_p13), %s129_s29, 24576, %s131_s3, %s118_s4, %s5651_s23, %s5651_s23, %s5652_s24  }
  0x22   : > { %p4198_p10 = scmp.ge.s32.totalorder %s5649_s12, 1  ;;  %p161_p0 = scmp.lt.s32.totalorder %s5649_s12, 3 }
  0x23   : > { %s4194_s25 = sshll.u32 %s5727_s22, 8  ;;  %s5102_s27 = sshll.u32 %s5649_s12, 8 }
  0x24   : > { %p5755_p2 = pnand %p4198_p10, %p161_p0  ;;  %s144_s30 = scalar_lea.vmem [#allocation5], %s4194_s25 }
  0x25   : > { %s153_s5 = sshll.u32 %s144_s30, 4  ;;  %s150_s8 = scalar_lea.hbm %s7431_s1, %s5102_s27  ;;  %s154_s5 = int_to_ptr.vmem [resolvable:$true] %s153_s5 }
  0x26   : > { %s151_s14 = sshll.u32 %s150_s8, 4  ;;  %s141_s16 = scalar_lea.sflag [#allocation6], %s5727_s22  ;;  %s152_s14 = int_to_ptr.hbm [resolvable:$true] %s151_s14 }
  0x27   : > { %s5549_s29 = sshra.s32 %s152_s14, 4  ;;  %s5556_s23 = scalar_lea.hbm %s7431_s1, 512  ;;  %s5550_s29 = int_to_ptr.hbm [resolvable:$true] %s5549_s29 }
  0x28   : > { %s5551_s3 = scalar_lea.hbm %s5550_s29, 256  ;;  %p5557_p7 = scmp.lt.s32.totalorder %s5550_s29, %s7431_s1 }
  0x29   : > { %p5552_p3 = scmp.ne.s32.totalorder %s5550_s29, %s5551_s3  ;;  %p5558_p8 = scmp.lt.s32.totalorder %s5556_s23, %s5551_s3 }
  0x2b   : > { %p5554_p4 = pnand %p5552_p3, %p5523_p1  ;;  %p5559_p10 = por %p5558_p8, %p5557_p7 }
  0x2d   : > { %p5555_p5 = pneg %p5554_p4 }
  0x2f   : > { %p5560_p0 = pnand %p5559_p10, %p5555_p5 }
  0x31   : > { %5563 = shalt.err (!%p5560_p0)
}
  0x32   : > { %s5653_s22 = smov 64   ;;  %s5654_s27 = smov 4  }
  0x33   : > { %5344 = dma.hbm_to_vmem [thread:$0]  (!%p5734_p13), %s152_s14, 4096, %s154_s5, %s141_s16, %s5653_s22, %s5653_s22, %s5654_s27  }
  0x34   : > { %165 = sbr.rel (%p5755_p2) target bundleno = 996 (0x3e4), region = 28  ;;  %s5778_s30 = sand.u32 (!%p5755_p2), 1, %s5641_s10  }
  0x35   : > { %s5329_s6 = smul.u32 (!%p5755_p2), 1536, %s5778_s30  ;;  %s168_s7 = scalar_lea.sflag (!%p5755_p2), [#allocation3], %s5778_s30 }
  0x37   : > { %s5782_s8 = scalar_lea.vmem (!%p5755_p2), [#allocation2], %s5329_s6 }
  0x39   : > { %5624 = dma.done.wait (%p5711_p6), %s168_s7, 24576  }
  0x3a   : > { %5626 = vsyncadd (%p5711_p6), %s168_s7, 4294942720  ;;  %s4199_s28 = sshll.u32 %s5778_s30, 8  ;;  %s178_s26 = scalar_lea.sflag [#allocation6], %s5778_s30 }
  0x3b   : > { %s5790_s5 = scalar_lea.vmem [#allocation5], %s4199_s28 }
  0x3c   : > { %5628 = dma.done.wait (%p5711_p6), %s178_s26, 4096  }
  0x3d   : > { %5630 = vsyncadd (%p5711_p6), %s178_s26, 4294963200  ;;  %v4402_v0 = vld [vmem:[%s5782_s8 + $0x150] sm:$0xf]  ;;  %v5148_v1 = vld [vmem:[%s5782_s8 + $0x164] sm:$0xf0]  ;;  %s5330_s19 = smul.u32 3072, %s5778_s30 }
  0x3e   : > { %v5145_v2 = vld [vmem:[%s5782_s8 + $0x154] sm:$0xf]  ;;  %v4403_v3 = vor.u32 %v5148_v1, %v4402_v0  ;;  %v4404_v4 = vld [vmem:[%s5782_s8 + $0x168] sm:$0xf0]  ;;  %v4410_v5 = vld [vmem:[%s5782_s8 + $0x158] sm:$0xf] }
  0x3f   : > { %v5149_v6 = vld [vmem:[%s5782_s8 + $0x16c] sm:$0xf0]  ;;  %v4407_v7 = vor.u32 %v5145_v2, %v4404_v4  ;;  %v5146_v9 = vld [vmem:[%s5782_s8 + $0x15c] sm:$0xf]  ;;  %v4412_v10 = vld [vmem:[%s5782_s8 + $0x170] sm:$0xf0] }
  0x40   : > { %v4411_v8 = vor.u32 %v5149_v6, %v4410_v5  ;;  %v4378_v11 = vld [vmem:[%s5782_s8 + $0x120] sm:$0xf]  ;;  %1267 = vmatpush.bf16.msra.mxu0 %v4403_v3  ;;  %v4415_v12 = vor.u32 %v5146_v9, %v4412_v10  ;;  %v5142_v13 = vld [vmem:[%s5782_s8 + $0x134] sm:$0xf0]  ;;  %v5139_v14 = vld [vmem:[%s5782_s8 + $0x124] sm:$0xf] }
  0x41   : > { %v4380_v15 = vld [vmem:[%s5782_s8 + $0x138] sm:$0xf0]  ;;  %1316 = vmatpush.bf16.msra.mxu1 %v4407_v7  ;;  %v4379_v16 = vor.u32 %v5142_v13, %v4378_v11  ;;  %v4386_v18 = vld [vmem:[%s5782_s8 + $0x128] sm:$0xf]  ;;  %v5143_v19 = vld [vmem:[%s5782_s8 + $0x13c] sm:$0xf0] }
  0x42   : > { %1365 = vmatpush.bf16.msra.mxu2 %v4411_v8  ;;  %v4383_v17 = vor.u32 %v5139_v14, %v4380_v15  ;;  %v5140_v20 = vld [vmem:[%s5782_s8 + $0x12c] sm:$0xf]  ;;  %1414 = vmatpush.bf16.msra.mxu3 %v4415_v12  ;;  %v4387_v21 = vor.u32 %v5143_v19, %v4386_v18  ;;  %v4388_v22 = vld [vmem:[%s5782_s8 + $0x140] sm:$0xf0]  ;;  %v4354_v23 = vld [vmem:[%s5782_s8 + $0xf0] sm:$0xf] }
  0x43   : > { %v5136_v24 = vld [vmem:[%s5782_s8 + $0x104] sm:$0xf0]  ;;  %v4391_v25 = vor.u32 %v5140_v20, %v4388_v22  ;;  %v5133_v26 = vld [vmem:[%s5782_s8 + $0xf4] sm:$0xf]  ;;  %v4356_v27 = vld [vmem:[%s5782_s8 + $0x108] sm:$0xf0] }
  0x44   : > { %v4362_v28 = vld [vmem:[%s5782_s8 + $0xf8] sm:$0xf]  ;;  %1268 = vmatpush.bf16.msra.mxu0 %v4379_v16  ;;  %v4355_v29 = vor.u32 %v5136_v24, %v4354_v23  ;;  %v5137_v30 = vld [vmem:[%s5782_s8 + $0x10c] sm:$0xf0]  ;;  %v5134_v31 = vld [vmem:[%s5782_s8 + $0xfc] sm:$0xf]  ;;  %v4359_v33 = vor.u32 %v5133_v26, %v4356_v27 }
  0x45   : > { %v4364_v32 = vld [vmem:[%s5782_s8 + $0x110] sm:$0xf0]  ;;  %1317 = vmatpush.bf16.msra.mxu1 %v4383_v17  ;;  %v4363_v34 = vor.u32 %v5137_v30, %v4362_v28  ;;  %v4330_v35 = vld [vmem:[%s5782_s8 + $0xc0] sm:$0xf]  ;;  %v5130_v36 = vld [vmem:[%s5782_s8 + $0xd4] sm:$0xf0] }
  0x46   : > { %1366 = vmatpush.bf16.msra.mxu2 %v4387_v21  ;;  %v5127_v37 = vld [vmem:[%s5782_s8 + $0xc4] sm:$0xf]  ;;  %1415 = vmatpush.bf16.msra.mxu3 %v4391_v25  ;;  %v4367_v38 = vor.u32 %v5134_v31, %v4364_v32  ;;  %v4332_v39 = vld [vmem:[%s5782_s8 + $0xd8] sm:$0xf0]  ;;  %v4338_v40 = vld [vmem:[%s5782_s8 + $0xc8] sm:$0xf]  ;;  %v4331_v44 = vor.u32 %v5130_v36, %v4330_v35 }
  0x47   : > { %v5131_v41 = vld [vmem:[%s5782_s8 + $0xdc] sm:$0xf0]  ;;  %v5128_v42 = vld [vmem:[%s5782_s8 + $0xcc] sm:$0xf]  ;;  %v4340_v43 = vld [vmem:[%s5782_s8 + $0xe0] sm:$0xf0]  ;;  %v4335_v45 = vor.u32 %v5127_v37, %v4332_v39 }
  0x48   : > { %1269 = vmatpush.bf16.msra.mxu0 %v4355_v29  ;;  %v4339_v46 = vor.u32 %v5131_v41, %v4338_v40  ;;  %v4306_v47 = vld [vmem:[%s5782_s8 + $0x90] sm:$0xf]  ;;  %v5124_v48 = vld [vmem:[%s5782_s8 + $0xa4] sm:$0xf0]  ;;  %v5121_v49 = vld [vmem:[%s5782_s8 + $0x94] sm:$0xf]  ;;  %v4343_v50 = vor.u32 %v5128_v42, %v4340_v43 }
  0x49   : > { %1318 = vmatpush.bf16.msra.mxu1 %v4359_v33  ;;  %v4308_v51 = vld [vmem:[%s5782_s8 + $0xa8] sm:$0xf0]  ;;  %v4314_v52 = vld [vmem:[%s5782_s8 + $0x98] sm:$0xf]  ;;  %v5125_v53 = vld [vmem:[%s5782_s8 + $0xac] sm:$0xf0]  ;;  %v4307_v56 = vor.u32 %v5124_v48, %v4306_v47 }
  0x4a   : > { %1367 = vmatpush.bf16.msra.mxu2 %v4363_v34  ;;  %1416 = vmatpush.bf16.msra.mxu3 %v4367_v38  ;;  %v5122_v54 = vld [vmem:[%s5782_s8 + $0x9c] sm:$0xf]  ;;  %v4316_v55 = vld [vmem:[%s5782_s8 + $0xb0] sm:$0xf0]  ;;  %v4311_v57 = vor.u32 %v5121_v49, %v4308_v51  ;;  %v4315_v58 = vor.u32 %v5125_v53, %v4314_v52  ;;  %v4282_v59 = vld [vmem:[%s5782_s8 + $0x60] sm:$0xf] }
  0x4b   : > { %v5118_v60 = vld [vmem:[%s5782_s8 + $0x74] sm:$0xf0]  ;;  %v5115_v61 = vld [vmem:[%s5782_s8 + $0x64] sm:$0xf]  ;;  %v4319_v62 = vor.u32 %v5122_v54, %v4316_v55  ;;  %v4284_v63 = vld [vmem:[%s5782_s8 + $0x78] sm:$0xf0] }
  0x4c   : > { %1270 = vmatpush.bf16.msra.mxu0 %v4331_v44  ;;  %v4290_v0 = vld [vmem:[%s5782_s8 + $0x68] sm:$0xf]  ;;  %v5119_v1 = vld [vmem:[%s5782_s8 + $0x7c] sm:$0xf0]  ;;  %v5116_v2 = vld [vmem:[%s5782_s8 + $0x6c] sm:$0xf]  ;;  %v4283_v5 = vor.u32 %v5118_v60, %v4282_v59  ;;  %v4287_v7 = vor.u32 %v5115_v61, %v4284_v63 }
  0x4d   : > { %1319 = vmatpush.bf16.msra.mxu1 %v4335_v45  ;;  %v4292_v3 = vld [vmem:[%s5782_s8 + $0x80] sm:$0xf0]  ;;  %v4291_v8 = vor.u32 %v5119_v1, %v4290_v0  ;;  %v4258_v9 = vld [vmem:[%s5782_s8 + $0x30] sm:$0xf]  ;;  %v5112_v10 = vld [vmem:[%s5782_s8 + $0x44] sm:$0xf0] }
  0x4e   : > { %1368 = vmatpush.bf16.msra.mxu2 %v4339_v46  ;;  %1417 = vmatpush.bf16.msra.mxu3 %v4343_v50  ;;  %v403_v4 = vld [vmem:[%s5790_s5] sm:$0xff]   ;;  %v5109_v11 = vld [vmem:[%s5782_s8 + $0x34] sm:$0xf]  ;;  %v4295_v12 = vor.u32 %v5116_v2, %v4292_v3  ;;  %v4260_v13 = vld [vmem:[%s5782_s8 + $0x48] sm:$0xf0]  ;;  %v4259_v18 = vor.u32 %v5112_v10, %v4258_v9  ;;  %s6018_s14 = scalar_lea.vmem [#allocation7], %s5330_s19 }
  0x4f   : > { %v467_v6 = vunpack.c.l.bf16 %v403_v4  ;;  %v4266_v14 = vld [vmem:[%s5782_s8 + $0x38] sm:$0xf]  ;;  %v5113_v15 = vld [vmem:[%s5782_s8 + $0x4c] sm:$0xf0]  ;;  %v5110_v16 = vld [vmem:[%s5782_s8 + $0x3c] sm:$0xf]  ;;  %v4263_v21 = vor.u32 %v5109_v11, %v4260_v13  ;;  %v468_v30 = vunpack.c.h.bf16 %v403_v4 }
  0x50   : > { %1271 = vmatpush.bf16.msra.mxu0 %v4307_v56  ;;  %v4268_v17 = vld [vmem:[%s5782_s8 + $0x50] sm:$0xf0]  ;;  %v4234_v19 = vld [vmem:[%s5782_s8] sm:$0xf]  ;;  %v5106_v20 = vld [vmem:[%s5782_s8 + $0x14] sm:$0xf0]  ;;  %v4267_v22 = vor.u32 %v5113_v15, %v4266_v14 }
  0x51   : > { %1320 = vmatpush.bf16.msra.mxu1 %v4311_v57  ;;  %531 = vadd.xlane.f32.xlu0 %v467_v6  ;;  %v5103_v23 = vld [vmem:[%s5782_s8 + $0x4] sm:$0xf]  ;;  %v4236_v24 = vld [vmem:[%s5782_s8 + $0x18] sm:$0xf0]  ;;  %v5858_v25 = vld [vmem:[%s5790_s5 + $0x8] sm:$0xff]   ;;  %v4271_v26 = vor.u32 %v5110_v16, %v4268_v17  ;;  %v4235_v35 = vor.u32 %v5106_v20, %v4234_v19  ;;  %s5331_s16 = smul.u32 3072, %s5693_s13 }
  0x52   : > { %1369 = vmatpush.bf16.msra.mxu2 %v4315_v58  ;;  %1418 = vmatpush.bf16.msra.mxu3 %v4319_v62  ;;  %v4242_v27 = vld [vmem:[%s5782_s8 + $0x8] sm:$0xf]  ;;  %v5107_v28 = vld [vmem:[%s5782_s8 + $0x1c] sm:$0xf0]  ;;  %v5104_v29 = vld [vmem:[%s5782_s8 + $0xc] sm:$0xf]  ;;  %v469_v31 = vunpack.c.l.bf16 %v5858_v25  ;;  %v4239_v38 = vor.u32 %v5103_v23, %v4236_v24  ;;  %v470_v60 = vunpack.c.h.bf16 %v5858_v25 }
  0x53   : > { %v4244_v32 = vld [vmem:[%s5782_s8 + $0x20] sm:$0xf0]  ;;  %v4626_v33 = vld [vmem:[%s5782_s8 + $0x2d0] sm:$0xf]  ;;  %v5196_v34 = vld [vmem:[%s5782_s8 + $0x2e4] sm:$0xf0]  ;;  %v4243_v39 = vor.u32 %v5107_v28, %v4242_v27  ;;  %s4088_s13 = scalar_lea.hbm %s7432_s2, %s5331_s16 }
  0x54   : > { %1272 = vmatpush.bf16.msra.mxu0 %v4283_v5  ;;  %v5193_v36 = vld [vmem:[%s5782_s8 + $0x2d4] sm:$0xf]  ;;  %v4628_v37 = vld [vmem:[%s5782_s8 + $0x2e8] sm:$0xf0]  ;;  %535 = vadd.xlane.f32.xlu1 %v469_v31  ;;  %v5870_v40 = vld [vmem:[%s5790_s5] sm:$0xff]  ;;  %v4247_v42 = vor.u32 %v5104_v29, %v4244_v32  ;;  %v4627_v43 = vor.u32 %v5196_v34, %v4626_v33  ;;  %s4089_s4 = sshll.u32 %s6018_s14, 4  ;;  %s4090_s4 = int_to_ptr.vmem [resolvable:$true] %s4089_s4 }
  0x55   : > { %1321 = vmatpush.bf16.msra.mxu1 %v4287_v7  ;;  %v407_v41 = vld [vmem:[%s5790_s5 + $0x10] sm:$0xff]   ;;  %v4418_v44 = vld [vmem:[%s5782_s8 + $0x160] sm:$0xf]  ;;  %v5150_v45 = vld [vmem:[%s5782_s8 + $0x174] sm:$0xf0]  ;;  %v4631_v48 = vor.u32 %v5193_v36, %v4628_v37  ;;  %s4091_s17 = sshll.u32 %s4088_s13, 4  ;;  %s4092_s17 = int_to_ptr.hbm [resolvable:$true] %s4091_s17 }
  0x56   : > { %1370 = vmatpush.bf16.msra.mxu2 %v4291_v8  ;;  %1419 = vmatpush.bf16.msra.mxu3 %v4295_v12  ;;  %v5147_v46 = vld [vmem:[%s5782_s8 + $0x164] sm:$0xf]  ;;  %v471_v47 = vunpack.c.l.bf16 %v407_v41  ;;  %v4420_v49 = vld [vmem:[%s5782_s8 + $0x178] sm:$0xf0]  ;;  %v4602_v50 = vld [vmem:[%s5782_s8 + $0x2a0] sm:$0xf]  ;;  %v4419_v54 = vor.u32 %v5150_v45, %v4418_v44  ;;  %v472_v3 = vunpack.c.h.bf16 %v407_v41 }
  0x57   : > { %v5190_v51 = vld [vmem:[%s5782_s8 + $0x2b4] sm:$0xf0]  ;;  %v5187_v52 = vld [vmem:[%s5782_s8 + $0x2a4] sm:$0xf]  ;;  %v4604_v53 = vld [vmem:[%s5782_s8 + $0x2b8] sm:$0xf0]  ;;  %v4423_v55 = vor.u32 %v5147_v46, %v4420_v49 }
  0x58   : > { %1273 = vmatpush.bf16.msra.mxu0 %v4259_v18  ;;  %539 = vadd.xlane.f32.xlu2 %v471_v47  ;;  %v4603_v56 = vor.u32 %v5190_v51, %v4602_v50  ;;  %v4394_v57 = vld [vmem:[%s5782_s8 + $0x130] sm:$0xf]  ;;  %v5144_v58 = vld [vmem:[%s5782_s8 + $0x144] sm:$0xf0]  ;;  %v4607_v59 = vor.u32 %v5187_v52, %v4604_v53  ;;  %v5141_v61 = vld [vmem:[%s5782_s8 + $0x134] sm:$0xf] }
  0x59   : > { %1322 = vmatpush.bf16.msra.mxu1 %v4263_v21  ;;  %533 = vadd.xlane.f32.xlu0 %v468_v30  ;;  %v4396_v62 = vld [vmem:[%s5782_s8 + $0x148] sm:$0xf0]  ;;  %v4395_v63 = vor.u32 %v5144_v58, %v4394_v57  ;;  %v4578_v0 = vld [vmem:[%s5782_s8 + $0x270] sm:$0xf]  ;;  %v5184_v1 = vld [vmem:[%s5782_s8 + $0x284] sm:$0xf0] }
  0x5a   : > { %1371 = vmatpush.bf16.msra.mxu2 %v4267_v22  ;;  %1420 = vmatpush.bf16.msra.mxu3 %v4271_v26  ;;  %v5181_v2 = vld [vmem:[%s5782_s8 + $0x274] sm:$0xf]  ;;  %v4399_v4 = vor.u32 %v5141_v61, %v4396_v62  ;;  %v4579_v5 = vor.u32 %v5184_v1, %v4578_v0  ;;  %v4580_v6 = vld [vmem:[%s5782_s8 + $0x288] sm:$0xf0]  ;;  %v4370_v7 = vld [vmem:[%s5782_s8 + $0x100] sm:$0xf] }
  0x5b   : > { %v5138_v8 = vld [vmem:[%s5782_s8 + $0x114] sm:$0xf0]  ;;  %v4583_v9 = vor.u32 %v5181_v2, %v4580_v6  ;;  %v5135_v10 = vld [vmem:[%s5782_s8 + $0x104] sm:$0xf]  ;;  %v4372_v11 = vld [vmem:[%s5782_s8 + $0x118] sm:$0xf0] }
  0x5c   : > { %1274 = vmatpush.bf16.msra.mxu0 %v4235_v35  ;;  %537 = vadd.xlane.f32.xlu1 %v470_v60  ;;  %v4371_v12 = vor.u32 %v5138_v8, %v4370_v7  ;;  %v4375_v13 = vor.u32 %v5135_v10, %v4372_v11  ;;  %v5899_v14 = vld [vmem:[%s5790_s5 + $0x8] sm:$0xff]  ;;  %v409_v15 = vld [vmem:[%s5790_s5 + $0x18] sm:$0xff]   ;;  %v4554_v17 = vld [vmem:[%s5782_s8 + $0x240] sm:$0xf]  ;;  %s4076_s23 = scalar_lea.sflag [#allocation4], %s5778_s30  ;;  %s5593_s24 = sshra.s32 %s4092_s17, 4  ;;  %s5594_s24 = int_to_ptr.hbm [resolvable:$true] %s5593_s24 }
  0x5d   : > { %1323 = vmatpush.bf16.msra.mxu1 %v4239_v38  ;;  %v473_v16 = vunpack.c.l.bf16 %v409_v15  ;;  %v5178_v18 = vld [vmem:[%s5782_s8 + $0x254] sm:$0xf0]  ;;  %v5175_v19 = vld [vmem:[%s5782_s8 + $0x244] sm:$0xf]  ;;  %v474_v20 = vunpack.c.h.bf16 %v409_v15  ;;  %v4556_v22 = vld [vmem:[%s5782_s8 + $0x258] sm:$0xf0]  ;;  %p5600_p2 = scmp.lt.s32.totalorder %s5594_s24, %s7432_s2 }
  0x5e   : > { %1372 = vmatpush.bf16.msra.mxu2 %v4243_v39  ;;  %1421 = vmatpush.bf16.msra.mxu3 %v4247_v42  ;;  %v4555_v21 = vor.u32 %v5178_v18, %v4554_v17  ;;  %v4346_v23 = vld [vmem:[%s5782_s8 + $0xd0] sm:$0xf]  ;;  %v5132_v24 = vld [vmem:[%s5782_s8 + $0xe4] sm:$0xf0]  ;;  %v4559_v25 = vor.u32 %v5175_v19, %v4556_v22  ;;  %v5129_v27 = vld [vmem:[%s5782_s8 + $0xd4] sm:$0xf] }
  0x5f   : > { %1275 = vmatmul.bf16.vlgmr.msra.gmra.mxu0 %v5870_v40  ;;  %v4347_v26 = vor.u32 %v5132_v24, %v4346_v23  ;;  %v4348_v28 = vld [vmem:[%s5782_s8 + $0xe8] sm:$0xf0]  ;;  %v5915_v30 = vld [vmem:[%s5790_s5 + $0x10] sm:$0xff]  ;;  %v411_v31 = vld [vmem:[%s5790_s5 + $0x20] sm:$0xff]   ;;  %s5595_s25 = scalar_lea.hbm %s5594_s24, 3072  ;;  %s5599_s6 = scalar_lea.hbm %s7432_s2, 6144 }
  0x60   : > { %1324 = vmatmul.bf16.vlgmr.msra.gmra.mxu1 %v5870_v40  ;;  %1463 = vmatpush.bf16.msrb.mxu0 %v4419_v54  ;;  %v4351_v29 = vor.u32 %v5129_v27, %v4348_v28  ;;  %v475_v32 = vunpack.c.l.bf16 %v411_v31  ;;  %v4530_v33 = vld [vmem:[%s5782_s8 + $0x210] sm:$0xf]  ;;  %v5172_v34 = vld [vmem:[%s5782_s8 + $0x224] sm:$0xf0]  ;;  %v5169_v35 = vld [vmem:[%s5782_s8 + $0x214] sm:$0xf]  ;;  %v476_v36 = vunpack.c.h.bf16 %v411_v31  ;;  %p5596_p6 = scmp.ne.s32.totalorder %s5594_s24, %s5595_s25  ;;  %p5601_p3 = scmp.lt.s32.totalorder %s5599_s6, %s5595_s25 }
  0x61   : > { %1373 = vmatmul.bf16.vlgmr.msra.gmra.mxu2 %v5870_v40  ;;  %1422 = vmatmul.bf16.vlgmr.msra.gmra.mxu3 %v5870_v40  ;;  %v4531_v37 = vor.u32 %v5172_v34, %v4530_v33  ;;  %v4532_v38 = vld [vmem:[%s5782_s8 + $0x228] sm:$0xf0]  ;;  %v4322_v39 = vld [vmem:[%s5782_s8 + $0xa0] sm:$0xf]  ;;  %v5126_v41 = vld [vmem:[%s5782_s8 + $0xb4] sm:$0xf0] }
  0x62   : > { %1849 = vmatpush.bf16.msrb.mxu2 %v4627_v43  ;;  %1898 = vmatpush.bf16.msrb.mxu3 %v4631_v48  ;;  %v4535_v42 = vor.u32 %v5169_v35, %v4532_v38  ;;  %v4323_v43 = vor.u32 %v5126_v41, %v4322_v39  ;;  %v5123_v44 = vld [vmem:[%s5782_s8 + $0xa4] sm:$0xf]  ;;  %v4324_v45 = vld [vmem:[%s5782_s8 + $0xb8] sm:$0xf0]  ;;  %v413_v48 = vld [vmem:[%s5790_s5 + $0x28] sm:$0xff]   ;;  %p5597_p13 = pnand %p5596_p6, %p5718_p11  ;;  %p5602_p4 = por %p5601_p3, %p5600_p2 }
  0x63   : > { %1512 = vmatpush.bf16.msrb.mxu1 %v4423_v55  ;;  %541 = vadd.xlane.f32.xlu2 %v472_v3  ;;  %v4327_v46 = vor.u32 %v5123_v44, %v4324_v45  ;;  %v5931_v47 = vld [vmem:[%s5790_s5 + $0x18] sm:$0xff]  ;;  %v477_v49 = vunpack.c.l.bf16 %v413_v48  ;;  %v4506_v50 = vld [vmem:[%s5782_s8 + $0x1e0] sm:$0xf]  ;;  %v5163_v52 = vld [vmem:[%s5782_s8 + $0x1e4] sm:$0xf]  ;;  %v478_v53 = vunpack.c.h.bf16 %v413_v48 }
  0x64   : > { %1464 = vmatpush.bf16.msrb.mxu0 %v4395_v63  ;;  %543 = vadd.xlane.f32.xlu0 %v473_v16  ;;  %v5166_v51 = vld [vmem:[%s5782_s8 + $0x1f4] sm:$0xf0]  ;;  %v4508_v55 = vld [vmem:[%s5782_s8 + $0x1f8] sm:$0xf0]  ;;  %v5120_v57 = vld [vmem:[%s5782_s8 + $0x84] sm:$0xf0]  ;;  %p5598_p1 = pneg %p5597_p13 }
  0x65   : > { %545 = vadd.xlane.f32.xlu1 %v474_v20  ;;  %v4507_v54 = vor.u32 %v5166_v51, %v4506_v50  ;;  %v4511_v58 = vor.u32 %v5163_v52, %v4508_v55  ;;  %v5117_v60 = vld [vmem:[%s5782_s8 + $0x74] sm:$0xf]  ;;  %v4300_v61 = vld [vmem:[%s5782_s8 + $0x88] sm:$0xf0]  ;;  %v5947_v63 = vld [vmem:[%s5790_s5 + $0x20] sm:$0xff] }
  0x66   : > { %1850 = vmatpush.bf16.msrb.mxu2 %v4603_v56  ;;  %1899 = vmatpush.bf16.msrb.mxu3 %v4607_v59  ;;  %v4298_v56 = vld [vmem:[%s5782_s8 + $0x70] sm:$0xf]  ;;  %v4303_v62 = vor.u32 %v5117_v60, %v4300_v61  ;;  %v5160_v3 = vld [vmem:[%s5782_s8 + $0x1c4] sm:$0xf0]  ;;  %v4484_v7 = vld [vmem:[%s5782_s8 + $0x1c8] sm:$0xf0]  ;;  %p5603_p5 = pnand %p5602_p4, %p5598_p1 }
  0x67   : > { %1513 = vmatpush.bf16.msrb.mxu1 %v4399_v4  ;;  %v4299_v59 = vor.u32 %v5120_v57, %v4298_v56  ;;  %v415_v0 = vld [vmem:[%s5790_s5 + $0x30] sm:$0xff]   ;;  %v4274_v8 = vld [vmem:[%s5782_s8 + $0x40] sm:$0xf]  ;;  %v5963_v16 = vld [vmem:[%s5790_s5 + $0x28] sm:$0xff] }
  0x68   : > { %1465 = vmatpush.bf16.msrb.mxu0 %v4371_v12  ;;  %v479_v1 = vunpack.c.l.bf16 %v415_v0  ;;  %v4482_v2 = vld [vmem:[%s5782_s8 + $0x1b0] sm:$0xf]  ;;  %v5157_v4 = vld [vmem:[%s5782_s8 + $0x1b4] sm:$0xf]  ;;  %v5111_v12 = vld [vmem:[%s5782_s8 + $0x44] sm:$0xf] }
  0x69   : > { %v4483_v6 = vor.u32 %v5160_v3, %v4482_v2  ;;  %v4487_v10 = vor.u32 %v5157_v4, %v4484_v7  ;;  %v417_v17 = vld [vmem:[%s5790_s5 + $0x38] sm:$0xff]   ;;  %v4458_v20 = vld [vmem:[%s5782_s8 + $0x180] sm:$0xf]  ;;  %v5151_v22 = vld [vmem:[%s5782_s8 + $0x184] sm:$0xf] }
  0x6a   : > { %1851 = vmatpush.bf16.msrb.mxu2 %v4579_v5  ;;  %1900 = vmatpush.bf16.msrb.mxu3 %v4583_v9  ;;  %v480_v5 = vunpack.c.h.bf16 %v415_v0  ;;  %v5114_v9 = vld [vmem:[%s5782_s8 + $0x54] sm:$0xf0]  ;;  %v481_v18 = vunpack.c.l.bf16 %v417_v17  ;;  %v482_v19 = vunpack.c.h.bf16 %v417_v17  ;;  %v4460_v24 = vld [vmem:[%s5782_s8 + $0x198] sm:$0xf0]  ;;  %v4250_v27 = vld [vmem:[%s5782_s8 + $0x10] sm:$0xf] }
  0x6b   : > { %1514 = vmatpush.bf16.msrb.mxu1 %v4375_v13  ;;  %547 = vadd.xlane.f32.xlu2 %v475_v32  ;;  %v4275_v11 = vor.u32 %v5114_v9, %v4274_v8  ;;  %v4276_v13 = vld [vmem:[%s5782_s8 + $0x58] sm:$0xf0]  ;;  %v5108_v28 = vld [vmem:[%s5782_s8 + $0x24] sm:$0xf0]  ;;  %v4252_v32 = vld [vmem:[%s5782_s8 + $0x28] sm:$0xf0] }
  0x6c   : > { %1466 = vmatpush.bf16.msrb.mxu0 %v4347_v26  ;;  %549 = vadd.xlane.f32.xlu0 %v476_v36  ;;  %v4279_v15 = vor.u32 %v5111_v12, %v4276_v13  ;;  %v5975_v26 = vld [vmem:[%s5790_s5 + $0x30] sm:$0xff]  ;;  %v4251_v31 = vor.u32 %v5108_v28, %v4250_v27  ;;  %v419_v34 = vld [vmem:[%s5790_s5 + $0x40] sm:$0xff]   ;;  %v4644_v41 = vld [vmem:[%s5782_s8 + $0x2f8] sm:$0xf0] }
  0x6d   : > { %551 = vadd.xlane.f32.xlu1 %v477_v49  ;;  %v483_v35 = vunpack.c.l.bf16 %v419_v34  ;;  %v4642_v36 = vld [vmem:[%s5782_s8 + $0x2e0] sm:$0xf]  ;;  %v5195_v38 = vld [vmem:[%s5782_s8 + $0x2e4] sm:$0xf]  ;;  %v484_v45 = vunpack.c.h.bf16 %v419_v34  ;;  %v5197_v48 = vld [vmem:[%s5782_s8 + $0x2ec] sm:$0xf0] }
  0x6e   : > { %1852 = vmatpush.bf16.msrb.mxu2 %v4555_v21  ;;  %1901 = vmatpush.bf16.msrb.mxu3 %v4559_v25  ;;  %v5154_v21 = vld [vmem:[%s5782_s8 + $0x194] sm:$0xf0]  ;;  %v4463_v25 = vor.u32 %v5151_v22, %v4460_v24  ;;  %v5194_v49 = vld [vmem:[%s5782_s8 + $0x2dc] sm:$0xf]  ;;  %v4636_v51 = vld [vmem:[%s5782_s8 + $0x2f0] sm:$0xf0] }
  0x6f   : > { %1280 = vmatmul.bf16.gmra.mxu0 %v5899_v14  ;;  %1515 = vmatpush.bf16.msrb.mxu1 %v4351_v29  ;;  %v4459_v23 = vor.u32 %v5154_v21, %v4458_v20  ;;  %v5105_v29 = vld [vmem:[%s5782_s8 + $0x14] sm:$0xf]  ;;  %v5995_v52 = vld [vmem:[%s5790_s5 + $0x38] sm:$0xff]  ;;  %v4618_v61 = vld [vmem:[%s5782_s8 + $0x2b0] sm:$0xf] }
  0x70   : > { %1329 = vmatmul.bf16.gmra.mxu1 %v5899_v14  ;;  %1467 = vmatpush.bf16.msrb.mxu0 %v4323_v43  ;;  %v4255_v33 = vor.u32 %v5105_v29, %v4252_v32  ;;  %v4620_v2 = vld [vmem:[%s5782_s8 + $0x2c8] sm:$0xf0]  ;;  %v5191_v12 = vld [vmem:[%s5782_s8 + $0x2bc] sm:$0xf0]  ;;  %v4612_v17 = vld [vmem:[%s5782_s8 + $0x2c0] sm:$0xf0] }
  0x71   : > { %1378 = vmatmul.bf16.gmra.mxu2 %v5899_v14  ;;  %1427 = vmatmul.bf16.gmra.mxu3 %v5899_v14  ;;  %v6014_v20 = vld [vmem:[%s5790_s5 + $0x40] sm:$0xff]  ;;  %v423_v29 = vld [vmem:[%s5790_s5 + $0x50] sm:$0xff]  }
  0x72   : > { %1853 = vmatpush.bf16.msrb.mxu2 %v4531_v37  ;;  %1902 = vmatpush.bf16.msrb.mxu3 %v4535_v42  ;;  %v5198_v37 = vld [vmem:[%s5782_s8 + $0x2f4] sm:$0xf0]  ;;  %v4647_v42 = vor.u32 %v5195_v38, %v4644_v41  ;;  %v4594_v34 = vld [vmem:[%s5782_s8 + $0x280] sm:$0xf]  ;;  %v4596_v38 = vld [vmem:[%s5782_s8 + $0x298] sm:$0xf0] }
  0x73   : > { %1516 = vmatpush.bf16.msrb.mxu1 %v4327_v46  ;;  %553 = vadd.xlane.f32.xlu2 %v478_v53  ;;  %v4643_v39 = vor.u32 %v5198_v37, %v4642_v36  ;;  %v4634_v46 = vld [vmem:[%s5782_s8 + $0x2d8] sm:$0xf]  ;;  %v4639_v53 = vor.u32 %v5194_v49, %v4636_v51  ;;  %v5183_v36 = vld [vmem:[%s5782_s8 + $0x284] sm:$0xf] }
  0x74   : > { %1468 = vmatpush.bf16.msrb.mxu0 %v4299_v59  ;;  %555 = vadd.xlane.f32.xlu0 %v479_v1  ;;  %v4635_v50 = vor.u32 %v5197_v48, %v4634_v46  ;;  %v5189_v1 = vld [vmem:[%s5782_s8 + $0x2b4] sm:$0xf] }
  0x75   : > { %557 = vadd.xlane.f32.xlu1 %v480_v5  ;;  %v4623_v3 = vor.u32 %v5189_v1, %v4620_v2 }
  0x76   : > { %1854 = vmatpush.bf16.msrb.mxu2 %v4507_v54  ;;  %1903 = vmatpush.bf16.msrb.mxu3 %v4511_v58  ;;  %v421_v58 = vld [vmem:[%s5790_s5 + $0x48] sm:$0xff]  }
  0x77   : > { %1517 = vmatpush.bf16.msrb.mxu1 %v4303_v62  ;;  %v485_v59 = vunpack.c.l.bf16 %v421_v58  ;;  %v5192_v62 = vld [vmem:[%s5782_s8 + $0x2c4] sm:$0xf0]  ;;  %v486_v7 = vunpack.c.h.bf16 %v421_v58  ;;  %v5185_v58 = vld [vmem:[%s5782_s8 + $0x28c] sm:$0xf0] }
  0x78   : > { %1469 = vmatpush.bf16.msrb.mxu0 %v4275_v11  ;;  %v4619_v0 = vor.u32 %v5192_v62, %v4618_v61  ;;  %v4610_v11 = vld [vmem:[%s5782_s8 + $0x2a8] sm:$0xf]  ;;  %v4588_v61 = vld [vmem:[%s5782_s8 + $0x290] sm:$0xf0] }
  0x79   : > { %v4611_v13 = vor.u32 %v5191_v12, %v4610_v11 }
  0x7a   : > { %1855 = vmatpush.bf16.msrb.mxu2 %v4483_v6  ;;  %1904 = vmatpush.bf16.msrb.mxu3 %v4487_v10 }
  0x7b   : > { %1518 = vmatpush.bf16.msrb.mxu1 %v4279_v15  ;;  %559 = vadd.xlane.f32.xlu2 %v481_v18  ;;  %v5188_v15 = vld [vmem:[%s5782_s8 + $0x2ac] sm:$0xf] }
  0x7c   : > { %561 = vadd.xlane.f32.xlu0 %v482_v19  ;;  %1470 = vmatpush.bf16.msrb.mxu0 %v4251_v31  ;;  %v4615_v18 = vor.u32 %v5188_v15, %v4612_v17  ;;  %v487_v31 = vunpack.c.l.bf16 %v423_v29 }
  0x7d   : > { %563 = vadd.xlane.f32.xlu1 %v483_v35  ;;  %v5186_v35 = vld [vmem:[%s5782_s8 + $0x294] sm:$0xf0] }
  0x7e   : > { %1856 = vmatpush.bf16.msrb.mxu2 %v4459_v23  ;;  %1905 = vmatpush.bf16.msrb.mxu3 %v4463_v25  ;;  %v4595_v37 = vor.u32 %v5186_v35, %v4594_v34 }
  0x7f   : > { %1285 = vmatmul.bf16.gmra.mxu0 %v5915_v30  ;;  %1519 = vmatpush.bf16.msrb.mxu1 %v4255_v33 }
  0x80   : > { %1334 = vmatmul.bf16.gmra.mxu1 %v5915_v30  ;;  %1947 = vmatpush.bf16.msra.mxu0 %v4635_v50 }
  0x81   : > { %1383 = vmatmul.bf16.gmra.mxu2 %v5915_v30  ;;  %1432 = vmatmul.bf16.gmra.mxu3 %v5915_v30 }
  0x82   : > { %2045 = vmatpush.bf16.msra.mxu2 %v4643_v39  ;;  %2094 = vmatpush.bf16.msra.mxu3 %v4647_v42 }
  0x83   : > { %565 = vadd.xlane.f32.xlu2 %v484_v45  ;;  %1996 = vmatpush.bf16.msra.mxu1 %v4639_v53  ;;  %v488_v53 = vunpack.c.h.bf16 %v423_v29 }
  0x84   : > { %567 = vadd.xlane.f32.xlu0 %v485_v59  ;;  %1948 = vmatpush.bf16.msra.mxu0 %v4611_v13  ;;  %v425_v13 = vld [vmem:[%s5790_s5 + $0x58] sm:$0xff]  }
  0x85   : > { %569 = vadd.xlane.f32.xlu1 %v486_v7  ;;  %v489_v15 = vunpack.c.l.bf16 %v425_v13 }
  0x86   : > { %2046 = vmatpush.bf16.msra.mxu2 %v4619_v0  ;;  %2095 = vmatpush.bf16.msra.mxu3 %v4623_v3 }
  0x87   : > { %1997 = vmatpush.bf16.msra.mxu1 %v4615_v18 }
  0x8a   : > { %2047 = vmatpush.bf16.msra.mxu2 %v4595_v37 }
  0x8b   : > { %571 = vadd.xlane.f32.xlu2 %v487_v31 }
  0x8c   : > { %573 = vadd.xlane.f32.xlu0 %v488_v53 }
  0x8d   : > { %575 = vadd.xlane.f32.xlu1 %v489_v15 }
  0x8f   : > { %1290 = vmatmul.bf16.gmra.mxu0 %v5931_v47 }
  0x90   : > { %1339 = vmatmul.bf16.gmra.mxu1 %v5931_v47 }
  0x91   : > { %1388 = vmatmul.bf16.gmra.mxu2 %v5931_v47  ;;  %1437 = vmatmul.bf16.gmra.mxu3 %v5931_v47 }
  0x9f   : > { %1295 = vmatmul.bf16.gmra.mxu0 %v5947_v63 }
  0xa0   : > { %1344 = vmatmul.bf16.gmra.mxu1 %v5947_v63 }
  0xa1   : > { %1393 = vmatmul.bf16.gmra.mxu2 %v5947_v63  ;;  %1442 = vmatmul.bf16.gmra.mxu3 %v5947_v63 }
  0xaf   : > { %1300 = vmatmul.bf16.gmra.mxu0 %v5963_v16 }
  0xb0   : > { %1349 = vmatmul.bf16.gmra.mxu1 %v5963_v16 }
  0xb1   : > { %1398 = vmatmul.bf16.gmra.mxu2 %v5963_v16  ;;  %1447 = vmatmul.bf16.gmra.mxu3 %v5963_v16 }
  0xbf   : > { %1305 = vmatmul.bf16.gmra.mxu0 %v5975_v26 }
  0xc0   : > { %1354 = vmatmul.bf16.gmra.mxu1 %v5975_v26 }
  0xc1   : > { %1403 = vmatmul.bf16.gmra.mxu2 %v5975_v26  ;;  %1452 = vmatmul.bf16.gmra.mxu3 %v5975_v26 }
  0xc4   : > { %v532_v43 = vpop.xlane.xlu0 %531 }
  0xc5   : > { %v659_v44 = vadd.f32 1.0, %v532_v43 }
  0xc7   : > { %5389 = vrcp.f32 %v659_v44  ;;  %v536_v57 = vpop.xlane.xlu1 %535 }
  0xc8   : > { %v661_v4 = vadd.f32 1.0, %v536_v57  ;;  %v4586_v57 = vld [vmem:[%s5782_s8 + $0x278] sm:$0xf] }
  0xc9   : > { %v4587_v59 = vor.u32 %v5185_v58, %v4586_v57  ;;  %v6085_v57 = vld [vmem:[%s5790_s5 + $0x50] sm:$0xff] }
  0xcb   : > { %v540_v28 = vpop.xlane.xlu2 %539  ;;  %1949 = vmatpush.bf16.msra.mxu0 %v4587_v59 }
  0xcc   : > { %v534_v54 = vpop.xlane.xlu0 %533 }
  0xcd   : > { %v5390_v55 = vpop.eup %5389  ;;  %v660_v56 = vadd.f32 1.0, %v534_v54 }
  0xce   : > { %v787_v60 = vmul.f32 %v5390_v55, %v659_v44  ;;  %v663_v44 = vadd.f32 1.0, %v540_v28 }
  0xcf   : > { %1310 = vmatmul.bf16.gmra.mxu0 %v5995_v52  ;;  %5391 = vrcp.f32 %v660_v56  ;;  %v538_v10 = vpop.xlane.xlu1 %537 }
  0xd0   : > { %1359 = vmatmul.bf16.gmra.mxu1 %v5995_v52  ;;  %v851_v5 = vsub.f32 2.0, %v787_v60  ;;  %5393 = vrcp.f32 %v661_v4  ;;  %v662_v21 = vadd.f32 1.0, %v538_v10  ;;  %v5182_v60 = vld [vmem:[%s5782_s8 + $0x27c] sm:$0xf] }
  0xd1   : > { %1408 = vmatmul.bf16.gmra.mxu2 %v5995_v52  ;;  %1457 = vmatmul.bf16.gmra.mxu3 %v5995_v52  ;;  %v4591_v0 = vor.u32 %v5182_v60, %v4588_v61 }
  0xd2   : > { %v6007_v8 = vmul.f32 %v5390_v55, %v851_v5  ;;  %5395 = vrcp.f32 %v662_v21 }
  0xd3   : > { %5397 = vrcp.f32 %v663_v44  ;;  %1998 = vmatpush.bf16.msra.mxu1 %v4591_v0 }
  0xd5   : > { %v5392_v6 = vpop.eup %5391 }
  0xd6   : > { %v788_v9 = vmul.f32 %v5392_v6, %v660_v56  ;;  %v5394_v25 = vpop.eup %5393  ;;  %v542_v56 = vpop.xlane.xlu2 %541 }
  0xd7   : > { %v789_v33 = vmul.f32 %v5394_v25, %v661_v4  ;;  %v6049_v4 = vld [vmem:[%s5790_s5 + $0x48] sm:$0xff]  ;;  %v664_v5 = vadd.f32 1.0, %v542_v56 }
  0xd8   : > { %v852_v22 = vsub.f32 2.0, %v788_v9  ;;  %v5396_v50 = vpop.eup %5395 }
  0xd9   : > { %v853_v45 = vsub.f32 2.0, %v789_v33  ;;  %v790_v55 = vmul.f32 %v5396_v50, %v662_v21  ;;  %v5398_v11 = vpop.eup %5397  ;;  %5399 = vrcp.f32 %v664_v5  ;;  %v4570_v21 = vld [vmem:[%s5782_s8 + $0x250] sm:$0xf] }
  0xda   : > { %v6026_v32 = vmul.f32 %v5392_v6, %v852_v22  ;;  %v791_v18 = vmul.f32 %v5398_v11, %v663_v44  ;;  %v5180_v22 = vld [vmem:[%s5782_s8 + $0x264] sm:$0xf0] }
  0xdb   : > { %v6040_v54 = vmul.f32 %v5394_v25, %v853_v45  ;;  %v854_v6 = vsub.f32 2.0, %v790_v55  ;;  %v4572_v25 = vld [vmem:[%s5782_s8 + $0x268] sm:$0xf0]  ;;  %v4562_v44 = vld [vmem:[%s5782_s8 + $0x248] sm:$0xf] }
  0xdc   : > { %v1276_v19 = vpop.f32.mrf.mxu0  ;;  %v855_v34 = vsub.f32 2.0, %v791_v18  ;;  %v5179_v45 = vld [vmem:[%s5782_s8 + $0x25c] sm:$0xf0] }
  0xdd   : > { %v3307_v23 = vmul.f32 %v1276_v19, %v6007_v8  ;;  %v1325_v24 = vpop.f32.mrf.mxu1  ;;  %v6061_v17 = vmul.f32 %v5396_v50, %v854_v6  ;;  %v544_v19 = vpop.xlane.xlu0 %543 }
  0xde   : > { %v3308_v27 = vmul.f32 %v1325_v24, %v6007_v8  ;;  %v5177_v24 = vld [vmem:[%s5782_s8 + $0x254] sm:$0xf]  ;;  %v665_v33 = vadd.f32 1.0, %v544_v19 }
  0xdf   : > { %3691 = vst [vmem:[%s6018_s14] sm:$0xff] %v3307_v23  ;;  %1471 = vmatmul.bf16.vlgmr.msrb.gmra.mxu0 %v5870_v40  ;;  %v4571_v23 = vor.u32 %v5180_v22, %v4570_v21 }
  0xe0   : > { %3692 = vst [vmem:[%s6018_s14 + $0x8] sm:$0xff] %v3308_v27  ;;  %1520 = vmatmul.bf16.vlgmr.msrb.gmra.mxu1 %v5870_v40  ;;  %v4599_v40 = vor.u32 %v5183_v36, %v4596_v38  ;;  %v4575_v27 = vor.u32 %v5177_v24, %v4572_v25  ;;  %v5400_v38 = vpop.eup %5399  ;;  %5401 = vrcp.f32 %v665_v33 }
  0xe1   : > { %1857 = vmatmul.bf16.vlgmr.msrb.gmra.mxu2 %v6014_v20  ;;  %1906 = vmatmul.bf16.vlgmr.msrb.gmra.mxu3 %v6014_v20 }
  0xe2   : > { %2096 = vmatpush.bf16.msra.mxu3 %v4599_v40  ;;  %2048 = vmatpush.bf16.msra.mxu2 %v4571_v23  ;;  %v490_v40 = vunpack.c.h.bf16 %v425_v13  ;;  %v4548_v13 = vld [vmem:[%s5782_s8 + $0x238] sm:$0xf0] }
  0xe4   : > { %v1374_v39 = vpop.f32.mrf.mxu2  ;;  %v1423_v42 = vpop.f32.mrf.mxu3  ;;  %577 = vadd.xlane.f32.xlu2 %v490_v40 }
  0xe5   : > { %v3309_v41 = vmul.f32 %v1374_v39, %v6007_v8  ;;  %v1278_v43 = vpop.f32.mrf.mxu0  ;;  %v3310_v46 = vmul.f32 %v1423_v42, %v6007_v8  ;;  %v1327_v49 = vpop.f32.mrf.mxu1  ;;  %v792_v42 = vmul.f32 %v5400_v38, %v664_v5 }
  0xe6   : > { %v3313_v48 = vmul.f32 %v1278_v43, %v6026_v32  ;;  %v3314_v51 = vmul.f32 %v1327_v49, %v6026_v32  ;;  %2097 = vmatpush.bf16.msra.mxu3 %v4575_v27  ;;  %v546_v43 = vpop.xlane.xlu1 %545  ;;  %v4564_v49 = vld [vmem:[%s5782_s8 + $0x260] sm:$0xf0]  ;;  %v5402_v0 = vpop.eup %5401 }
  0xe7   : > { %3693 = vst [vmem:[%s6018_s14 + $0x10] sm:$0xff] %v3309_v41  ;;  %v6076_v41 = vmul.f32 %v5398_v11, %v855_v34  ;;  %v666_v58 = vadd.f32 1.0, %v546_v43  ;;  %v856_v59 = vsub.f32 2.0, %v792_v42  ;;  %v793_v6 = vmul.f32 %v5402_v0, %v665_v33  ;;  %v550_v34 = vpop.xlane.xlu0 %549 }
  0xe8   : > { %3694 = vst [vmem:[%s6018_s14 + $0x18] sm:$0xff] %v3310_v46  ;;  %v4563_v46 = vor.u32 %v5179_v45, %v4562_v44 }
  0xe9   : > { %3697 = vst [vmem:[%s6018_s14 + $0x30] sm:$0xff] %v3313_v48  ;;  %v5176_v48 = vld [vmem:[%s5782_s8 + $0x24c] sm:$0xf]  ;;  %5403 = vrcp.f32 %v666_v58  ;;  %v6097_v5 = vmul.f32 %v5400_v38, %v856_v59  ;;  %v857_v24 = vsub.f32 2.0, %v793_v6  ;;  %v5170_v38 = vld [vmem:[%s5782_s8 + $0x21c] sm:$0xf] }
  0xea   : > { %3698 = vst [vmem:[%s6018_s14 + $0x38] sm:$0xff] %v3314_v51  ;;  %v4567_v51 = vor.u32 %v5176_v48, %v4564_v49  ;;  %1950 = vmatpush.bf16.msra.mxu0 %v4563_v46  ;;  %v6121_v46 = vld [vmem:[%s5790_s5 + $0x58] sm:$0xff]  ;;  %v668_v48 = vadd.f32 1.0, %v550_v34  ;;  %v4524_v6 = vld [vmem:[%s5782_s8 + $0x208] sm:$0xf0] }
  0xec   : > { %v1376_v62 = vpop.f32.mrf.mxu2  ;;  %v1425_v2 = vpop.f32.mrf.mxu3  ;;  %1999 = vmatpush.bf16.msra.mxu1 %v4567_v51 }
  0xed   : > { %v3315_v1 = vmul.f32 %v1376_v62, %v6026_v32  ;;  %v1281_v3 = vpop.f32.mrf.mxu0  ;;  %v3316_v7 = vmul.f32 %v1425_v2, %v6026_v32  ;;  %v1330_v10 = vpop.f32.mrf.mxu1  ;;  %v427_v2 = vld [vmem:[%s5790_s5 + $0x60] sm:$0xff]  }
  0xee   : > { %v3319_v9 = vmul.f32 %v1281_v3, %v6040_v54  ;;  %v3320_v12 = vmul.f32 %v1330_v10, %v6040_v54  ;;  %v491_v3 = vunpack.c.l.bf16 %v427_v2  ;;  %v5174_v10 = vld [vmem:[%s5782_s8 + $0x234] sm:$0xf0] }
  0xef   : > { %3699 = vst [vmem:[%s6018_s14 + $0x40] sm:$0xff] %v3315_v1  ;;  %1476 = vmatmul.bf16.gmra.mxu0 %v5899_v14  ;;  %v5404_v27 = vpop.eup %5403 }
  0xf0   : > { %3700 = vst [vmem:[%s6018_s14 + $0x48] sm:$0xff] %v3316_v7  ;;  %1525 = vmatmul.bf16.gmra.mxu1 %v5899_v14  ;;  %v548_v7 = vpop.xlane.xlu2 %547  ;;  %579 = vadd.xlane.f32.xlu0 %v491_v3  ;;  %v794_v33 = vmul.f32 %v5404_v27, %v666_v58  ;;  %v429_v58 = vld [vmem:[%s5790_s5 + $0x68] sm:$0xff]   ;;  %v5165_v3 = vld [vmem:[%s5782_s8 + $0x1f4] sm:$0xf] }
  0xf1   : > { %3703 = vst [vmem:[%s6018_s14 + $0x60] sm:$0xff] %v3319_v9  ;;  %1862 = vmatmul.bf16.gmra.mxu2 %v6049_v4  ;;  %1911 = vmatmul.bf16.gmra.mxu3 %v6049_v4  ;;  %v4546_v9 = vld [vmem:[%s5782_s8 + $0x220] sm:$0xf]  ;;  %v667_v22 = vadd.f32 1.0, %v548_v7  ;;  %v493_v59 = vunpack.c.l.bf16 %v429_v58  ;;  %v4527_v7 = vor.u32 %v5165_v3, %v4524_v6 }
  0xf2   : > { %3704 = vst [vmem:[%s6018_s14 + $0x68] sm:$0xff] %v3320_v12  ;;  %v4547_v11 = vor.u32 %v5174_v10, %v4546_v9  ;;  %v5171_v12 = vld [vmem:[%s5782_s8 + $0x224] sm:$0xf]  ;;  %v858_v49 = vsub.f32 2.0, %v794_v33 }
  0xf3   : > { %v4551_v15 = vor.u32 %v5171_v12, %v4548_v13  ;;  %5405 = vrcp.f32 %v667_v22  ;;  %583 = vadd.xlane.f32.xlu2 %v493_v59  ;;  %v4516_v33 = vld [vmem:[%s5782_s8 + $0x200] sm:$0xf0]  ;;  %v5162_v59 = vld [vmem:[%s5782_s8 + $0x1d4] sm:$0xf0] }
  0xf4   : > { %v1379_v14 = vpop.f32.mrf.mxu2  ;;  %v1428_v29 = vpop.f32.mrf.mxu3  ;;  %2049 = vmatpush.bf16.msra.mxu2 %v4547_v11  ;;  %5407 = vrcp.f32 %v668_v48 }
  0xf5   : > { %v3321_v28 = vmul.f32 %v1379_v14, %v6040_v54  ;;  %v1283_v31 = vpop.f32.mrf.mxu0  ;;  %v3322_v35 = vmul.f32 %v1428_v29, %v6040_v54  ;;  %v1332_v37 = vpop.f32.mrf.mxu1  ;;  %2098 = vmatpush.bf16.msra.mxu3 %v4551_v15  ;;  %v492_v29 = vunpack.c.h.bf16 %v427_v2 }
  0xf6   : > { %v3325_v36 = vmul.f32 %v1283_v31, %v6061_v17  ;;  %v3326_v39 = vmul.f32 %v1332_v37, %v6061_v17  ;;  %v6112_v31 = vmul.f32 %v5402_v0, %v857_v24  ;;  %v4522_v0 = vld [vmem:[%s5782_s8 + $0x1f0] sm:$0xf] }
  0xf7   : > { %3705 = vst [vmem:[%s6018_s14 + $0x70] sm:$0xff] %v3321_v28  ;;  %581 = vadd.xlane.f32.xlu1 %v492_v29  ;;  %v5164_v29 = vld [vmem:[%s5782_s8 + $0x1ec] sm:$0xf] }
  0xf8   : > { %3706 = vst [vmem:[%s6018_s14 + $0x78] sm:$0xff] %v3322_v35  ;;  %v4538_v35 = vld [vmem:[%s5782_s8 + $0x218] sm:$0xf] }
  0xf9   : > { %3709 = vst [vmem:[%s6018_s14 + $0x90] sm:$0xff] %v3325_v36  ;;  %v5173_v36 = vld [vmem:[%s5782_s8 + $0x22c] sm:$0xf0]  ;;  %2099 = vmatpush.bf16.msra.mxu3 %v4527_v7 }
  0xfa   : > { %3710 = vst [vmem:[%s6018_s14 + $0x98] sm:$0xff] %v3326_v39  ;;  %v4539_v37 = vor.u32 %v5173_v36, %v4538_v35  ;;  %v4540_v39 = vld [vmem:[%s5782_s8 + $0x230] sm:$0xf0]  ;;  %v4519_v35 = vor.u32 %v5164_v29, %v4516_v33 }
  0xfb   : > { %v4543_v42 = vor.u32 %v5170_v38, %v4540_v39  ;;  %v6157_v39 = vld [vmem:[%s5790_s5 + $0x60] sm:$0xff] }
  0xfc   : > { %v1381_v50 = vpop.f32.mrf.mxu2  ;;  %v1430_v55 = vpop.f32.mrf.mxu3  ;;  %1951 = vmatpush.bf16.msra.mxu0 %v4539_v37 }
  0xfd   : > { %v3327_v53 = vmul.f32 %v1381_v50, %v6061_v17  ;;  %v1286_v56 = vpop.f32.mrf.mxu0  ;;  %v3328_v60 = vmul.f32 %v1430_v55, %v6061_v17  ;;  %v1335_v62 = vpop.f32.mrf.mxu1  ;;  %2000 = vmatpush.bf16.msra.mxu1 %v4543_v42 }
  0xfe   : > { %v3331_v61 = vmul.f32 %v1286_v56, %v6076_v41  ;;  %v3332_v1 = vmul.f32 %v1335_v62, %v6076_v41  ;;  %v5406_v55 = vpop.eup %5405  ;;  %v552_v62 = vpop.xlane.xlu1 %551 }
  0xff   : > { %3711 = vst [vmem:[%s6018_s14 + $0xa0] sm:$0xff] %v3327_v53  ;;  %1481 = vmatmul.bf16.gmra.mxu0 %v5915_v30  ;;  %v669_v12 = vadd.f32 1.0, %v552_v62  ;;  %v5159_v62 = vld [vmem:[%s5782_s8 + $0x1c4] sm:$0xf] }
 0x100   : > { %3712 = vst [vmem:[%s6018_s14 + $0xa8] sm:$0xff] %v3328_v60  ;;  %1530 = vmatmul.bf16.gmra.mxu1 %v5915_v30  ;;  %v6133_v60 = vmul.f32 %v5404_v27, %v858_v49  ;;  %v5167_v27 = vld [vmem:[%s5782_s8 + $0x1fc] sm:$0xf0] }
 0x101   : > { %3715 = vst [vmem:[%s6018_s14 + $0xc0] sm:$0xff] %v3331_v61  ;;  %1867 = vmatmul.bf16.gmra.mxu2 %v6085_v57  ;;  %1916 = vmatmul.bf16.gmra.mxu3 %v6085_v57  ;;  %v795_v61 = vmul.f32 %v5406_v55, %v667_v22  ;;  %5409 = vrcp.f32 %v669_v12  ;;  %v494_v22 = vunpack.c.h.bf16 %v429_v58  ;;  %v4498_v58 = vld [vmem:[%s5782_s8 + $0x1c0] sm:$0xf] }
 0x102   : > { %3716 = vst [vmem:[%s6018_s14 + $0xc8] sm:$0xff] %v3332_v1  ;;  %v5168_v1 = vld [vmem:[%s5782_s8 + $0x204] sm:$0xf0]  ;;  %2001 = vmatpush.bf16.msra.mxu1 %v4519_v35 }
 0x103   : > { %v4523_v2 = vor.u32 %v5168_v1, %v4522_v0  ;;  %585 = vadd.xlane.f32.xlu0 %v494_v22  ;;  %v4500_v0 = vld [vmem:[%s5782_s8 + $0x1d8] sm:$0xf0]  ;;  %v5161_v22 = vld [vmem:[%s5782_s8 + $0x1cc] sm:$0xf0]  ;;  %v6193_v35 = vld [vmem:[%s5790_s5 + $0x68] sm:$0xff] }
 0x104   : > { %v1384_v30 = vpop.f32.mrf.mxu2  ;;  %v1433_v19 = vpop.f32.mrf.mxu3  ;;  %v4503_v1 = vor.u32 %v5159_v62, %v4500_v0 }
 0x105   : > { %v3333_v18 = vmul.f32 %v1384_v30, %v6076_v41  ;;  %v1288_v21 = vpop.f32.mrf.mxu0  ;;  %v3334_v23 = vmul.f32 %v1433_v19, %v6076_v41  ;;  %v1337_v14 = vpop.f32.mrf.mxu1  ;;  %2050 = vmatpush.bf16.msra.mxu2 %v4523_v2  ;;  %v859_v30 = vsub.f32 2.0, %v795_v61  ;;  %v4499_v61 = vor.u32 %v5162_v59, %v4498_v58  ;;  %v5153_v59 = vld [vmem:[%s5782_s8 + $0x194] sm:$0xf] }
 0x106   : > { %v3337_v25 = vmul.f32 %v1288_v21, %v6097_v5  ;;  %v3338_v28 = vmul.f32 %v1337_v14, %v6097_v5  ;;  %v5408_v19 = vpop.eup %5407  ;;  %v4514_v14 = vld [vmem:[%s5782_s8 + $0x1e8] sm:$0xf]  ;;  %2100 = vmatpush.bf16.msra.mxu3 %v4503_v1 }
 0x107   : > { %3717 = vst [vmem:[%s6018_s14 + $0xd0] sm:$0xff] %v3333_v18  ;;  %v796_v24 = vmul.f32 %v5408_v19, %v668_v48  ;;  %v5410_v48 = vpop.eup %5409 }
 0x108   : > { %3718 = vst [vmem:[%s6018_s14 + $0xd8] sm:$0xff] %v3334_v23  ;;  %v6148_v23 = vmul.f32 %v5406_v55, %v859_v30  ;;  %v797_v55 = vmul.f32 %v5410_v48, %v669_v12 }
 0x109   : > { %3721 = vst [vmem:[%s6018_s14 + $0xf0] sm:$0xff] %v3337_v25  ;;  %v554_v25 = vpop.xlane.xlu2 %553  ;;  %v860_v42 = vsub.f32 2.0, %v796_v24  ;;  %2051 = vmatpush.bf16.msra.mxu2 %v4499_v61  ;;  %v4476_v61 = vld [vmem:[%s5782_s8 + $0x1a8] sm:$0xf0] }
 0x10a   : > { %3722 = vst [vmem:[%s6018_s14 + $0xf8] sm:$0xff] %v3338_v28  ;;  %v4515_v28 = vor.u32 %v5167_v27, %v4514_v14  ;;  %v4492_v14 = vld [vmem:[%s5782_s8 + $0x1d0] sm:$0xf0]  ;;  %v4479_v62 = vor.u32 %v5153_v59, %v4476_v61 }
 0x10c   : > { %v1386_v40 = vpop.f32.mrf.mxu2  ;;  %v1435_v44 = vpop.f32.mrf.mxu3  ;;  %1952 = vmatpush.bf16.msra.mxu0 %v4515_v28  ;;  %2101 = vmatpush.bf16.msra.mxu3 %v4479_v62 }
 0x10d   : > { %v3339_v43 = vmul.f32 %v1386_v40, %v6097_v5  ;;  %v1291_v45 = vpop.f32.mrf.mxu0  ;;  %v3340_v50 = vmul.f32 %v1435_v44, %v6097_v5  ;;  %v1340_v53 = vpop.f32.mrf.mxu1  ;;  %v670_v40 = vadd.f32 1.0, %v554_v25  ;;  %v5158_v25 = vld [vmem:[%s5782_s8 + $0x1bc] sm:$0xf] }
 0x10e   : > { %v3343_v51 = vmul.f32 %v1291_v45, %v6112_v31  ;;  %v3344_v56 = vmul.f32 %v1340_v53, %v6112_v31  ;;  %v6169_v53 = vmul.f32 %v5408_v19, %v860_v42  ;;  %v558_v19 = vpop.xlane.xlu1 %557  ;;  %v4495_v28 = vor.u32 %v5158_v25, %v4492_v14 }
 0x10f   : > { %3723 = vst [vmem:[%s6018_s14 + $0x100] sm:$0xff] %v3339_v43  ;;  %1486 = vmatmul.bf16.gmra.mxu0 %v5931_v47  ;;  %5411 = vrcp.f32 %v670_v40 }
 0x110   : > { %3724 = vst [vmem:[%s6018_s14 + $0x108] sm:$0xff] %v3340_v50  ;;  %1535 = vmatmul.bf16.gmra.mxu1 %v5931_v47  ;;  %v431_v50 = vld [vmem:[%s5790_s5 + $0x70] sm:$0xff]  }
 0x111   : > { %3727 = vst [vmem:[%s6018_s14 + $0x120] sm:$0xff] %v3343_v51  ;;  %1872 = vmatmul.bf16.gmra.mxu2 %v6121_v46  ;;  %1921 = vmatmul.bf16.gmra.mxu3 %v6121_v46  ;;  %v495_v51 = vunpack.c.l.bf16 %v431_v50  ;;  %v496_v30 = vunpack.c.h.bf16 %v431_v50 }
 0x112   : > { %3728 = vst [vmem:[%s6018_s14 + $0x128] sm:$0xff] %v3344_v56  ;;  %v556_v56 = vpop.xlane.xlu0 %555  ;;  %2002 = vmatpush.bf16.msra.mxu1 %v4495_v28 }
 0x113   : > { %587 = vadd.xlane.f32.xlu1 %v495_v51  ;;  %589 = vadd.xlane.f32.xlu2 %v496_v30  ;;  %v560_v51 = vpop.xlane.xlu2 %559 }
 0x114   : > { %v1389_v47 = vpop.f32.mrf.mxu2  ;;  %v1438_v10 = vpop.f32.mrf.mxu3 }
 0x115   : > { %v3345_v9 = vmul.f32 %v1389_v47, %v6112_v31  ;;  %v1293_v11 = vpop.f32.mrf.mxu0  ;;  %v3346_v13 = vmul.f32 %v1438_v10, %v6112_v31  ;;  %v1342_v18 = vpop.f32.mrf.mxu1  ;;  %v671_v47 = vadd.f32 1.0, %v556_v56  ;;  %v5156_v56 = vld [vmem:[%s5782_s8 + $0x1a4] sm:$0xf0] }
 0x116   : > { %v3349_v15 = vmul.f32 %v1293_v11, %v6133_v60  ;;  %v3350_v21 = vmul.f32 %v1342_v18, %v6133_v60  ;;  %v5412_v12 = vpop.eup %5411 }
 0x117   : > { %3729 = vst [vmem:[%s6018_s14 + $0x130] sm:$0xff] %v3345_v9  ;;  %v861_v9 = vsub.f32 2.0, %v797_v55  ;;  %5413 = vrcp.f32 %v671_v47  ;;  %v798_v18 = vmul.f32 %v5412_v12, %v670_v40  ;;  %v4474_v55 = vld [vmem:[%s5782_s8 + $0x190] sm:$0xf] }
 0x118   : > { %3730 = vst [vmem:[%s6018_s14 + $0x138] sm:$0xff] %v3346_v13  ;;  %v4475_v58 = vor.u32 %v5156_v56, %v4474_v55  ;;  %v5242_v55 = vld [vmem:[%s5782_s8 + $0x45c] sm:$0xf]  ;;  %v4860_v56 = vld [vmem:[%s5782_s8 + $0x470] sm:$0xf0] }
 0x119   : > { %3733 = vst [vmem:[%s6018_s14 + $0x150] sm:$0xff] %v3349_v15  ;;  %v6184_v15 = vmul.f32 %v5410_v48, %v861_v9  ;;  %v4863_v59 = vor.u32 %v5242_v55, %v4860_v56 }
 0x11a   : > { %3734 = vst [vmem:[%s6018_s14 + $0x158] sm:$0xff] %v3350_v21  ;;  %v4490_v21 = vld [vmem:[%s5782_s8 + $0x1b8] sm:$0xf]  ;;  %2052 = vmatpush.bf16.msra.mxu2 %v4475_v58  ;;  %v562_v30 = vpop.xlane.xlu0 %561 }
 0x11b   : > { %v4491_v24 = vor.u32 %v5161_v22, %v4490_v21  ;;  %v5152_v22 = vld [vmem:[%s5782_s8 + $0x18c] sm:$0xf]  ;;  %2578 = vmatpush.bf16.msrb.mxu3 %v4863_v59 }
 0x11c   : > { %v1391_v34 = vpop.f32.mrf.mxu2  ;;  %v1440_v37 = vpop.f32.mrf.mxu3 }
 0x11d   : > { %v3351_v36 = vmul.f32 %v1391_v34, %v6133_v60  ;;  %v1296_v38 = vpop.f32.mrf.mxu0  ;;  %v3352_v43 = vmul.f32 %v1440_v37, %v6133_v60  ;;  %v1345_v45 = vpop.f32.mrf.mxu1  ;;  %1953 = vmatpush.bf16.msra.mxu0 %v4491_v24  ;;  %v862_v37 = vsub.f32 2.0, %v798_v18  ;;  %v4466_v18 = vld [vmem:[%s5782_s8 + $0x188] sm:$0xf]  ;;  %v4468_v24 = vld [vmem:[%s5782_s8 + $0x1a0] sm:$0xf0] }
 0x11e   : > { %v3355_v44 = vmul.f32 %v1296_v38, %v6148_v23  ;;  %v3356_v49 = vmul.f32 %v1345_v45, %v6148_v23  ;;  %v433_v45 = vld [vmem:[%s5790_s5 + $0x78] sm:$0xff]   ;;  %v4471_v14 = vor.u32 %v5152_v22, %v4468_v24 }
 0x11f   : > { %3735 = vst [vmem:[%s6018_s14 + $0x160] sm:$0xff] %v3351_v36  ;;  %1491 = vmatmul.bf16.gmra.mxu0 %v5947_v63  ;;  %v672_v36 = vadd.f32 1.0, %v558_v19  ;;  %v497_v48 = vunpack.c.l.bf16 %v433_v45  ;;  %v5155_v19 = vld [vmem:[%s5782_s8 + $0x19c] sm:$0xf0] }
 0x120   : > { %3736 = vst [vmem:[%s6018_s14 + $0x168] sm:$0xff] %v3352_v43  ;;  %1540 = vmatmul.bf16.gmra.mxu1 %v5947_v63  ;;  %v5414_v43 = vpop.eup %5413  ;;  %v4467_v21 = vor.u32 %v5155_v19, %v4466_v18 }
 0x121   : > { %3739 = vst [vmem:[%s6018_s14 + $0x180] sm:$0xff] %v3355_v44  ;;  %1877 = vmatmul.bf16.gmra.mxu2 %v6157_v39  ;;  %1926 = vmatmul.bf16.gmra.mxu3 %v6157_v39  ;;  %5415 = vrcp.f32 %v672_v36  ;;  %v799_v50 = vmul.f32 %v5414_v43, %v671_v47 }
 0x122   : > { %3740 = vst [vmem:[%s6018_s14 + $0x188] sm:$0xff] %v3356_v49  ;;  %v6205_v49 = vmul.f32 %v5412_v12, %v862_v37  ;;  %591 = vadd.xlane.f32.xlu0 %v497_v48  ;;  %1954 = vmatpush.bf16.msra.mxu0 %v4467_v21  ;;  %v4858_v48 = vld [vmem:[%s5782_s8 + $0x458] sm:$0xf] }
 0x123   : > { %2003 = vmatpush.bf16.msra.mxu1 %v4471_v14  ;;  %v6264_v14 = vld [vmem:[%s5790_s5 + $0x78] sm:$0xff] }
 0x124   : > { %v1394_v63 = vpop.f32.mrf.mxu2  ;;  %v1443_v3 = vpop.f32.mrf.mxu3 }
 0x125   : > { %v3357_v2 = vmul.f32 %v1394_v63, %v6148_v23  ;;  %v1298_v6 = vpop.f32.mrf.mxu0  ;;  %v3358_v7 = vmul.f32 %v1443_v3, %v6148_v23  ;;  %v1347_v11 = vpop.f32.mrf.mxu1 }
 0x126   : > { %v3361_v10 = vmul.f32 %v1298_v6, %v6169_v53  ;;  %v3362_v13 = vmul.f32 %v1347_v11, %v6169_v53  ;;  %v863_v6 = vsub.f32 2.0, %v799_v50  ;;  %v498_v11 = vunpack.c.h.bf16 %v433_v45  ;;  %v5245_v50 = vld [vmem:[%s5782_s8 + $0x46c] sm:$0xf0] }
 0x127   : > { %3741 = vst [vmem:[%s6018_s14 + $0x190] sm:$0xff] %v3357_v2  ;;  %v673_v2 = vadd.f32 1.0, %v560_v51  ;;  %v5416_v9 = vpop.eup %5415  ;;  %v4859_v51 = vor.u32 %v5245_v50, %v4858_v48  ;;  %v4836_v48 = vld [vmem:[%s5782_s8 + $0x440] sm:$0xf0] }
 0x128   : > { %3742 = vst [vmem:[%s6018_s14 + $0x198] sm:$0xff] %v3358_v7  ;;  %v6220_v12 = vmul.f32 %v5414_v43, %v863_v6  ;;  %593 = vadd.xlane.f32.xlu1 %v498_v11  ;;  %v564_v6 = vpop.xlane.xlu1 %563 }
 0x129   : > { %3745 = vst [vmem:[%s6018_s14 + $0x1b0] sm:$0xff] %v3361_v10  ;;  %5417 = vrcp.f32 %v673_v2  ;;  %2529 = vmatpush.bf16.msrb.mxu2 %v4859_v51  ;;  %v675_v19 = vadd.f32 1.0, %v564_v6  ;;  %v5235_v6 = vld [vmem:[%s5782_s8 + $0x424] sm:$0xf] }
 0x12a   : > { %3746 = vst [vmem:[%s6018_s14 + $0x1b8] sm:$0xff] %v3362_v13  ;;  %v800_v13 = vmul.f32 %v5416_v9, %v672_v36 }
 0x12c   : > { %v1396_v27 = vpop.f32.mrf.mxu2  ;;  %v1445_v33 = vpop.f32.mrf.mxu3  ;;  %v864_v36 = vsub.f32 2.0, %v800_v13  ;;  %v5241_v13 = vld [vmem:[%s5782_s8 + $0x454] sm:$0xf] }
 0x12d   : > { %v3363_v29 = vmul.f32 %v1396_v27, %v6169_v53  ;;  %v1301_v34 = vpop.f32.mrf.mxu0  ;;  %v3364_v38 = vmul.f32 %v1445_v33, %v6169_v53  ;;  %v1350_v42 = vpop.f32.mrf.mxu1  ;;  %v6229_v33 = vld [vmem:[%s5790_s5 + $0x70] sm:$0xff] }
 0x12e   : > { %v3367_v40 = vmul.f32 %v1301_v34, %v6184_v15  ;;  %v3368_v44 = vmul.f32 %v1350_v42, %v6184_v15  ;;  %v674_v34 = vadd.f32 1.0, %v562_v30  ;;  %v4852_v30 = vld [vmem:[%s5782_s8 + $0x468] sm:$0xf0] }
 0x12f   : > { %3747 = vst [vmem:[%s6018_s14 + $0x1c0] sm:$0xff] %v3363_v29  ;;  %1496 = vmatmul.bf16.gmra.mxu0 %v5963_v16  ;;  %v5418_v42 = vpop.eup %5417  ;;  %v4855_v21 = vor.u32 %v5241_v13, %v4852_v30 }
 0x130   : > { %3748 = vst [vmem:[%s6018_s14 + $0x1c8] sm:$0xff] %v3364_v38  ;;  %1545 = vmatmul.bf16.gmra.mxu1 %v5963_v16  ;;  %5419 = vrcp.f32 %v674_v34  ;;  %v801_v45 = vmul.f32 %v5418_v42, %v673_v2 }
 0x131   : > { %3751 = vst [vmem:[%s6018_s14 + $0x1e0] sm:$0xff] %v3367_v40  ;;  %1882 = vmatmul.bf16.gmra.mxu2 %v6193_v35  ;;  %1931 = vmatmul.bf16.gmra.mxu3 %v6193_v35  ;;  %5421 = vrcp.f32 %v675_v19 }
 0x132   : > { %3752 = vst [vmem:[%s6018_s14 + $0x1e8] sm:$0xff] %v3368_v44  ;;  %v6240_v44 = vmul.f32 %v5416_v9, %v864_v36  ;;  %v4850_v9 = vld [vmem:[%s5782_s8 + $0x450] sm:$0xf]  ;;  %2480 = vmatpush.bf16.msrb.mxu1 %v4855_v21 }
 0x134   : > { %v1399_v16 = vpop.f32.mrf.mxu2  ;;  %v1448_v63 = vpop.f32.mrf.mxu3 }
 0x135   : > { %v3369_v0 = vmul.f32 %v1399_v16, %v6184_v15  ;;  %v1303_v1 = vpop.f32.mrf.mxu0  ;;  %v3370_v3 = vmul.f32 %v1448_v63, %v6184_v15  ;;  %v1352_v7 = vpop.f32.mrf.mxu1 }
 0x136   : > { %v3373_v47 = vmul.f32 %v1303_v1, %v6205_v49  ;;  %v3374_v10 = vmul.f32 %v1352_v7, %v6205_v49  ;;  %v5420_v2 = vpop.eup %5419 }
 0x137   : > { %3753 = vst [vmem:[%s6018_s14 + $0x1f0] sm:$0xff] %v3369_v0  ;;  %v865_v0 = vsub.f32 2.0, %v801_v45  ;;  %v802_v7 = vmul.f32 %v5420_v2, %v674_v34  ;;  %v5236_v45 = vld [vmem:[%s5782_s8 + $0x42c] sm:$0xf]  ;;  %v5422_v59 = vpop.eup %5421 }
 0x138   : > { %3754 = vst [vmem:[%s6018_s14 + $0x1f8] sm:$0xff] %v3370_v3  ;;  %v4839_v55 = vor.u32 %v5236_v45, %v4836_v48 }
 0x139   : > { %3757 = vst [vmem:[%s6018_s14 + $0x210] sm:$0xff] %v3373_v47  ;;  %v6255_v47 = vmul.f32 %v5418_v42, %v865_v0  ;;  %v5239_v42 = vld [vmem:[%s5782_s8 + $0x43c] sm:$0xf0]  ;;  %v803_v0 = vmul.f32 %v5422_v59, %v675_v19 }
 0x13a   : > { %3758 = vst [vmem:[%s6018_s14 + $0x218] sm:$0xff] %v3374_v10  ;;  %v5244_v10 = vld [vmem:[%s5782_s8 + $0x464] sm:$0xf0]  ;;  %2579 = vmatpush.bf16.msrb.mxu3 %v4839_v55 }
 0x13b   : > { %v4851_v11 = vor.u32 %v5244_v10, %v4850_v9  ;;  %v867_v13 = vsub.f32 2.0, %v803_v0 }
 0x13c   : > { %v1401_v25 = vpop.f32.mrf.mxu2  ;;  %v1450_v28 = vpop.f32.mrf.mxu3 }
 0x13d   : > { %v3375_v27 = vmul.f32 %v1401_v25, %v6205_v49  ;;  %v1306_v29 = vpop.f32.mrf.mxu0  ;;  %v3376_v37 = vmul.f32 %v1450_v28, %v6205_v49  ;;  %v1355_v40 = vpop.f32.mrf.mxu1  ;;  %2431 = vmatpush.bf16.msrb.mxu0 %v4851_v11 }
 0x13e   : > { %v3379_v38 = vmul.f32 %v1306_v29, %v6220_v12  ;;  %v3380_v43 = vmul.f32 %v1355_v40, %v6220_v12  ;;  %v4834_v40 = vld [vmem:[%s5782_s8 + $0x428] sm:$0xf] }
 0x13f   : > { %3759 = vst [vmem:[%s6018_s14 + $0x220] sm:$0xff] %v3375_v27  ;;  %1501 = vmatmul.bf16.gmra.mxu0 %v5975_v26  ;;  %v866_v27 = vsub.f32 2.0, %v802_v7  ;;  %v4828_v7 = vld [vmem:[%s5782_s8 + $0x438] sm:$0xf0] }
 0x140   : > { %3760 = vst [vmem:[%s6018_s14 + $0x228] sm:$0xff] %v3376_v37  ;;  %1550 = vmatmul.bf16.gmra.mxu1 %v5975_v26  ;;  %v566_v37 = vpop.xlane.xlu2 %565  ;;  %v4831_v11 = vor.u32 %v5235_v6, %v4828_v7  ;;  %v4804_v6 = vld [vmem:[%s5782_s8 + $0x408] sm:$0xf0] }
 0x141   : > { %3763 = vst [vmem:[%s6018_s14 + $0x240] sm:$0xff] %v3379_v38  ;;  %1887 = vmatmul.bf16.gmra.mxu2 %v6229_v33  ;;  %1936 = vmatmul.bf16.gmra.mxu3 %v6229_v33  ;;  %v6275_v38 = vmul.f32 %v5420_v2, %v866_v27  ;;  %v676_v51 = vadd.f32 1.0, %v566_v37  ;;  %v5238_v2 = vld [vmem:[%s5782_s8 + $0x434] sm:$0xf0] }
 0x142   : > { %3764 = vst [vmem:[%s6018_s14 + $0x248] sm:$0xff] %v3380_v43  ;;  %v4835_v43 = vor.u32 %v5239_v42, %v4834_v40  ;;  %2481 = vmatpush.bf16.msrb.mxu1 %v4831_v11  ;;  %v4810_v37 = vld [vmem:[%s5782_s8 + $0x3f8] sm:$0xf]  ;;  %v5230_v42 = vld [vmem:[%s5782_s8 + $0x3fc] sm:$0xf] }
 0x143   : > { %5423 = vrcp.f32 %v676_v51 }
 0x144   : > { %v1404_v58 = vpop.f32.mrf.mxu2  ;;  %v1453_v61 = vpop.f32.mrf.mxu3  ;;  %2530 = vmatpush.bf16.msrb.mxu2 %v4835_v43  ;;  %v4812_v43 = vld [vmem:[%s5782_s8 + $0x410] sm:$0xf0] }
 0x145   : > { %v3381_v26 = vmul.f32 %v1404_v58, %v6220_v12  ;;  %v1308_v16 = vpop.f32.mrf.mxu0  ;;  %v3382_v62 = vmul.f32 %v1453_v61, %v6220_v12  ;;  %v1357_v1 = vpop.f32.mrf.mxu1 }
 0x146   : > { %v3385_v63 = vmul.f32 %v1308_v16, %v6240_v44  ;;  %v3386_v3 = vmul.f32 %v1357_v1, %v6240_v44  ;;  %v4826_v1 = vld [vmem:[%s5782_s8 + $0x420] sm:$0xf] }
 0x147   : > { %3765 = vst [vmem:[%s6018_s14 + $0x250] sm:$0xff] %v3381_v26 }
 0x148   : > { %3766 = vst [vmem:[%s6018_s14 + $0x258] sm:$0xff] %v3382_v62  ;;  %v572_v0 = vpop.xlane.xlu2 %571 }
 0x149   : > { %3769 = vst [vmem:[%s6018_s14 + $0x270] sm:$0xff] %v3385_v63  ;;  %v568_v63 = vpop.xlane.xlu0 %567  ;;  %v5424_v19 = vpop.eup %5423 }
 0x14a   : > { %3770 = vst [vmem:[%s6018_s14 + $0x278] sm:$0xff] %v3386_v3  ;;  %v4827_v3 = vor.u32 %v5238_v2, %v4826_v1  ;;  %v677_v10 = vadd.f32 1.0, %v568_v63  ;;  %v4802_v63 = vld [vmem:[%s5782_s8 + $0x3f0] sm:$0xf]  ;;  %v5232_v1 = vld [vmem:[%s5782_s8 + $0x404] sm:$0xf0] }
 0x14b   : > { %v4803_v2 = vor.u32 %v5232_v1, %v4802_v63  ;;  %v5223_v63 = vld [vmem:[%s5782_s8 + $0x3c4] sm:$0xf]  ;;  %v4780_v1 = vld [vmem:[%s5782_s8 + $0x3d8] sm:$0xf0] }
 0x14c   : > { %v1406_v18 = vpop.f32.mrf.mxu2  ;;  %v1455_v24 = vpop.f32.mrf.mxu3  ;;  %2432 = vmatpush.bf16.msrb.mxu0 %v4827_v3  ;;  %5425 = vrcp.f32 %v677_v10  ;;  %v5229_v3 = vld [vmem:[%s5782_s8 + $0x3f4] sm:$0xf] }
 0x14d   : > { %v3387_v22 = vmul.f32 %v1406_v18, %v6240_v44  ;;  %v1311_v25 = vpop.f32.mrf.mxu0  ;;  %v3388_v28 = vmul.f32 %v1455_v24, %v6240_v44  ;;  %v1360_v34 = vpop.f32.mrf.mxu1  ;;  %v4807_v11 = vor.u32 %v5229_v3, %v4804_v6  ;;  %v4783_v6 = vor.u32 %v5223_v63, %v4780_v1 }
 0x14e   : > { %v3391_v29 = vmul.f32 %v1311_v25, %v6255_v47  ;;  %v3392_v36 = vmul.f32 %v1360_v34, %v6255_v47  ;;  %v570_v34 = vpop.xlane.xlu1 %569 }
 0x14f   : > { %3771 = vst [vmem:[%s6018_s14 + $0x280] sm:$0xff] %v3387_v22  ;;  %1506 = vmatmul.bf16.gmra.mxu0 %v5995_v52  ;;  %v678_v48 = vadd.f32 1.0, %v570_v34  ;;  %2482 = vmatpush.bf16.msrb.mxu1 %v4807_v11  ;;  %v4786_v34 = vld [vmem:[%s5782_s8 + $0x3c8] sm:$0xf] }
 0x150   : > { %3772 = vst [vmem:[%s6018_s14 + $0x288] sm:$0xff] %v3388_v28  ;;  %1555 = vmatmul.bf16.gmra.mxu1 %v5995_v52  ;;  %v6302_v28 = vmul.f32 %v5422_v59, %v867_v13  ;;  %2433 = vmatpush.bf16.msrb.mxu0 %v4803_v2 }
 0x151   : > { %3775 = vst [vmem:[%s6018_s14 + $0x2a0] sm:$0xff] %v3391_v29  ;;  %1892 = vmatmul.bf16.gmra.mxu2 %v6264_v14  ;;  %1941 = vmatmul.bf16.gmra.mxu3 %v6264_v14  ;;  %v804_v29 = vmul.f32 %v5424_v19, %v676_v51  ;;  %5427 = vrcp.f32 %v678_v48 }
 0x152   : > { %3776 = vst [vmem:[%s6018_s14 + $0x2a8] sm:$0xff] %v3392_v36  ;;  %v5517_v36 = vld [vmem:[%s5790_s5 + $0x40] sm:$0xff] }
 0x153   : > { %v868_v51 = vsub.f32 2.0, %v804_v29  ;;  %v574_v29 = vpop.xlane.xlu0 %573  ;;  %2483 = vmatpush.bf16.msrb.mxu1 %v4783_v6 }
 0x154   : > { %v1409_v50 = vpop.f32.mrf.mxu2  ;;  %v1458_v56 = vpop.f32.mrf.mxu3 }
 0x155   : > { %v3393_v52 = vmul.f32 %v1409_v50, %v6255_v47  ;;  %v1313_v58 = vpop.f32.mrf.mxu0  ;;  %v3394_v26 = vmul.f32 %v1458_v56, %v6255_v47  ;;  %v1362_v16 = vpop.f32.mrf.mxu1  ;;  %v4815_v50 = vor.u32 %v5230_v42, %v4812_v43  ;;  %v680_v42 = vadd.f32 1.0, %v574_v29  ;;  %v5218_v29 = vld [vmem:[%s5782_s8 + $0x39c] sm:$0xf] }
 0x156   : > { %v3397_v61 = vmul.f32 %v1313_v58, %v6275_v38  ;;  %v3398_v62 = vmul.f32 %v1362_v16, %v6275_v38  ;;  %v5426_v56 = vpop.eup %5425  ;;  %v6319_v16 = vmul.f32 %v5424_v19, %v868_v51 }
 0x157   : > { %3777 = vst [vmem:[%s6018_s14 + $0x2b0] sm:$0xff] %v3393_v52  ;;  %2580 = vmatpush.bf16.msrb.mxu3 %v4815_v50 }
 0x158   : > { %3778 = vst [vmem:[%s6018_s14 + $0x2b8] sm:$0xff] %v3394_v26 }
 0x159   : > { %3781 = vst [vmem:[%s6018_s14 + $0x2d0] sm:$0xff] %v3397_v61 }
 0x15a   : > { %3782 = vst [vmem:[%s6018_s14 + $0x2d8] sm:$0xff] %v3398_v62  ;;  %v805_v62 = vmul.f32 %v5426_v56, %v677_v10  ;;  %v5428_v10 = vpop.eup %5427 }
 0x15c   : > { %v1411_v9 = vpop.f32.mrf.mxu2  ;;  %v1460_v18 = vpop.f32.mrf.mxu3  ;;  %v869_v13 = vsub.f32 2.0, %v805_v62  ;;  %v5226_v62 = vld [vmem:[%s5782_s8 + $0x3d4] sm:$0xf0] }
 0x15d   : > { %v3399_v30 = vmul.f32 %v1411_v9, %v6275_v38  ;;  %v1472_v21 = vpop.f32.mrf.mxu0  ;;  %v3400_v22 = vmul.f32 %v1460_v18, %v6275_v38  ;;  %v1521_v25 = vpop.f32.mrf.mxu1  ;;  %v679_v9 = vadd.f32 1.0, %v572_v0 }
 0x15e   : > { %v3311_v24 = vmul.f32 %v1472_v21, %v6007_v8  ;;  %v3312_v27 = vmul.f32 %v1521_v25, %v6007_v8  ;;  %v5233_v8 = vld [vmem:[%s5782_s8 + $0x40c] sm:$0xf0]  ;;  %v6334_v25 = vmul.f32 %v5426_v56, %v869_v13 }
 0x15f   : > { %3783 = vst [vmem:[%s6018_s14 + $0x2e0] sm:$0xff] %v3399_v30  ;;  %1955 = vmatmul.bf16.vlgmr.msra.gmra.mxu0 %v6014_v20  ;;  %v4811_v40 = vor.u32 %v5233_v8, %v4810_v37  ;;  %5429 = vrcp.f32 %v679_v9  ;;  %v5224_v37 = vld [vmem:[%s5782_s8 + $0x3cc] sm:$0xf]  ;;  %v4788_v8 = vld [vmem:[%s5782_s8 + $0x3e0] sm:$0xf0] }
 0x160   : > { %3784 = vst [vmem:[%s6018_s14 + $0x2e8] sm:$0xff] %v3400_v22  ;;  %2004 = vmatmul.bf16.vlgmr.msra.gmra.mxu1 %v6014_v20  ;;  %v4791_v43 = vor.u32 %v5224_v37, %v4788_v8  ;;  %5431 = vrcp.f32 %v680_v42 }
 0x161   : > { %3695 = vst [vmem:[%s6018_s14 + $0x20] sm:$0xff] %v3311_v24  ;;  %2053 = vmatmul.bf16.vlgmr.msra.gmra.mxu2 %v6014_v20  ;;  %2102 = vmatmul.bf16.vlgmr.msra.gmra.mxu3 %v5517_v36  ;;  %v5227_v36 = vld [vmem:[%s5782_s8 + $0x3dc] sm:$0xf0] }
 0x162   : > { %3696 = vst [vmem:[%s6018_s14 + $0x28] sm:$0xff] %v3312_v27  ;;  %2531 = vmatpush.bf16.msrb.mxu2 %v4811_v40  ;;  %v806_v27 = vmul.f32 %v5428_v10, %v678_v48  ;;  %2581 = vmatpush.bf16.msrb.mxu3 %v4791_v43 }
 0x164   : > { %v1858_v45 = vpop.f32.mrf.mxu2  ;;  %v1907_v52 = vpop.f32.mrf.mxu3 }
 0x165   : > { %v3403_v55 = vmul.f32 %v1858_v45, %v6302_v28  ;;  %v1474_v20 = vpop.f32.mrf.mxu0  ;;  %v3404_v58 = vmul.f32 %v1907_v52, %v6302_v28  ;;  %v1523_v26 = vpop.f32.mrf.mxu1  ;;  %v870_v45 = vsub.f32 2.0, %v806_v27  ;;  %v5221_v27 = vld [vmem:[%s5782_s8 + $0x3ac] sm:$0xf0] }
 0x166   : > { %v3317_v59 = vmul.f32 %v1474_v20, %v6026_v32  ;;  %v3318_v61 = vmul.f32 %v1523_v26, %v6026_v32  ;;  %v576_v26 = vpop.xlane.xlu1 %575 }
 0x167   : > { %3787 = vst [vmem:[%s6018_s14 + $0x300] sm:$0xff] %v3403_v55  ;;  %v681_v3 = vadd.f32 1.0, %v576_v26  ;;  %v5217_v26 = vld [vmem:[%s5782_s8 + $0x394] sm:$0xf] }
 0x168   : > { %3788 = vst [vmem:[%s6018_s14 + $0x308] sm:$0xff] %v3404_v58  ;;  %v6351_v58 = vmul.f32 %v5428_v10, %v870_v45 }
 0x169   : > { %3701 = vst [vmem:[%s6018_s14 + $0x50] sm:$0xff] %v3317_v59  ;;  %5433 = vrcp.f32 %v681_v3 }
 0x16a   : > { %3702 = vst [vmem:[%s6018_s14 + $0x58] sm:$0xff] %v3318_v61  ;;  %v4778_v61 = vld [vmem:[%s5782_s8 + $0x3c0] sm:$0xf] }
 0x16b   : > { %v4779_v0 = vor.u32 %v5226_v62, %v4778_v61  ;;  %v4756_v61 = vld [vmem:[%s5782_s8 + $0x3a8] sm:$0xf0] }
 0x16c   : > { %v1860_v7 = vpop.f32.mrf.mxu2  ;;  %v1909_v30 = vpop.f32.mrf.mxu3  ;;  %v4759_v63 = vor.u32 %v5217_v26, %v4756_v61 }
 0x16d   : > { %v3409_v32 = vmul.f32 %v1860_v7, %v6319_v16  ;;  %v1477_v18 = vpop.f32.mrf.mxu0  ;;  %v3410_v21 = vmul.f32 %v1909_v30, %v6319_v16  ;;  %v1526_v22 = vpop.f32.mrf.mxu1  ;;  %2434 = vmatpush.bf16.msrb.mxu0 %v4779_v0 }
 0x16e   : > { %v3323_v19 = vmul.f32 %v1477_v18, %v6040_v54  ;;  %v3324_v24 = vmul.f32 %v1526_v22, %v6040_v54  ;;  %v4787_v54 = vor.u32 %v5227_v36, %v4786_v34  ;;  %v578_v22 = vpop.xlane.xlu2 %577  ;;  %v4764_v34 = vld [vmem:[%s5782_s8 + $0x3b0] sm:$0xf0]  ;;  %2484 = vmatpush.bf16.msrb.mxu1 %v4759_v63 }
 0x16f   : > { %3793 = vst [vmem:[%s6018_s14 + $0x330] sm:$0xff] %v3409_v32  ;;  %1960 = vmatmul.bf16.gmra.mxu0 %v6049_v4  ;;  %v4767_v37 = vor.u32 %v5218_v29, %v4764_v34 }
 0x170   : > { %3794 = vst [vmem:[%s6018_s14 + $0x338] sm:$0xff] %v3410_v21  ;;  %2009 = vmatmul.bf16.gmra.mxu1 %v6049_v4  ;;  %2532 = vmatpush.bf16.msrb.mxu2 %v4787_v54  ;;  %v682_v54 = vadd.f32 1.0, %v578_v22  ;;  %v4740_v22 = vld [vmem:[%s5782_s8 + $0x380] sm:$0xf0] }
 0x171   : > { %3707 = vst [vmem:[%s6018_s14 + $0x80] sm:$0xff] %v3323_v19  ;;  %2058 = vmatmul.bf16.gmra.mxu2 %v6049_v4  ;;  %2107 = vmatmul.bf16.gmra.mxu3 %v6049_v4  ;;  %v5430_v4 = vpop.eup %5429 }
 0x172   : > { %3708 = vst [vmem:[%s6018_s14 + $0x88] sm:$0xff] %v3324_v24  ;;  %v807_v59 = vmul.f32 %v5430_v4, %v679_v9  ;;  %v5432_v9 = vpop.eup %5431  ;;  %v4762_v24 = vld [vmem:[%s5782_s8 + $0x398] sm:$0xf]  ;;  %2582 = vmatpush.bf16.msrb.mxu3 %v4767_v37  ;;  %5435 = vrcp.f32 %v682_v54 }
 0x173   : > { %v808_v19 = vmul.f32 %v5432_v9, %v680_v42 }
 0x174   : > { %v1863_v40 = vpop.f32.mrf.mxu2  ;;  %v1912_v50 = vpop.f32.mrf.mxu3  ;;  %v871_v7 = vsub.f32 2.0, %v807_v59 }
 0x175   : > { %v3415_v48 = vmul.f32 %v1863_v40, %v6334_v25  ;;  %v1479_v51 = vpop.f32.mrf.mxu0  ;;  %v3416_v55 = vmul.f32 %v1912_v50, %v6334_v25  ;;  %v1528_v20 = vpop.f32.mrf.mxu1  ;;  %v872_v8 = vsub.f32 2.0, %v808_v19  ;;  %v5212_v19 = vld [vmem:[%s5782_s8 + $0x36c] sm:$0xf] }
 0x176   : > { %v3329_v52 = vmul.f32 %v1479_v51, %v6061_v17  ;;  %v3330_v56 = vmul.f32 %v1528_v20, %v6061_v17  ;;  %v6366_v21 = vmul.f32 %v5430_v4, %v871_v7  ;;  %v4754_v20 = vld [vmem:[%s5782_s8 + $0x390] sm:$0xf] }
 0x177   : > { %3799 = vst [vmem:[%s6018_s14 + $0x360] sm:$0xff] %v3415_v48  ;;  %v6383_v4 = vmul.f32 %v5432_v9, %v872_v8 }
 0x178   : > { %3800 = vst [vmem:[%s6018_s14 + $0x368] sm:$0xff] %v3416_v55 }
 0x179   : > { %3713 = vst [vmem:[%s6018_s14 + $0xb0] sm:$0xff] %v3329_v52  ;;  %v580_v52 = vpop.xlane.xlu0 %579 }
 0x17a   : > { %3714 = vst [vmem:[%s6018_s14 + $0xb8] sm:$0xff] %v3330_v56  ;;  %v5220_v56 = vld [vmem:[%s5782_s8 + $0x3a4] sm:$0xf0]  ;;  %v683_v0 = vadd.f32 1.0, %v580_v52  ;;  %v4732_v52 = vld [vmem:[%s5782_s8 + $0x378] sm:$0xf0] }
 0x17b   : > { %v4755_v59 = vor.u32 %v5220_v56, %v4754_v20 }
 0x17c   : > { %v1865_v2 = vpop.f32.mrf.mxu2  ;;  %v1914_v11 = vpop.f32.mrf.mxu3  ;;  %5437 = vrcp.f32 %v683_v0 }
 0x17d   : > { %v3421_v17 = vmul.f32 %v1865_v2, %v6351_v58  ;;  %v1482_v13 = vpop.f32.mrf.mxu0  ;;  %v3422_v32 = vmul.f32 %v1914_v11, %v6351_v58  ;;  %v1531_v18 = vpop.f32.mrf.mxu1  ;;  %2435 = vmatpush.bf16.msrb.mxu0 %v4755_v59 }
 0x17e   : > { %v3335_v30 = vmul.f32 %v1482_v13, %v6076_v41  ;;  %v3336_v10 = vmul.f32 %v1531_v18, %v6076_v41  ;;  %v4763_v41 = vor.u32 %v5221_v27, %v4762_v24  ;;  %v4738_v18 = vld [vmem:[%s5782_s8 + $0x368] sm:$0xf] }
 0x17f   : > { %3805 = vst [vmem:[%s6018_s14 + $0x390] sm:$0xff] %v3421_v17  ;;  %1965 = vmatmul.bf16.gmra.mxu0 %v6085_v57 }
 0x180   : > { %3806 = vst [vmem:[%s6018_s14 + $0x398] sm:$0xff] %v3422_v32  ;;  %2014 = vmatmul.bf16.gmra.mxu1 %v6085_v57  ;;  %2533 = vmatpush.bf16.msrb.mxu2 %v4763_v41  ;;  %v4743_v41 = vor.u32 %v5212_v19, %v4740_v22 }
 0x181   : > { %3719 = vst [vmem:[%s6018_s14 + $0xe0] sm:$0xff] %v3335_v30  ;;  %2063 = vmatmul.bf16.gmra.mxu2 %v6085_v57  ;;  %2112 = vmatmul.bf16.gmra.mxu3 %v6085_v57  ;;  %v5434_v57 = vpop.eup %5433  ;;  %v582_v30 = vpop.xlane.xlu1 %581 }
 0x182   : > { %3720 = vst [vmem:[%s6018_s14 + $0xe8] sm:$0xff] %v3336_v10  ;;  %v809_v55 = vmul.f32 %v5434_v57, %v681_v3  ;;  %v5436_v3 = vpop.eup %5435  ;;  %v5215_v10 = vld [vmem:[%s5782_s8 + $0x37c] sm:$0xf0]  ;;  %v684_v27 = vadd.f32 1.0, %v582_v30  ;;  %2583 = vmatpush.bf16.msrb.mxu3 %v4743_v41 }
 0x183   : > { %v810_v32 = vmul.f32 %v5436_v3, %v682_v54 }
 0x184   : > { %v1868_v36 = vpop.f32.mrf.mxu2  ;;  %v1917_v42 = vpop.f32.mrf.mxu3  ;;  %v873_v1 = vsub.f32 2.0, %v809_v55  ;;  %5439 = vrcp.f32 %v684_v27  ;;  %v5211_v55 = vld [vmem:[%s5782_s8 + $0x364] sm:$0xf] }
 0x185   : > { %v3427_v40 = vmul.f32 %v1868_v36, %v6366_v21  ;;  %v1484_v43 = vpop.f32.mrf.mxu0  ;;  %v3428_v45 = vmul.f32 %v1917_v42, %v6366_v21  ;;  %v1533_v50 = vpop.f32.mrf.mxu1  ;;  %v874_v29 = vsub.f32 2.0, %v810_v32  ;;  %v4735_v59 = vor.u32 %v5211_v55, %v4732_v52  ;;  %v4716_v32 = vld [vmem:[%s5782_s8 + $0x350] sm:$0xf0] }
 0x186   : > { %v3341_v48 = vmul.f32 %v1484_v43, %v6097_v5  ;;  %v3342_v51 = vmul.f32 %v1533_v50, %v6097_v5  ;;  %v6398_v9 = vmul.f32 %v5434_v57, %v873_v1  ;;  %v5214_v50 = vld [vmem:[%s5782_s8 + $0x374] sm:$0xf0] }
 0x187   : > { %3811 = vst [vmem:[%s6018_s14 + $0x3c0] sm:$0xff] %v3427_v40  ;;  %v6415_v43 = vmul.f32 %v5436_v3, %v874_v29  ;;  %2485 = vmatpush.bf16.msrb.mxu1 %v4735_v59 }
 0x188   : > { %3812 = vst [vmem:[%s6018_s14 + $0x3c8] sm:$0xff] %v3428_v45  ;;  %v584_v45 = vpop.xlane.xlu2 %583 }
 0x189   : > { %3725 = vst [vmem:[%s6018_s14 + $0x110] sm:$0xff] %v3341_v48  ;;  %v4730_v48 = vld [vmem:[%s5782_s8 + $0x360] sm:$0xf]  ;;  %v685_v56 = vadd.f32 1.0, %v584_v45 }
 0x18a   : > { %3726 = vst [vmem:[%s6018_s14 + $0x118] sm:$0xff] %v3342_v51  ;;  %v4731_v51 = vor.u32 %v5214_v50, %v4730_v48 }
 0x18b   : > { %5441 = vrcp.f32 %v685_v56 }
 0x18c   : > { %v1870_v62 = vpop.f32.mrf.mxu2  ;;  %v1919_v2 = vpop.f32.mrf.mxu3  ;;  %2436 = vmatpush.bf16.msrb.mxu0 %v4731_v51 }
 0x18d   : > { %v3433_v5 = vmul.f32 %v1870_v62, %v6383_v4  ;;  %v1487_v6 = vpop.f32.mrf.mxu0  ;;  %v3434_v7 = vmul.f32 %v1919_v2, %v6383_v4  ;;  %v1536_v11 = vpop.f32.mrf.mxu1 }
 0x18e   : > { %v3347_v17 = vmul.f32 %v1487_v6, %v6112_v31  ;;  %v3348_v13 = vmul.f32 %v1536_v11, %v6112_v31  ;;  %v4739_v31 = vor.u32 %v5215_v10, %v4738_v18  ;;  %v5209_v11 = vld [vmem:[%s5782_s8 + $0x34c] sm:$0xf0] }
 0x18f   : > { %3817 = vst [vmem:[%s6018_s14 + $0x3f0] sm:$0xff] %v3433_v5  ;;  %1970 = vmatmul.bf16.gmra.mxu0 %v6121_v46 }
 0x190   : > { %3818 = vst [vmem:[%s6018_s14 + $0x3f8] sm:$0xff] %v3434_v7  ;;  %2019 = vmatmul.bf16.gmra.mxu1 %v6121_v46  ;;  %2534 = vmatpush.bf16.msrb.mxu2 %v4739_v31  ;;  %v586_v7 = vpop.xlane.xlu0 %585 }
 0x191   : > { %3731 = vst [vmem:[%s6018_s14 + $0x140] sm:$0xff] %v3347_v17  ;;  %2068 = vmatmul.bf16.gmra.mxu2 %v6121_v46  ;;  %2117 = vmatmul.bf16.gmra.mxu3 %v6121_v46  ;;  %v5438_v46 = vpop.eup %5437  ;;  %v4714_v17 = vld [vmem:[%s5782_s8 + $0x338] sm:$0xf]  ;;  %v686_v18 = vadd.f32 1.0, %v586_v7 }
 0x192   : > { %3732 = vst [vmem:[%s6018_s14 + $0x148] sm:$0xff] %v3348_v13  ;;  %v811_v57 = vmul.f32 %v5438_v46, %v683_v0  ;;  %v5440_v0 = vpop.eup %5439  ;;  %v5206_v13 = vld [vmem:[%s5782_s8 + $0x33c] sm:$0xf] }
 0x193   : > { %v812_v3 = vmul.f32 %v5440_v0, %v684_v27  ;;  %v4719_v10 = vor.u32 %v5206_v13, %v4716_v32  ;;  %5443 = vrcp.f32 %v686_v18 }
 0x194   : > { %v1873_v24 = vpop.f32.mrf.mxu2  ;;  %v1922_v36 = vpop.f32.mrf.mxu3  ;;  %v875_v26 = vsub.f32 2.0, %v811_v57  ;;  %v4708_v57 = vld [vmem:[%s5782_s8 + $0x348] sm:$0xf0] }
 0x195   : > { %v3439_v34 = vmul.f32 %v1873_v24, %v6398_v9  ;;  %v1489_v54 = vpop.f32.mrf.mxu0  ;;  %v3440_v37 = vmul.f32 %v1922_v36, %v6398_v9  ;;  %v1538_v40 = vpop.f32.mrf.mxu1  ;;  %v876_v31 = vsub.f32 2.0, %v812_v3  ;;  %2584 = vmatpush.bf16.msrb.mxu3 %v4719_v10 }
 0x196   : > { %v3353_v8 = vmul.f32 %v1489_v54, %v6133_v60  ;;  %v3354_v42 = vmul.f32 %v1538_v40, %v6133_v60  ;;  %v6430_v6 = vmul.f32 %v5438_v46, %v875_v26  ;;  %v588_v46 = vpop.xlane.xlu1 %587 }
 0x197   : > { %3823 = vst [vmem:[%s6018_s14 + $0x420] sm:$0xff] %v3439_v34  ;;  %v6447_v36 = vmul.f32 %v5440_v0, %v876_v31  ;;  %v687_v48 = vadd.f32 1.0, %v588_v46  ;;  %v590_v0 = vpop.xlane.xlu2 %589 }
 0x198   : > { %3824 = vst [vmem:[%s6018_s14 + $0x428] sm:$0xff] %v3440_v37  ;;  %v4706_v37 = vld [vmem:[%s5782_s8 + $0x330] sm:$0xf]  ;;  %v688_v7 = vadd.f32 1.0, %v590_v0  ;;  %v5076_v0 = vld [vmem:[%s5782_s8 + $0x5e8] sm:$0xf0] }
 0x199   : > { %3737 = vst [vmem:[%s6018_s14 + $0x170] sm:$0xff] %v3353_v8  ;;  %v5208_v8 = vld [vmem:[%s5782_s8 + $0x344] sm:$0xf0]  ;;  %5445 = vrcp.f32 %v687_v48 }
 0x19a   : > { %3738 = vst [vmem:[%s6018_s14 + $0x178] sm:$0xff] %v3354_v42  ;;  %v4707_v40 = vor.u32 %v5208_v8, %v4706_v37  ;;  %v5205_v42 = vld [vmem:[%s5782_s8 + $0x334] sm:$0xf]  ;;  %5447 = vrcp.f32 %v688_v7 }
 0x19b   : > { %v4711_v50 = vor.u32 %v5205_v42, %v4708_v57 }
 0x19c   : > { %v1875_v20 = vpop.f32.mrf.mxu2  ;;  %v1924_v61 = vpop.f32.mrf.mxu3  ;;  %2437 = vmatpush.bf16.msrb.mxu0 %v4707_v40 }
 0x19d   : > { %v3445_v60 = vmul.f32 %v1875_v20, %v6415_v43  ;;  %v1492_v62 = vpop.f32.mrf.mxu0  ;;  %v3446_v63 = vmul.f32 %v1924_v61, %v6415_v43  ;;  %v1541_v5 = vpop.f32.mrf.mxu1  ;;  %2486 = vmatpush.bf16.msrb.mxu1 %v4711_v50 }
 0x19e   : > { %v3359_v1 = vmul.f32 %v1492_v62, %v6148_v23  ;;  %v3360_v2 = vmul.f32 %v1541_v5, %v6148_v23  ;;  %v4715_v23 = vor.u32 %v5209_v11, %v4714_v17  ;;  %v5200_v5 = vld [vmem:[%s5782_s8 + $0x30c] sm:$0xf] }
 0x19f   : > { %3829 = vst [vmem:[%s6018_s14 + $0x450] sm:$0xff] %v3445_v60  ;;  %1975 = vmatmul.bf16.gmra.mxu0 %v6157_v39 }
 0x1a0   : > { %3830 = vst [vmem:[%s6018_s14 + $0x458] sm:$0xff] %v3446_v63  ;;  %2024 = vmatmul.bf16.gmra.mxu1 %v6157_v39  ;;  %2535 = vmatpush.bf16.msrb.mxu2 %v4715_v23  ;;  %v4690_v63 = vld [vmem:[%s5782_s8 + $0x308] sm:$0xf] }
 0x1a1   : > { %3743 = vst [vmem:[%s6018_s14 + $0x1a0] sm:$0xff] %v3359_v1  ;;  %2073 = vmatmul.bf16.gmra.mxu2 %v6157_v39  ;;  %2122 = vmatmul.bf16.gmra.mxu3 %v6157_v39  ;;  %v5442_v39 = vpop.eup %5441  ;;  %v5203_v1 = vld [vmem:[%s5782_s8 + $0x31c] sm:$0xf0] }
 0x1a2   : > { %3744 = vst [vmem:[%s6018_s14 + $0x1a8] sm:$0xff] %v3360_v2  ;;  %v813_v54 = vmul.f32 %v5442_v39, %v685_v56  ;;  %v5444_v20 = vpop.eup %5443  ;;  %v4692_v2 = vld [vmem:[%s5782_s8 + $0x320] sm:$0xf0] }
 0x1a3   : > { %v814_v62 = vmul.f32 %v5444_v20, %v686_v18  ;;  %v4695_v17 = vor.u32 %v5200_v5, %v4692_v2 }
 0x1a4   : > { %v1878_v30 = vpop.f32.mrf.mxu2  ;;  %v1927_v22 = vpop.f32.mrf.mxu3  ;;  %v877_v51 = vsub.f32 2.0, %v813_v54 }
 0x1a5   : > { %v3451_v19 = vmul.f32 %v1878_v30, %v6430_v6  ;;  %v1494_v24 = vpop.f32.mrf.mxu0  ;;  %v3452_v27 = vmul.f32 %v1927_v22, %v6430_v6  ;;  %v1543_v29 = vpop.f32.mrf.mxu1  ;;  %v878_v11 = vsub.f32 2.0, %v814_v62  ;;  %2585 = vmatpush.bf16.msrb.mxu3 %v4695_v17  ;;  %v5289_v62 = vld [vmem:[%s5782_s8 + $0x5d4] sm:$0xf] }
 0x1a6   : > { %v3365_v41 = vmul.f32 %v1494_v24, %v6169_v53  ;;  %v3366_v34 = vmul.f32 %v1543_v29, %v6169_v53  ;;  %v6462_v61 = vmul.f32 %v5442_v39, %v877_v51  ;;  %v592_v24 = vpop.xlane.xlu0 %591  ;;  %v4682_v39 = vld [vmem:[%s5782_s8 + $0x300] sm:$0xf]  ;;  %v5199_v29 = vld [vmem:[%s5782_s8 + $0x304] sm:$0xf] }
 0x1a7   : > { %3835 = vst [vmem:[%s6018_s14 + $0x480] sm:$0xff] %v3451_v19  ;;  %v6479_v19 = vmul.f32 %v5444_v20, %v878_v11  ;;  %v689_v46 = vadd.f32 1.0, %v592_v24  ;;  %v594_v20 = vpop.xlane.xlu1 %593 }
 0x1a8   : > { %3836 = vst [vmem:[%s6018_s14 + $0x488] sm:$0xff] %v3452_v27  ;;  %v5202_v27 = vld [vmem:[%s5782_s8 + $0x314] sm:$0xf0] }
 0x1a9   : > { %3749 = vst [vmem:[%s6018_s14 + $0x1d0] sm:$0xff] %v3365_v41  ;;  %v4683_v41 = vor.u32 %v5202_v27, %v4682_v39  ;;  %5449 = vrcp.f32 %v689_v46 }
 0x1aa   : > { %3750 = vst [vmem:[%s6018_s14 + $0x1d8] sm:$0xff] %v3366_v34  ;;  %v4684_v34 = vld [vmem:[%s5782_s8 + $0x318] sm:$0xf0] }
 0x1ab   : > { %v4687_v37 = vor.u32 %v5199_v29, %v4684_v34  ;;  %2438 = vmatpush.bf16.msrb.mxu0 %v4683_v41 }
 0x1ac   : > { %v1880_v45 = vpop.f32.mrf.mxu2  ;;  %v1929_v55 = vpop.f32.mrf.mxu3 }
 0x1ad   : > { %v3457_v53 = vmul.f32 %v1880_v45, %v6447_v36  ;;  %v1497_v52 = vpop.f32.mrf.mxu0  ;;  %v3458_v56 = vmul.f32 %v1929_v55, %v6447_v36  ;;  %v1546_v26 = vpop.f32.mrf.mxu1  ;;  %2487 = vmatpush.bf16.msrb.mxu1 %v4687_v37 }
 0x1ae   : > { %v3371_v59 = vmul.f32 %v1497_v52, %v6184_v15  ;;  %v3372_v60 = vmul.f32 %v1546_v26, %v6184_v15  ;;  %v4691_v15 = vor.u32 %v5203_v1, %v4690_v63  ;;  %v690_v1 = vadd.f32 1.0, %v594_v20 }
 0x1af   : > { %3841 = vst [vmem:[%s6018_s14 + $0x4b0] sm:$0xff] %v3457_v53  ;;  %1980 = vmatmul.bf16.gmra.mxu0 %v6193_v35  ;;  %v435_v53 = vld [vmem:[%s5790_s5 + $0x80] sm:$0xff]  }
 0x1b0   : > { %3842 = vst [vmem:[%s6018_s14 + $0x4b8] sm:$0xff] %v3458_v56  ;;  %2029 = vmatmul.bf16.gmra.mxu1 %v6193_v35  ;;  %2536 = vmatpush.bf16.msrb.mxu2 %v4691_v15  ;;  %v499_v56 = vunpack.c.l.bf16 %v435_v53  ;;  %v500_v26 = vunpack.c.h.bf16 %v435_v53  ;;  %v5079_v15 = vor.u32 %v5289_v62, %v5076_v0  ;;  %5451 = vrcp.f32 %v690_v1  ;;  %v5052_v53 = vld [vmem:[%s5782_s8 + $0x5b8] sm:$0xf0] }
 0x1b1   : > { %3755 = vst [vmem:[%s6018_s14 + $0x200] sm:$0xff] %v3371_v59  ;;  %2078 = vmatmul.bf16.gmra.mxu2 %v6193_v35  ;;  %2127 = vmatmul.bf16.gmra.mxu3 %v6193_v35  ;;  %v5446_v35 = vpop.eup %5445  ;;  %v5292_v59 = vld [vmem:[%s5782_s8 + $0x5e4] sm:$0xf0] }
 0x1b2   : > { %3756 = vst [vmem:[%s6018_s14 + $0x208] sm:$0xff] %v3372_v60  ;;  %v815_v22 = vmul.f32 %v5446_v35, %v687_v48  ;;  %v5448_v57 = vpop.eup %5447  ;;  %595 = vadd.xlane.f32.xlu2 %v499_v56  ;;  %597 = vadd.xlane.f32.xlu0 %v500_v26 }
 0x1b3   : > { %v816_v52 = vmul.f32 %v5448_v57, %v688_v7  ;;  %v5450_v7 = vpop.eup %5449  ;;  %3062 = vmatpush.bf16.msra.mxu3 %v5079_v15  ;;  %v5240_v15 = vld [vmem:[%s5782_s8 + $0x444] sm:$0xf0] }
 0x1b4   : > { %v1883_v3 = vpop.f32.mrf.mxu2  ;;  %v1932_v13 = vpop.f32.mrf.mxu3 }
 0x1b5   : > { %v3463_v23 = vmul.f32 %v1883_v3, %v6462_v61  ;;  %v1499_v32 = vpop.f32.mrf.mxu0  ;;  %v3464_v30 = vmul.f32 %v1932_v13, %v6462_v61  ;;  %v1548_v10 = vpop.f32.mrf.mxu1  ;;  %v880_v5 = vsub.f32 2.0, %v816_v52 }
 0x1b6   : > { %v3377_v18 = vmul.f32 %v1499_v32, %v6205_v49  ;;  %v3378_v31 = vmul.f32 %v1548_v10, %v6205_v49  ;;  %v879_v49 = vsub.f32 2.0, %v815_v22  ;;  %v4868_v22 = vld [vmem:[%s5782_s8 + $0x478] sm:$0xf0]  ;;  %v5452_v34 = vpop.eup %5451 }
 0x1b7   : > { %3847 = vst [vmem:[%s6018_s14 + $0x4e0] sm:$0xff] %v3463_v23  ;;  %v6512_v32 = vmul.f32 %v5448_v57, %v880_v5 }
 0x1b8   : > { %3848 = vst [vmem:[%s6018_s14 + $0x4e8] sm:$0xff] %v3464_v30  ;;  %v6495_v55 = vmul.f32 %v5446_v35, %v879_v49  ;;  %v817_v35 = vmul.f32 %v5450_v7, %v689_v46  ;;  %v4866_v30 = vld [vmem:[%s5782_s8 + $0x460] sm:$0xf] }
 0x1b9   : > { %3761 = vst [vmem:[%s6018_s14 + $0x230] sm:$0xff] %v3377_v18  ;;  %v5246_v18 = vld [vmem:[%s5782_s8 + $0x474] sm:$0xf0] }
 0x1ba   : > { %3762 = vst [vmem:[%s6018_s14 + $0x238] sm:$0xff] %v3378_v31  ;;  %v4867_v10 = vor.u32 %v5246_v18, %v4866_v30  ;;  %v5243_v31 = vld [vmem:[%s5782_s8 + $0x464] sm:$0xf]  ;;  %v881_v27 = vsub.f32 2.0, %v817_v35 }
 0x1bb   : > { %v4871_v39 = vor.u32 %v5243_v31, %v4868_v22  ;;  %v5026_v22 = vld [vmem:[%s5782_s8 + $0x570] sm:$0xf] }
 0x1bc   : > { %v1885_v54 = vpop.f32.mrf.mxu2  ;;  %v1934_v40 = vpop.f32.mrf.mxu3  ;;  %2627 = vmatpush.bf16.msra.mxu0 %v4867_v10  ;;  %v439_v10 = vld [vmem:[%s5790_s5 + $0x90] sm:$0xff]  }
 0x1bd   : > { %v3469_v8 = vmul.f32 %v1885_v54, %v6479_v19  ;;  %v1502_v42 = vpop.f32.mrf.mxu0  ;;  %v3470_v45 = vmul.f32 %v1934_v40, %v6479_v19  ;;  %v1551_v50 = vpop.f32.mrf.mxu1  ;;  %2676 = vmatpush.bf16.msra.mxu1 %v4871_v39  ;;  %v6528_v40 = vmul.f32 %v5450_v7, %v881_v27  ;;  %v6554_v7 = vld [vmem:[%s5790_s5 + $0x80] sm:$0xff]  ;;  %v503_v31 = vunpack.c.l.bf16 %v439_v10 }
 0x1be   : > { %v3383_v48 = vmul.f32 %v1502_v42, %v6220_v12  ;;  %v3384_v51 = vmul.f32 %v1551_v50, %v6220_v12  ;;  %v5074_v12 = vld [vmem:[%s5782_s8 + $0x5d0] sm:$0xf]  ;;  %v818_v42 = vmul.f32 %v5452_v34, %v690_v1  ;;  %v504_v39 = vunpack.c.h.bf16 %v439_v10 }
 0x1bf   : > { %3853 = vst [vmem:[%s6018_s14 + $0x510] sm:$0xff] %v3469_v8  ;;  %1985 = vmatmul.bf16.gmra.mxu0 %v6229_v33  ;;  %v5075_v60 = vor.u32 %v5292_v59, %v5074_v12  ;;  %v437_v8 = vld [vmem:[%s5790_s5 + $0x88] sm:$0xff]   ;;  %v4842_v1 = vld [vmem:[%s5782_s8 + $0x430] sm:$0xf]  ;;  %603 = vadd.xlane.f32.xlu0 %v503_v31 }
 0x1c0   : > { %3854 = vst [vmem:[%s6018_s14 + $0x518] sm:$0xff] %v3470_v45  ;;  %2034 = vmatmul.bf16.gmra.mxu1 %v6229_v33  ;;  %v501_v57 = vunpack.c.l.bf16 %v437_v8  ;;  %v5050_v45 = vld [vmem:[%s5782_s8 + $0x5a0] sm:$0xf]  ;;  %v882_v56 = vsub.f32 2.0, %v818_v42  ;;  %v4843_v5 = vor.u32 %v5240_v15, %v4842_v1  ;;  %v5274_v1 = vld [vmem:[%s5782_s8 + $0x554] sm:$0xf0] }
 0x1c1   : > { %3767 = vst [vmem:[%s6018_s14 + $0x260] sm:$0xff] %v3383_v48  ;;  %2083 = vmatmul.bf16.gmra.mxu2 %v6229_v33  ;;  %2132 = vmatmul.bf16.gmra.mxu3 %v6229_v33  ;;  %v502_v48 = vunpack.c.h.bf16 %v437_v8  ;;  %v4794_v10 = vld [vmem:[%s5782_s8 + $0x3d0] sm:$0xf]  ;;  %v5228_v31 = vld [vmem:[%s5782_s8 + $0x3e4] sm:$0xf0] }
 0x1c2   : > { %3768 = vst [vmem:[%s6018_s14 + $0x268] sm:$0xff] %v3384_v51  ;;  %3013 = vmatpush.bf16.msra.mxu2 %v5075_v60  ;;  %v5283_v51 = vld [vmem:[%s5782_s8 + $0x5a4] sm:$0xf]  ;;  %599 = vadd.xlane.f32.xlu1 %v501_v57 }
 0x1c3   : > { %v5055_v20 = vor.u32 %v5283_v51, %v5052_v53  ;;  %601 = vadd.xlane.f32.xlu2 %v502_v48  ;;  %2628 = vmatpush.bf16.msra.mxu0 %v4843_v5  ;;  %v4820_v51 = vld [vmem:[%s5782_s8 + $0x418] sm:$0xf0] }
 0x1c4   : > { %v1888_v63 = vpop.f32.mrf.mxu2  ;;  %v1937_v3 = vpop.f32.mrf.mxu3 }
 0x1c5   : > { %v3475_v2 = vmul.f32 %v1888_v63, %v6495_v55  ;;  %v1504_v33 = vpop.f32.mrf.mxu0  ;;  %v3476_v17 = vmul.f32 %v1937_v3, %v6495_v55  ;;  %v1553_v23 = vpop.f32.mrf.mxu1  ;;  %3063 = vmatpush.bf16.msra.mxu3 %v5055_v20  ;;  %v6545_v63 = vmul.f32 %v5452_v34, %v882_v56  ;;  %v4844_v3 = vld [vmem:[%s5782_s8 + $0x448] sm:$0xf0] }
 0x1c6   : > { %v3389_v11 = vmul.f32 %v1504_v33, %v6240_v44  ;;  %v3390_v13 = vmul.f32 %v1553_v23, %v6240_v44 }
 0x1c7   : > { %3859 = vst [vmem:[%s6018_s14 + $0x540] sm:$0xff] %v3475_v2  ;;  %v5237_v2 = vld [vmem:[%s5782_s8 + $0x434] sm:$0xf] }
 0x1c8   : > { %3860 = vst [vmem:[%s6018_s14 + $0x548] sm:$0xff] %v3476_v17  ;;  %v4847_v17 = vor.u32 %v5237_v2, %v4844_v3  ;;  %v5271_v2 = vld [vmem:[%s5782_s8 + $0x544] sm:$0xf]  ;;  %v5004_v3 = vld [vmem:[%s5782_s8 + $0x558] sm:$0xf0] }
 0x1c9   : > { %3773 = vst [vmem:[%s6018_s14 + $0x290] sm:$0xff] %v3389_v11 }
 0x1ca   : > { %3774 = vst [vmem:[%s6018_s14 + $0x298] sm:$0xff] %v3390_v13  ;;  %2677 = vmatpush.bf16.msra.mxu1 %v4847_v17  ;;  %605 = vadd.xlane.f32.xlu1 %v504_v39  ;;  %v5007_v17 = vor.u32 %v5271_v2, %v5004_v3  ;;  %v4796_v39 = vld [vmem:[%s5782_s8 + $0x3e8] sm:$0xf0] }
 0x1cc   : > { %v1890_v24 = vpop.f32.mrf.mxu2  ;;  %v1939_v41 = vpop.f32.mrf.mxu3 }
 0x1cd   : > { %v3481_v44 = vmul.f32 %v1890_v24, %v6512_v32  ;;  %v1507_v29 = vpop.f32.mrf.mxu0  ;;  %v3482_v54 = vmul.f32 %v1939_v41, %v6512_v32  ;;  %v1556_v37 = vpop.f32.mrf.mxu1  ;;  %v5280_v24 = vld [vmem:[%s5782_s8 + $0x584] sm:$0xf0]  ;;  %v5028_v41 = vld [vmem:[%s5782_s8 + $0x588] sm:$0xf0] }
 0x1ce   : > { %v3395_v46 = vmul.f32 %v1507_v29, %v6255_v47  ;;  %v3396_v49 = vmul.f32 %v1556_v37, %v6255_v47  ;;  %v5286_v47 = vld [vmem:[%s5782_s8 + $0x5b4] sm:$0xf0]  ;;  %v5027_v27 = vor.u32 %v5280_v24, %v5026_v22  ;;  %v4795_v22 = vor.u32 %v5228_v31, %v4794_v10  ;;  %v5225_v24 = vld [vmem:[%s5782_s8 + $0x3d4] sm:$0xf]  ;;  %v5259_v31 = vld [vmem:[%s5782_s8 + $0x4e4] sm:$0xf] }
 0x1cf   : > { %3865 = vst [vmem:[%s6018_s14 + $0x570] sm:$0xff] %v3481_v44  ;;  %1990 = vmatmul.bf16.gmra.mxu0 %v6264_v14  ;;  %v5051_v50 = vor.u32 %v5286_v47, %v5050_v45  ;;  %v5277_v44 = vld [vmem:[%s5782_s8 + $0x574] sm:$0xf]  ;;  %v4818_v45 = vld [vmem:[%s5782_s8 + $0x400] sm:$0xf] }
 0x1d0   : > { %3866 = vst [vmem:[%s6018_s14 + $0x578] sm:$0xff] %v3482_v54  ;;  %2039 = vmatmul.bf16.gmra.mxu1 %v6264_v14  ;;  %v5031_v34 = vor.u32 %v5277_v44, %v5028_v41  ;;  %v5234_v47 = vld [vmem:[%s5782_s8 + $0x414] sm:$0xf0]  ;;  %v4799_v44 = vor.u32 %v5225_v24, %v4796_v39 }
 0x1d1   : > { %3779 = vst [vmem:[%s6018_s14 + $0x2c0] sm:$0xff] %v3395_v46  ;;  %2088 = vmatmul.bf16.gmra.mxu2 %v6264_v14  ;;  %2137 = vmatmul.bf16.gmra.mxu3 %v6264_v14  ;;  %v4819_v48 = vor.u32 %v5234_v47, %v4818_v45 }
 0x1d2   : > { %3780 = vst [vmem:[%s6018_s14 + $0x2c8] sm:$0xff] %v3396_v49  ;;  %3014 = vmatpush.bf16.msra.mxu2 %v5051_v50  ;;  %3064 = vmatpush.bf16.msra.mxu3 %v5031_v34  ;;  %v5231_v50 = vld [vmem:[%s5782_s8 + $0x404] sm:$0xf] }
 0x1d3   : > { %2629 = vmatpush.bf16.msra.mxu0 %v4819_v48  ;;  %v5265_v48 = vld [vmem:[%s5782_s8 + $0x514] sm:$0xf] }
 0x1d4   : > { %v1893_v52 = vpop.f32.mrf.mxu2  ;;  %v1942_v14 = vpop.f32.mrf.mxu3 }
 0x1d5   : > { %v3487_v12 = vmul.f32 %v1893_v52, %v6528_v40  ;;  %v1509_v59 = vpop.f32.mrf.mxu0  ;;  %v3488_v26 = vmul.f32 %v1942_v14, %v6528_v40  ;;  %v1558_v62 = vpop.f32.mrf.mxu1  ;;  %v4823_v52 = vor.u32 %v5231_v50, %v4820_v51  ;;  %v4980_v50 = vld [vmem:[%s5782_s8 + $0x528] sm:$0xf0] }
 0x1d6   : > { %v3401_v60 = vmul.f32 %v1509_v59, %v6275_v38  ;;  %v3402_v0 = vmul.f32 %v1558_v62, %v6275_v38  ;;  %3015 = vmatpush.bf16.msra.mxu2 %v5027_v27  ;;  %v441_v62 = vld [vmem:[%s5790_s5 + $0x98] sm:$0xff]   ;;  %3065 = vmatpush.bf16.msra.mxu3 %v5007_v17 }
 0x1d7   : > { %3871 = vst [vmem:[%s6018_s14 + $0x5a0] sm:$0xff] %v3487_v12  ;;  %2678 = vmatpush.bf16.msra.mxu1 %v4823_v52  ;;  %v506_v15 = vunpack.c.h.bf16 %v441_v62  ;;  %2630 = vmatpush.bf16.msra.mxu0 %v4795_v22  ;;  %v4956_v22 = vld [vmem:[%s5782_s8 + $0x4f8] sm:$0xf0] }
 0x1d8   : > { %3872 = vst [vmem:[%s6018_s14 + $0x5a8] sm:$0xff] %v3488_v26  ;;  %v4959_v39 = vor.u32 %v5259_v31, %v4956_v22 }
 0x1d9   : > { %3785 = vst [vmem:[%s6018_s14 + $0x2f0] sm:$0xff] %v3401_v60  ;;  %609 = vadd.xlane.f32.xlu0 %v506_v15 }
 0x1da   : > { %3786 = vst [vmem:[%s6018_s14 + $0x2f8] sm:$0xff] %v3402_v0  ;;  %v5002_v0 = vld [vmem:[%s5782_s8 + $0x540] sm:$0xf] }
 0x1db   : > { %v5003_v5 = vor.u32 %v5274_v1, %v5002_v0  ;;  %2679 = vmatpush.bf16.msra.mxu1 %v4799_v44  ;;  %v5219_v0 = vld [vmem:[%s5782_s8 + $0x3a4] sm:$0xf]  ;;  %v4772_v1 = vld [vmem:[%s5782_s8 + $0x3b8] sm:$0xf0] }
 0x1dc   : > { %v1895_v33 = vpop.f32.mrf.mxu2  ;;  %v1944_v11 = vpop.f32.mrf.mxu3 }
 0x1dd   : > { %v3493_v38 = vmul.f32 %v1895_v33, %v6545_v63  ;;  %v1956_v23 = vpop.f32.mrf.mxu0  ;;  %v3494_v13 = vmul.f32 %v1944_v11, %v6545_v63  ;;  %v2005_v30 = vpop.f32.mrf.mxu1  ;;  %3016 = vmatpush.bf16.msra.mxu2 %v5003_v5  ;;  %v4775_v5 = vor.u32 %v5219_v0, %v4772_v1 }
 0x1de   : > { %v3405_v35 = vmul.f32 %v1956_v23, %v6302_v28  ;;  %v3406_v18 = vmul.f32 %v2005_v30, %v6302_v28 }
 0x1df   : > { %3877 = vst [vmem:[%s6018_s14 + $0x5d0] sm:$0xff] %v3493_v38  ;;  %2439 = vmatmul.bf16.vlgmr.msrb.gmra.mxu0 %v6554_v7  ;;  %2680 = vmatpush.bf16.msra.mxu1 %v4775_v5 }
 0x1e0   : > { %3878 = vst [vmem:[%s6018_s14 + $0x5d8] sm:$0xff] %v3494_v13  ;;  %2488 = vmatmul.bf16.vlgmr.msrb.gmra.mxu1 %v6554_v7 }
 0x1e1   : > { %3789 = vst [vmem:[%s6018_s14 + $0x310] sm:$0xff] %v3405_v35  ;;  %2537 = vmatmul.bf16.vlgmr.msrb.gmra.mxu2 %v6554_v7  ;;  %2586 = vmatmul.bf16.vlgmr.msrb.gmra.mxu3 %v6554_v7 }
 0x1e2   : > { %3790 = vst [vmem:[%s6018_s14 + $0x318] sm:$0xff] %v3406_v18 }
 0x1e4   : > { %v2054_v29 = vpop.f32.mrf.mxu2  ;;  %v2103_v46 = vpop.f32.mrf.mxu3 }
 0x1e5   : > { %v3407_v54 = vmul.f32 %v2054_v29, %v6302_v28  ;;  %v1958_v37 = vpop.f32.mrf.mxu0  ;;  %v3408_v49 = vmul.f32 %v2103_v46, %v6302_v28  ;;  %v2007_v42 = vpop.f32.mrf.mxu1  ;;  %v6586_v28 = vld [vmem:[%s5790_s5 + $0x88] sm:$0xff] }
 0x1e6   : > { %v3411_v8 = vmul.f32 %v1958_v37, %v6319_v16  ;;  %v3412_v57 = vmul.f32 %v2007_v42, %v6319_v16  ;;  %v4978_v42 = vld [vmem:[%s5782_s8 + $0x510] sm:$0xf] }
 0x1e7   : > { %3791 = vst [vmem:[%s6018_s14 + $0x320] sm:$0xff] %v3407_v54 }
 0x1e8   : > { %3792 = vst [vmem:[%s6018_s14 + $0x328] sm:$0xff] %v3408_v49 }
 0x1e9   : > { %3795 = vst [vmem:[%s6018_s14 + $0x340] sm:$0xff] %v3411_v8  ;;  %v443_v8 = vld [vmem:[%s5790_s5 + $0xa0] sm:$0xff]  }
 0x1ea   : > { %3796 = vst [vmem:[%s6018_s14 + $0x348] sm:$0xff] %v3412_v57  ;;  %v5268_v57 = vld [vmem:[%s5782_s8 + $0x524] sm:$0xf0]  ;;  %v508_v45 = vunpack.c.h.bf16 %v443_v8 }
 0x1eb   : > { %v4979_v47 = vor.u32 %v5268_v57, %v4978_v42  ;;  %v4748_v42 = vld [vmem:[%s5782_s8 + $0x388] sm:$0xf0] }
 0x1ec   : > { %v2056_v53 = vpop.f32.mrf.mxu2  ;;  %v2105_v56 = vpop.f32.mrf.mxu3 }
 0x1ed   : > { %v3413_v20 = vmul.f32 %v2056_v53, %v6319_v16  ;;  %v1961_v12 = vpop.f32.mrf.mxu0  ;;  %v3414_v14 = vmul.f32 %v2105_v56, %v6319_v16  ;;  %v2010_v26 = vpop.f32.mrf.mxu1  ;;  %v505_v16 = vunpack.c.l.bf16 %v441_v62  ;;  %v4983_v53 = vor.u32 %v5265_v48, %v4980_v50  ;;  %3017 = vmatpush.bf16.msra.mxu2 %v4979_v47  ;;  %v5222_v62 = vld [vmem:[%s5782_s8 + $0x3b4] sm:$0xf0] }
 0x1ee   : > { %v3417_v59 = vmul.f32 %v1961_v12, %v6334_v25  ;;  %v3418_v60 = vmul.f32 %v2010_v26, %v6334_v25 }
 0x1ef   : > { %3797 = vst [vmem:[%s6018_s14 + $0x350] sm:$0xff] %v3413_v20  ;;  %2444 = vmatmul.bf16.gmra.mxu0 %v6586_v28  ;;  %607 = vadd.xlane.f32.xlu2 %v505_v16 }
 0x1f0   : > { %3798 = vst [vmem:[%s6018_s14 + $0x358] sm:$0xff] %v3414_v14  ;;  %2493 = vmatmul.bf16.gmra.mxu1 %v6586_v28  ;;  %3066 = vmatpush.bf16.msra.mxu3 %v4983_v53 }
 0x1f1   : > { %3801 = vst [vmem:[%s6018_s14 + $0x370] sm:$0xff] %v3417_v59  ;;  %2542 = vmatmul.bf16.gmra.mxu2 %v6586_v28  ;;  %2591 = vmatmul.bf16.gmra.mxu3 %v6586_v28 }
 0x1f2   : > { %3802 = vst [vmem:[%s6018_s14 + $0x378] sm:$0xff] %v3418_v60  ;;  %v4770_v60 = vld [vmem:[%s5782_s8 + $0x3a0] sm:$0xf] }
 0x1f3   : > { %v4771_v16 = vor.u32 %v5222_v62, %v4770_v60  ;;  %v5253_v60 = vld [vmem:[%s5782_s8 + $0x4b4] sm:$0xf]  ;;  %v4932_v62 = vld [vmem:[%s5782_s8 + $0x4c8] sm:$0xf0] }
 0x1f4   : > { %v2059_v33 = vpop.f32.mrf.mxu2  ;;  %v2108_v11 = vpop.f32.mrf.mxu3  ;;  %3067 = vmatpush.bf16.msra.mxu3 %v4959_v39  ;;  %v4935_v0 = vor.u32 %v5253_v60, %v4932_v62 }
 0x1f5   : > { %v3419_v38 = vmul.f32 %v2059_v33, %v6334_v25  ;;  %v1963_v23 = vpop.f32.mrf.mxu0  ;;  %v3420_v13 = vmul.f32 %v2108_v11, %v6334_v25  ;;  %v2012_v30 = vpop.f32.mrf.mxu1  ;;  %v6618_v25 = vld [vmem:[%s5790_s5 + $0x90] sm:$0xff]  ;;  %2631 = vmatpush.bf16.msra.mxu0 %v4771_v16 }
 0x1f6   : > { %v3423_v35 = vmul.f32 %v1963_v23, %v6351_v58  ;;  %v3424_v18 = vmul.f32 %v2012_v30, %v6351_v58  ;;  %v5262_v30 = vld [vmem:[%s5782_s8 + $0x4f4] sm:$0xf0] }
 0x1f7   : > { %3803 = vst [vmem:[%s6018_s14 + $0x380] sm:$0xff] %v3419_v38  ;;  %613 = vadd.xlane.f32.xlu2 %v508_v45 }
 0x1f8   : > { %3804 = vst [vmem:[%s6018_s14 + $0x388] sm:$0xff] %v3420_v13  ;;  %v445_v13 = vld [vmem:[%s5790_s5 + $0xa8] sm:$0xff]   ;;  %3068 = vmatpush.bf16.msra.mxu3 %v4935_v0 }
 0x1f9   : > { %3807 = vst [vmem:[%s6018_s14 + $0x3a0] sm:$0xff] %v3423_v35  ;;  %v4954_v35 = vld [vmem:[%s5782_s8 + $0x4e0] sm:$0xf] }
 0x1fa   : > { %3808 = vst [vmem:[%s6018_s14 + $0x3a8] sm:$0xff] %v3424_v18  ;;  %v510_v18 = vunpack.c.h.bf16 %v445_v13  ;;  %v4955_v10 = vor.u32 %v5262_v30, %v4954_v35 }
 0x1fc   : > { %v2061_v27 = vpop.f32.mrf.mxu2  ;;  %v2110_v29 = vpop.f32.mrf.mxu3  ;;  %3018 = vmatpush.bf16.msra.mxu2 %v4955_v10 }
 0x1fd   : > { %v3425_v41 = vmul.f32 %v2061_v27, %v6351_v58  ;;  %v1966_v34 = vpop.f32.mrf.mxu0  ;;  %v3426_v54 = vmul.f32 %v2110_v29, %v6351_v58  ;;  %v2015_v37 = vpop.f32.mrf.mxu1  ;;  %v507_v58 = vunpack.c.l.bf16 %v443_v8 }
 0x1fe   : > { %v3429_v46 = vmul.f32 %v1966_v34, %v6366_v21  ;;  %v3430_v49 = vmul.f32 %v2015_v37, %v6366_v21  ;;  %v4746_v37 = vld [vmem:[%s5782_s8 + $0x370] sm:$0xf] }
 0x1ff   : > { %3809 = vst [vmem:[%s6018_s14 + $0x3b0] sm:$0xff] %v3425_v41  ;;  %2449 = vmatmul.bf16.gmra.mxu0 %v6618_v25  ;;  %611 = vadd.xlane.f32.xlu1 %v507_v58  ;;  %v5213_v58 = vld [vmem:[%s5782_s8 + $0x374] sm:$0xf] }
 0x200   : > { %3810 = vst [vmem:[%s6018_s14 + $0x3b8] sm:$0xff] %v3426_v54  ;;  %2498 = vmatmul.bf16.gmra.mxu1 %v6618_v25  ;;  %v4751_v45 = vor.u32 %v5213_v58, %v4748_v42 }
 0x201   : > { %3813 = vst [vmem:[%s6018_s14 + $0x3d0] sm:$0xff] %v3429_v46  ;;  %2547 = vmatmul.bf16.gmra.mxu2 %v6618_v25  ;;  %2596 = vmatmul.bf16.gmra.mxu3 %v6618_v25 }
 0x202   : > { %3814 = vst [vmem:[%s6018_s14 + $0x3d8] sm:$0xff] %v3430_v49  ;;  %v5216_v49 = vld [vmem:[%s5782_s8 + $0x384] sm:$0xf0]  ;;  %2681 = vmatpush.bf16.msra.mxu1 %v4751_v45 }
 0x203   : > { %v4747_v8 = vor.u32 %v5216_v49, %v4746_v37  ;;  %v4908_v37 = vld [vmem:[%s5782_s8 + $0x498] sm:$0xf0] }
 0x204   : > { %v2064_v51 = vpop.f32.mrf.mxu2  ;;  %v2113_v20 = vpop.f32.mrf.mxu3 }
 0x205   : > { %v3431_v52 = vmul.f32 %v2064_v51, %v6366_v21  ;;  %v1968_v56 = vpop.f32.mrf.mxu0  ;;  %v3432_v12 = vmul.f32 %v2113_v20, %v6366_v21  ;;  %v2017_v59 = vpop.f32.mrf.mxu1  ;;  %v6650_v21 = vld [vmem:[%s5790_s5 + $0x98] sm:$0xff]  ;;  %2632 = vmatpush.bf16.msra.mxu0 %v4747_v8 }
 0x206   : > { %v3435_v14 = vmul.f32 %v1968_v56, %v6383_v4  ;;  %v3436_v26 = vmul.f32 %v2017_v59, %v6383_v4  ;;  %v447_v56 = vld [vmem:[%s5790_s5 + $0xb0] sm:$0xff]  }
 0x207   : > { %3815 = vst [vmem:[%s6018_s14 + $0x3e0] sm:$0xff] %v3431_v52  ;;  %617 = vadd.xlane.f32.xlu1 %v510_v18  ;;  %v512_v59 = vunpack.c.h.bf16 %v447_v56 }
 0x208   : > { %3816 = vst [vmem:[%s6018_s14 + $0x3e8] sm:$0xff] %v3432_v12  ;;  %v4930_v12 = vld [vmem:[%s5782_s8 + $0x4b0] sm:$0xf] }
 0x209   : > { %3819 = vst [vmem:[%s6018_s14 + $0x400] sm:$0xff] %v3435_v14  ;;  %v5256_v14 = vld [vmem:[%s5782_s8 + $0x4c4] sm:$0xf0] }
 0x20a   : > { %3820 = vst [vmem:[%s6018_s14 + $0x408] sm:$0xff] %v3436_v26  ;;  %v4931_v26 = vor.u32 %v5256_v14, %v4930_v12 }
 0x20c   : > { %v2066_v15 = vpop.f32.mrf.mxu2  ;;  %v2115_v3 = vpop.f32.mrf.mxu3  ;;  %3019 = vmatpush.bf16.msra.mxu2 %v4931_v26 }
 0x20d   : > { %v3437_v2 = vmul.f32 %v2066_v15, %v6383_v4  ;;  %v1971_v33 = vpop.f32.mrf.mxu0  ;;  %v3438_v17 = vmul.f32 %v2115_v3, %v6383_v4  ;;  %v2020_v11 = vpop.f32.mrf.mxu1  ;;  %v509_v4 = vunpack.c.l.bf16 %v445_v13  ;;  %v5207_v13 = vld [vmem:[%s5782_s8 + $0x344] sm:$0xf] }
 0x20e   : > { %v3441_v38 = vmul.f32 %v1971_v33, %v6398_v9  ;;  %v3442_v23 = vmul.f32 %v2020_v11, %v6398_v9  ;;  %v5210_v11 = vld [vmem:[%s5782_s8 + $0x354] sm:$0xf0] }
 0x20f   : > { %3821 = vst [vmem:[%s6018_s14 + $0x410] sm:$0xff] %v3437_v2  ;;  %2454 = vmatmul.bf16.gmra.mxu0 %v6650_v21  ;;  %615 = vadd.xlane.f32.xlu0 %v509_v4  ;;  %v4724_v4 = vld [vmem:[%s5782_s8 + $0x358] sm:$0xf0] }
 0x210   : > { %3822 = vst [vmem:[%s6018_s14 + $0x418] sm:$0xff] %v3438_v17  ;;  %2503 = vmatmul.bf16.gmra.mxu1 %v6650_v21  ;;  %v4727_v30 = vor.u32 %v5207_v13, %v4724_v4 }
 0x211   : > { %3825 = vst [vmem:[%s6018_s14 + $0x430] sm:$0xff] %v3441_v38  ;;  %2552 = vmatmul.bf16.gmra.mxu2 %v6650_v21  ;;  %2601 = vmatmul.bf16.gmra.mxu3 %v6650_v21  ;;  %v4722_v38 = vld [vmem:[%s5782_s8 + $0x340] sm:$0xf] }
 0x212   : > { %3826 = vst [vmem:[%s6018_s14 + $0x438] sm:$0xff] %v3442_v23  ;;  %v4723_v23 = vor.u32 %v5210_v11, %v4722_v38  ;;  %2682 = vmatpush.bf16.msra.mxu1 %v4727_v30 }
 0x214   : > { %v2069_v24 = vpop.f32.mrf.mxu2  ;;  %v2118_v44 = vpop.f32.mrf.mxu3  ;;  %2633 = vmatpush.bf16.msra.mxu0 %v4723_v23 }
 0x215   : > { %v3443_v27 = vmul.f32 %v2069_v24, %v6398_v9  ;;  %v1973_v41 = vpop.f32.mrf.mxu0  ;;  %v3444_v29 = vmul.f32 %v2118_v44, %v6398_v9  ;;  %v2022_v54 = vpop.f32.mrf.mxu1  ;;  %v6682_v9 = vld [vmem:[%s5790_s5 + $0xa0] sm:$0xff]  ;;  %v449_v44 = vld [vmem:[%s5790_s5 + $0xb8] sm:$0xff]  }
 0x216   : > { %v3447_v34 = vmul.f32 %v1973_v41, %v6415_v43  ;;  %v3448_v46 = vmul.f32 %v2022_v54, %v6415_v43  ;;  %v4906_v41 = vld [vmem:[%s5782_s8 + $0x480] sm:$0xf] }
 0x217   : > { %3827 = vst [vmem:[%s6018_s14 + $0x440] sm:$0xff] %v3443_v27  ;;  %621 = vadd.xlane.f32.xlu0 %v512_v59 }
 0x218   : > { %3828 = vst [vmem:[%s6018_s14 + $0x448] sm:$0xff] %v3444_v29  ;;  %v5250_v29 = vld [vmem:[%s5782_s8 + $0x494] sm:$0xf0] }
 0x219   : > { %3831 = vst [vmem:[%s6018_s14 + $0x460] sm:$0xff] %v3447_v34  ;;  %v514_v34 = vunpack.c.h.bf16 %v449_v44  ;;  %v4907_v54 = vor.u32 %v5250_v29, %v4906_v41  ;;  %v6772_v29 = vld [vmem:[%s5790_s5 + $0xb8] sm:$0xff] }
 0x21a   : > { %3832 = vst [vmem:[%s6018_s14 + $0x468] sm:$0xff] %v3448_v46  ;;  %v5247_v46 = vld [vmem:[%s5782_s8 + $0x484] sm:$0xf] }
 0x21b   : > { %v4911_v8 = vor.u32 %v5247_v46, %v4908_v37  ;;  %3020 = vmatpush.bf16.msra.mxu2 %v4907_v54 }
 0x21c   : > { %v2071_v57 = vpop.f32.mrf.mxu2  ;;  %v2120_v48 = vpop.f32.mrf.mxu3 }
 0x21d   : > { %v3449_v47 = vmul.f32 %v2071_v57, %v6415_v43  ;;  %v1976_v50 = vpop.f32.mrf.mxu0  ;;  %v3450_v51 = vmul.f32 %v2120_v48, %v6415_v43  ;;  %v2025_v52 = vpop.f32.mrf.mxu1  ;;  %v511_v43 = vunpack.c.l.bf16 %v447_v56  ;;  %3069 = vmatpush.bf16.msra.mxu3 %v4911_v8  ;;  %v4700_v56 = vld [vmem:[%s5782_s8 + $0x328] sm:$0xf0] }
 0x21e   : > { %v3453_v53 = vmul.f32 %v1976_v50, %v6430_v6  ;;  %v3454_v20 = vmul.f32 %v2025_v52, %v6430_v6 }
 0x21f   : > { %3833 = vst [vmem:[%s6018_s14 + $0x470] sm:$0xff] %v3449_v47  ;;  %2459 = vmatmul.bf16.gmra.mxu0 %v6682_v9  ;;  %619 = vadd.xlane.f32.xlu2 %v511_v43 }
 0x220   : > { %3834 = vst [vmem:[%s6018_s14 + $0x478] sm:$0xff] %v3450_v51  ;;  %2508 = vmatmul.bf16.gmra.mxu1 %v6682_v9  ;;  %v4698_v51 = vld [vmem:[%s5782_s8 + $0x310] sm:$0xf] }
 0x221   : > { %3837 = vst [vmem:[%s6018_s14 + $0x490] sm:$0xff] %v3453_v53  ;;  %2557 = vmatmul.bf16.gmra.mxu2 %v6682_v9  ;;  %2606 = vmatmul.bf16.gmra.mxu3 %v6682_v9  ;;  %v5204_v53 = vld [vmem:[%s5782_s8 + $0x324] sm:$0xf0] }
 0x222   : > { %3838 = vst [vmem:[%s6018_s14 + $0x498] sm:$0xff] %v3454_v20  ;;  %v4699_v52 = vor.u32 %v5204_v53, %v4698_v51  ;;  %v5201_v20 = vld [vmem:[%s5782_s8 + $0x314] sm:$0xf]  ;;  %v5066_v51 = vld [vmem:[%s5782_s8 + $0x5b0] sm:$0xf] }
 0x223   : > { %v4703_v12 = vor.u32 %v5201_v20, %v4700_v56  ;;  %v5288_v53 = vld [vmem:[%s5782_s8 + $0x5c4] sm:$0xf0]  ;;  %v5285_v20 = vld [vmem:[%s5782_s8 + $0x5b4] sm:$0xf]  ;;  %v5068_v56 = vld [vmem:[%s5782_s8 + $0x5c8] sm:$0xf0] }
 0x224   : > { %v2074_v16 = vpop.f32.mrf.mxu2  ;;  %v2123_v15 = vpop.f32.mrf.mxu3  ;;  %2634 = vmatpush.bf16.msra.mxu0 %v4699_v52  ;;  %v5067_v52 = vor.u32 %v5288_v53, %v5066_v51 }
 0x225   : > { %v3455_v1 = vmul.f32 %v2074_v16, %v6430_v6  ;;  %v1978_v5 = vpop.f32.mrf.mxu0  ;;  %v3456_v2 = vmul.f32 %v2123_v15, %v6430_v6  ;;  %v2027_v33 = vpop.f32.mrf.mxu1  ;;  %v6714_v6 = vld [vmem:[%s5790_s5 + $0xa8] sm:$0xff]  ;;  %2683 = vmatpush.bf16.msra.mxu1 %v4703_v12 }
 0x226   : > { %v3459_v3 = vmul.f32 %v1978_v5, %v6447_v36  ;;  %v3460_v17 = vmul.f32 %v2027_v33, %v6447_v36  ;;  %v5090_v5 = vld [vmem:[%s5782_s8 + $0x5e0] sm:$0xf]  ;;  %v5291_v33 = vld [vmem:[%s5782_s8 + $0x5e4] sm:$0xf] }
 0x227   : > { %3839 = vst [vmem:[%s6018_s14 + $0x4a0] sm:$0xff] %v3455_v1  ;;  %625 = vadd.xlane.f32.xlu2 %v514_v34  ;;  %v451_v1 = vld [vmem:[%s5790_s5 + $0xc0] sm:$0xff]  }
 0x228   : > { %3840 = vst [vmem:[%s6018_s14 + $0x4a8] sm:$0xff] %v3456_v2  ;;  %v515_v15 = vunpack.c.l.bf16 %v451_v1  ;;  %v5294_v2 = vld [vmem:[%s5782_s8 + $0x5f4] sm:$0xf0] }
 0x229   : > { %3843 = vst [vmem:[%s6018_s14 + $0x4c0] sm:$0xff] %v3459_v3  ;;  %v5091_v3 = vor.u32 %v5294_v2, %v5090_v5 }
 0x22a   : > { %3844 = vst [vmem:[%s6018_s14 + $0x4c8] sm:$0xff] %v3460_v17  ;;  %v5092_v17 = vld [vmem:[%s5782_s8 + $0x5f8] sm:$0xf0]  ;;  %627 = vadd.xlane.f32.xlu0 %v515_v15 }
 0x22b   : > { %v5095_v11 = vor.u32 %v5291_v33, %v5092_v17  ;;  %3209 = vmatpush.bf16.msrb.mxu2 %v5091_v3  ;;  %v5058_v3 = vld [vmem:[%s5782_s8 + $0x5a8] sm:$0xf]  ;;  %v5287_v33 = vld [vmem:[%s5782_s8 + $0x5bc] sm:$0xf0] }
 0x22c   : > { %v2076_v35 = vpop.f32.mrf.mxu2  ;;  %v2125_v10 = vpop.f32.mrf.mxu3  ;;  %v5059_v17 = vor.u32 %v5287_v33, %v5058_v3 }
 0x22d   : > { %v3461_v18 = vmul.f32 %v2076_v35, %v6447_v36  ;;  %v1981_v31 = vpop.f32.mrf.mxu0  ;;  %v3462_v22 = vmul.f32 %v2125_v10, %v6447_v36  ;;  %v2030_v39 = vpop.f32.mrf.mxu1  ;;  %v513_v36 = vunpack.c.l.bf16 %v449_v44  ;;  %3258 = vmatpush.bf16.msrb.mxu3 %v5095_v11  ;;  %v5060_v11 = vld [vmem:[%s5782_s8 + $0x5c0] sm:$0xf0] }
 0x22e   : > { %v3465_v24 = vmul.f32 %v1981_v31, %v6462_v61  ;;  %v3466_v27 = vmul.f32 %v2030_v39, %v6462_v61  ;;  %v5082_v39 = vld [vmem:[%s5782_s8 + $0x5d8] sm:$0xf] }
 0x22f   : > { %3845 = vst [vmem:[%s6018_s14 + $0x4d0] sm:$0xff] %v3461_v18  ;;  %2464 = vmatmul.bf16.gmra.mxu0 %v6714_v6  ;;  %623 = vadd.xlane.f32.xlu1 %v513_v36  ;;  %v5290_v36 = vld [vmem:[%s5782_s8 + $0x5dc] sm:$0xf] }
 0x230   : > { %3846 = vst [vmem:[%s6018_s14 + $0x4d8] sm:$0xff] %v3462_v22  ;;  %2513 = vmatmul.bf16.gmra.mxu1 %v6714_v6  ;;  %v516_v22 = vunpack.c.h.bf16 %v451_v1  ;;  %3210 = vmatpush.bf16.msrb.mxu2 %v5067_v52 }
 0x231   : > { %3849 = vst [vmem:[%s6018_s14 + $0x4f0] sm:$0xff] %v3465_v24  ;;  %2562 = vmatmul.bf16.gmra.mxu2 %v6714_v6  ;;  %2611 = vmatmul.bf16.gmra.mxu3 %v6714_v6  ;;  %v598_v24 = vpop.xlane.xlu0 %597 }
 0x232   : > { %3850 = vst [vmem:[%s6018_s14 + $0x4f8] sm:$0xff] %v3466_v27  ;;  %v5293_v27 = vld [vmem:[%s5782_s8 + $0x5ec] sm:$0xf0] }
 0x233   : > { %v5083_v44 = vor.u32 %v5293_v27, %v5082_v39 }
 0x234   : > { %v2079_v49 = vpop.f32.mrf.mxu2  ;;  %v2128_v42 = vpop.f32.mrf.mxu3 }
 0x235   : > { %v3467_v58 = vmul.f32 %v2079_v49, %v6462_v61  ;;  %v1983_v57 = vpop.f32.mrf.mxu0  ;;  %v3468_v45 = vmul.f32 %v2128_v42, %v6462_v61  ;;  %v2032_v48 = vpop.f32.mrf.mxu1  ;;  %v5317_v61 = vld [vmem:[%s5790_s5 + $0xb0] sm:$0xff]  ;;  %v692_v49 = vadd.f32 1.0, %v598_v24  ;;  %3111 = vmatpush.bf16.msrb.mxu0 %v5083_v44 }
 0x236   : > { %v3471_v47 = vmul.f32 %v1983_v57, %v6479_v19  ;;  %v3472_v50 = vmul.f32 %v2032_v48, %v6479_v19 }
 0x237   : > { %3851 = vst [vmem:[%s6018_s14 + $0x500] sm:$0xff] %v3467_v58  ;;  %629 = vadd.xlane.f32.xlu1 %v516_v22 }
 0x238   : > { %3852 = vst [vmem:[%s6018_s14 + $0x508] sm:$0xff] %v3468_v45 }
 0x239   : > { %3855 = vst [vmem:[%s6018_s14 + $0x520] sm:$0xff] %v3471_v47  ;;  %v453_v47 = vld [vmem:[%s5790_s5 + $0xc8] sm:$0xff]   ;;  %3112 = vmatpush.bf16.msrb.mxu0 %v5059_v17 }
 0x23a   : > { %3856 = vst [vmem:[%s6018_s14 + $0x528] sm:$0xff] %v3472_v50  ;;  %v600_v50 = vpop.xlane.xlu1 %599 }
 0x23c   : > { %v2081_v43 = vpop.f32.mrf.mxu2  ;;  %v2130_v59 = vpop.f32.mrf.mxu3 }
 0x23d   : > { %v3473_v14 = vmul.f32 %v2081_v43, %v6479_v19  ;;  %v1986_v26 = vpop.f32.mrf.mxu0  ;;  %v3474_v60 = vmul.f32 %v2130_v59, %v6479_v19  ;;  %v2035_v16 = vpop.f32.mrf.mxu1 }
 0x23e   : > { %v3477_v62 = vmul.f32 %v1986_v26, %v6495_v55  ;;  %v3478_v0 = vmul.f32 %v2035_v16, %v6495_v55  ;;  %v596_v19 = vpop.xlane.xlu2 %595  ;;  %v693_v26 = vadd.f32 1.0, %v600_v50 }
 0x23f   : > { %3857 = vst [vmem:[%s6018_s14 + $0x530] sm:$0xff] %v3473_v14  ;;  %2469 = vmatmul.bf16.gmra.mxu0 %v5317_v61  ;;  %v691_v35 = vadd.f32 1.0, %v596_v19  ;;  %v518_v19 = vunpack.c.h.bf16 %v453_v47 }
 0x240   : > { %3858 = vst [vmem:[%s6018_s14 + $0x538] sm:$0xff] %v3474_v60  ;;  %2518 = vmatmul.bf16.gmra.mxu1 %v5317_v61 }
 0x241   : > { %3861 = vst [vmem:[%s6018_s14 + $0x550] sm:$0xff] %v3477_v62  ;;  %2567 = vmatmul.bf16.gmra.mxu2 %v5317_v61  ;;  %2616 = vmatmul.bf16.gmra.mxu3 %v5317_v61  ;;  %5453 = vrcp.f32 %v691_v35  ;;  %v5071_v61 = vor.u32 %v5285_v20, %v5068_v56 }
 0x242   : > { %3862 = vst [vmem:[%s6018_s14 + $0x558] sm:$0xff] %v3478_v0  ;;  %5455 = vrcp.f32 %v692_v49  ;;  %633 = vadd.xlane.f32.xlu0 %v518_v19  ;;  %v6843_v19 = vld [vmem:[%s5790_s5 + $0xc8] sm:$0xff] }
 0x243   : > { %3259 = vmatpush.bf16.msrb.mxu3 %v5071_v61  ;;  %5457 = vrcp.f32 %v693_v26  ;;  %v606_v61 = vpop.xlane.xlu1 %605 }
 0x244   : > { %v2084_v38 = vpop.f32.mrf.mxu2  ;;  %v2133_v13 = vpop.f32.mrf.mxu3 }
 0x245   : > { %v3479_v23 = vmul.f32 %v2084_v38, %v6495_v55  ;;  %v1988_v4 = vpop.f32.mrf.mxu0  ;;  %v3480_v30 = vmul.f32 %v2133_v13, %v6495_v55  ;;  %v2037_v10 = vpop.f32.mrf.mxu1  ;;  %v5084_v55 = vld [vmem:[%s5782_s8 + $0x5f0] sm:$0xf0]  ;;  %v5284_v38 = vld [vmem:[%s5782_s8 + $0x5ac] sm:$0xf] }
 0x246   : > { %v3483_v18 = vmul.f32 %v1988_v4, %v6512_v32  ;;  %v3484_v31 = vmul.f32 %v2037_v10, %v6512_v32  ;;  %v5087_v34 = vor.u32 %v5290_v36, %v5084_v55  ;;  %v602_v2 = vpop.xlane.xlu2 %601  ;;  %v5063_v13 = vor.u32 %v5284_v38, %v5060_v11  ;;  %v455_v36 = vld [vmem:[%s5790_s5 + $0xd0] sm:$0xff]  }
 0x247   : > { %3863 = vst [vmem:[%s6018_s14 + $0x560] sm:$0xff] %v3479_v23  ;;  %v5454_v57 = vpop.eup %5453  ;;  %v694_v10 = vadd.f32 1.0, %v602_v2  ;;  %v520_v20 = vunpack.c.h.bf16 %v455_v36 }
 0x248   : > { %3864 = vst [vmem:[%s6018_s14 + $0x568] sm:$0xff] %v3480_v30  ;;  %3160 = vmatpush.bf16.msrb.mxu1 %v5087_v34  ;;  %v819_v48 = vmul.f32 %v5454_v57, %v691_v35  ;;  %v5456_v1 = vpop.eup %5455  ;;  %v604_v34 = vpop.xlane.xlu0 %603 }
 0x249   : > { %3867 = vst [vmem:[%s6018_s14 + $0x580] sm:$0xff] %v3483_v18  ;;  %v6807_v18 = vld [vmem:[%s5790_s5 + $0xc0] sm:$0xff]  ;;  %v5458_v27 = vpop.eup %5457  ;;  %5459 = vrcp.f32 %v694_v10 }
 0x24a   : > { %3868 = vst [vmem:[%s6018_s14 + $0x588] sm:$0xff] %v3484_v31  ;;  %v883_v62 = vsub.f32 2.0, %v819_v48 }
 0x24c   : > { %v2086_v41 = vpop.f32.mrf.mxu2  ;;  %v2135_v46 = vpop.f32.mrf.mxu3  ;;  %v6798_v5 = vmul.f32 %v5454_v57, %v883_v62  ;;  %3161 = vmatpush.bf16.msrb.mxu1 %v5063_v13 }
 0x24d   : > { %v3485_v54 = vmul.f32 %v2086_v41, %v6512_v32  ;;  %v1991_v37 = vpop.f32.mrf.mxu0  ;;  %v3486_v8 = vmul.f32 %v2135_v46, %v6512_v32  ;;  %v2040_v42 = vpop.f32.mrf.mxu1  ;;  %v517_v32 = vunpack.c.l.bf16 %v453_v47  ;;  %v821_v41 = vmul.f32 %v5458_v27, %v693_v26  ;;  %v5282_v46 = vld [vmem:[%s5782_s8 + $0x594] sm:$0xf0]  ;;  %v5278_v26 = vld [vmem:[%s5782_s8 + $0x57c] sm:$0xf] }
 0x24e   : > { %v3489_v58 = vmul.f32 %v1991_v37, %v6528_v40  ;;  %v3490_v45 = vmul.f32 %v2040_v42, %v6528_v40  ;;  %v695_v47 = vadd.f32 1.0, %v604_v34 }
 0x24f   : > { %3869 = vst [vmem:[%s6018_s14 + $0x590] sm:$0xff] %v3485_v54  ;;  %2474 = vmatmul.bf16.gmra.mxu0 %v6772_v29  ;;  %631 = vadd.xlane.f32.xlu2 %v517_v32  ;;  %v5042_v54 = vld [vmem:[%s5782_s8 + $0x580] sm:$0xf]  ;;  %v885_v48 = vsub.f32 2.0, %v821_v41  ;;  %v5460_v53 = vpop.eup %5459 }
 0x250   : > { %3870 = vst [vmem:[%s6018_s14 + $0x598] sm:$0xff] %v3486_v8  ;;  %2523 = vmatmul.bf16.gmra.mxu1 %v6772_v29  ;;  %v5043_v37 = vor.u32 %v5282_v46, %v5042_v54  ;;  %v5044_v8 = vld [vmem:[%s5782_s8 + $0x598] sm:$0xf0]  ;;  %5461 = vrcp.f32 %v695_v47 }
 0x251   : > { %3873 = vst [vmem:[%s6018_s14 + $0x5b0] sm:$0xff] %v3489_v58  ;;  %2572 = vmatmul.bf16.gmra.mxu2 %v6772_v29  ;;  %2621 = vmatmul.bf16.gmra.mxu3 %v6772_v29  ;;  %v6834_v56 = vmul.f32 %v5458_v27, %v885_v48  ;;  %v5272_v48 = vld [vmem:[%s5782_s8 + $0x54c] sm:$0xf] }
 0x252   : > { %3874 = vst [vmem:[%s6018_s14 + $0x5b8] sm:$0xff] %v3490_v45  ;;  %3211 = vmatpush.bf16.msrb.mxu2 %v5043_v37 }
 0x254   : > { %v2089_v43 = vpop.f32.mrf.mxu2  ;;  %v2138_v14 = vpop.f32.mrf.mxu3 }
 0x255   : > { %v3491_v12 = vmul.f32 %v2089_v43, %v6528_v40  ;;  %v1993_v59 = vpop.f32.mrf.mxu0  ;;  %v3492_v60 = vmul.f32 %v2138_v14, %v6528_v40  ;;  %v2042_v0 = vpop.f32.mrf.mxu1  ;;  %v820_v40 = vmul.f32 %v5456_v1, %v692_v49  ;;  %v5279_v49 = vld [vmem:[%s5782_s8 + $0x584] sm:$0xf]  ;;  %v822_v43 = vmul.f32 %v5460_v53, %v694_v10  ;;  %v5281_v14 = vld [vmem:[%s5782_s8 + $0x58c] sm:$0xf0] }
 0x256   : > { %v3495_v16 = vmul.f32 %v1993_v59, %v6545_v63  ;;  %v3496_v15 = vmul.f32 %v2042_v0, %v6545_v63  ;;  %v5047_v58 = vor.u32 %v5279_v49, %v5044_v8  ;;  %v5462_v38 = vpop.eup %5461  ;;  %v5018_v10 = vld [vmem:[%s5782_s8 + $0x550] sm:$0xf] }
 0x257   : > { %3875 = vst [vmem:[%s6018_s14 + $0x5c0] sm:$0xff] %v3491_v12  ;;  %v884_v31 = vsub.f32 2.0, %v820_v40  ;;  %v5034_v12 = vld [vmem:[%s5782_s8 + $0x578] sm:$0xf]  ;;  %637 = vadd.xlane.f32.xlu2 %v520_v20  ;;  %v696_v40 = vadd.f32 1.0, %v606_v61  ;;  %v886_v2 = vsub.f32 2.0, %v822_v43 }
 0x258   : > { %3876 = vst [vmem:[%s6018_s14 + $0x5c8] sm:$0xff] %v3492_v60  ;;  %3260 = vmatpush.bf16.msrb.mxu3 %v5047_v58  ;;  %v5035_v59 = vor.u32 %v5281_v14, %v5034_v12  ;;  %v5036_v60 = vld [vmem:[%s5782_s8 + $0x590] sm:$0xf0] }
 0x259   : > { %3879 = vst [vmem:[%s6018_s14 + $0x5e0] sm:$0xff] %v3495_v16  ;;  %v6819_v55 = vmul.f32 %v5456_v1, %v884_v31  ;;  %v5039_v16 = vor.u32 %v5278_v26, %v5036_v60  ;;  %5463 = vrcp.f32 %v696_v40  ;;  %v5276_v31 = vld [vmem:[%s5782_s8 + $0x564] sm:$0xf0]  ;;  %v6879_v61 = vld [vmem:[%s5790_s5 + $0xd0] sm:$0xff] }
 0x25a   : > { %3880 = vst [vmem:[%s6018_s14 + $0x5e8] sm:$0xff] %v3496_v15  ;;  %3113 = vmatpush.bf16.msrb.mxu0 %v5035_v59 }
 0x25b   : > { %3162 = vmatpush.bf16.msrb.mxu1 %v5039_v16 }
 0x25c   : > { %v2091_v23 = vpop.f32.mrf.mxu2  ;;  %v2140_v35 = vpop.f32.mrf.mxu3 }
 0x25d   : > { %v3497_v4 = vmul.f32 %v2091_v23, %v6545_v63  ;;  %v2440_v30 = vpop.f32.mrf.mxu0  ;;  %v3498_v22 = vmul.f32 %v2140_v35, %v6545_v63  ;;  %v2489_v39 = vpop.f32.mrf.mxu1  ;;  %v519_v63 = vunpack.c.l.bf16 %v455_v36  ;;  %v457_v23 = vld [vmem:[%s5790_s5 + $0xd8] sm:$0xff]   ;;  %v823_v35 = vmul.f32 %v5462_v38, %v695_v47  ;;  %v5275_v47 = vld [vmem:[%s5782_s8 + $0x55c] sm:$0xf0] }
 0x25e   : > { %v3499_v24 = vmul.f32 %v2440_v30, %v6798_v5  ;;  %v3500_v44 = vmul.f32 %v2489_v39, %v6798_v5  ;;  %v521_v13 = vunpack.c.l.bf16 %v457_v23  ;;  %v5020_v39 = vld [vmem:[%s5782_s8 + $0x568] sm:$0xf0] }
 0x25f   : > { %3881 = vst [vmem:[%s6018_s14 + $0x5f0] sm:$0xff] %v3497_v4  ;;  %2635 = vmatmul.bf16.vlgmr.msra.gmra.mxu0 %v6554_v7  ;;  %635 = vadd.xlane.f32.xlu1 %v519_v63  ;;  %v6855_v4 = vmul.f32 %v5460_v53, %v886_v2  ;;  %v887_v54 = vsub.f32 2.0, %v823_v35  ;;  %v5464_v49 = vpop.eup %5463 }
 0x260   : > { %3882 = vst [vmem:[%s6018_s14 + $0x5f8] sm:$0xff] %v3498_v22  ;;  %2684 = vmatmul.bf16.vlgmr.msra.gmra.mxu1 %v6554_v7  ;;  %v5019_v22 = vor.u32 %v5276_v31, %v5018_v10  ;;  %639 = vadd.xlane.f32.xlu0 %v521_v13 }
 0x261   : > { %3883 = vst [vmem:[%s6018_s14 + $0x600] sm:$0xff] %v3499_v24  ;;  %3021 = vmatmul.bf16.vlgmr.msra.gmra.mxu2 %v6807_v18  ;;  %3070 = vmatmul.bf16.vlgmr.msra.gmra.mxu3 %v6807_v18  ;;  %v5273_v24 = vld [vmem:[%s5782_s8 + $0x554] sm:$0xf]  ;;  %v6870_v58 = vmul.f32 %v5462_v38, %v887_v54  ;;  %v5267_v38 = vld [vmem:[%s5782_s8 + $0x524] sm:$0xf] }
 0x262   : > { %3884 = vst [vmem:[%s6018_s14 + $0x608] sm:$0xff] %v3500_v44  ;;  %v608_v30 = vpop.xlane.xlu2 %607  ;;  %v5023_v27 = vor.u32 %v5273_v24, %v5020_v39  ;;  %3212 = vmatpush.bf16.msrb.mxu2 %v5019_v22  ;;  %v5269_v54 = vld [vmem:[%s5782_s8 + $0x52c] sm:$0xf0] }
 0x263   : > { %v697_v41 = vadd.f32 1.0, %v608_v30 }
 0x264   : > { %v2538_v7 = vpop.f32.mrf.mxu2  ;;  %v2587_v57 = vpop.f32.mrf.mxu3  ;;  %3261 = vmatpush.bf16.msrb.mxu3 %v5023_v27 }
 0x265   : > { %v3501_v42 = vmul.f32 %v2538_v7, %v6798_v5  ;;  %v2442_v45 = vpop.f32.mrf.mxu0  ;;  %v3502_v32 = vmul.f32 %v2587_v57, %v6798_v5  ;;  %v2491_v51 = vpop.f32.mrf.mxu1  ;;  %5465 = vrcp.f32 %v697_v41  ;;  %v522_v7 = vunpack.c.h.bf16 %v457_v23 }
 0x266   : > { %v3505_v50 = vmul.f32 %v2442_v45, %v6819_v55  ;;  %v3506_v52 = vmul.f32 %v2491_v51, %v6819_v55  ;;  %v610_v57 = vpop.xlane.xlu0 %609  ;;  %v5010_v45 = vld [vmem:[%s5782_s8 + $0x548] sm:$0xf] }
 0x267   : > { %3885 = vst [vmem:[%s6018_s14 + $0x610] sm:$0xff] %v3501_v42  ;;  %v824_v42 = vmul.f32 %v5464_v49, %v696_v40  ;;  %641 = vadd.xlane.f32.xlu1 %v522_v7  ;;  %v698_v12 = vadd.f32 1.0, %v610_v57 }
 0x268   : > { %3886 = vst [vmem:[%s6018_s14 + $0x618] sm:$0xff] %v3502_v32  ;;  %v5011_v32 = vor.u32 %v5275_v47, %v5010_v45  ;;  %v6915_v47 = vld [vmem:[%s5790_s5 + $0xd8] sm:$0xff] }
 0x269   : > { %3889 = vst [vmem:[%s6018_s14 + $0x630] sm:$0xff] %v3505_v50  ;;  %v5012_v50 = vld [vmem:[%s5782_s8 + $0x560] sm:$0xf0]  ;;  %v888_v14 = vsub.f32 2.0, %v824_v42  ;;  %5467 = vrcp.f32 %v698_v12 }
 0x26a   : > { %3890 = vst [vmem:[%s6018_s14 + $0x638] sm:$0xff] %v3506_v52  ;;  %v5015_v53 = vor.u32 %v5272_v48, %v5012_v50  ;;  %3114 = vmatpush.bf16.msrb.mxu0 %v5011_v32 }
 0x26c   : > { %v2540_v62 = vpop.f32.mrf.mxu2  ;;  %v2589_v1 = vpop.f32.mrf.mxu3  ;;  %3163 = vmatpush.bf16.msrb.mxu1 %v5015_v53 }
 0x26d   : > { %v3507_v0 = vmul.f32 %v2540_v62, %v6819_v55  ;;  %v2445_v15 = vpop.f32.mrf.mxu0  ;;  %v3508_v3 = vmul.f32 %v2589_v1, %v6819_v55  ;;  %v2494_v17 = vpop.f32.mrf.mxu1 }
 0x26e   : > { %v3511_v33 = vmul.f32 %v2445_v15, %v6834_v56  ;;  %v3512_v11 = vmul.f32 %v2494_v17, %v6834_v56  ;;  %v5466_v62 = vpop.eup %5465  ;;  %v6891_v15 = vmul.f32 %v5464_v49, %v888_v14  ;;  %v4988_v49 = vld [vmem:[%s5782_s8 + $0x530] sm:$0xf0] }
 0x26f   : > { %3891 = vst [vmem:[%s6018_s14 + $0x640] sm:$0xff] %v3507_v0  ;;  %2640 = vmatmul.bf16.gmra.mxu0 %v6586_v28  ;;  %v459_v0 = vld [vmem:[%s5790_s5 + $0xe0] sm:$0xff]   ;;  %v825_v40 = vmul.f32 %v5466_v62, %v697_v41  ;;  %v614_v41 = vpop.xlane.xlu2 %613 }
 0x270   : > { %3892 = vst [vmem:[%s6018_s14 + $0x648] sm:$0xff] %v3508_v3  ;;  %2689 = vmatmul.bf16.gmra.mxu1 %v6586_v28  ;;  %v523_v1 = vunpack.c.l.bf16 %v459_v0  ;;  %v4994_v3 = vld [vmem:[%s5782_s8 + $0x520] sm:$0xf]  ;;  %v700_v32 = vadd.f32 1.0, %v614_v41 }
 0x271   : > { %3895 = vst [vmem:[%s6018_s14 + $0x660] sm:$0xff] %v3511_v33  ;;  %3026 = vmatmul.bf16.gmra.mxu2 %v6843_v19  ;;  %3075 = vmatmul.bf16.gmra.mxu3 %v6843_v19  ;;  %v5270_v33 = vld [vmem:[%s5782_s8 + $0x534] sm:$0xf0]  ;;  %v889_v22 = vsub.f32 2.0, %v825_v40 }
 0x272   : > { %3896 = vst [vmem:[%s6018_s14 + $0x668] sm:$0xff] %v3512_v11  ;;  %v612_v2 = vpop.xlane.xlu1 %611  ;;  %v4995_v17 = vor.u32 %v5270_v33, %v4994_v3  ;;  %v4996_v11 = vld [vmem:[%s5782_s8 + $0x538] sm:$0xf0]  ;;  %643 = vadd.xlane.f32.xlu2 %v523_v1  ;;  %v4972_v1 = vld [vmem:[%s5782_s8 + $0x508] sm:$0xf0] }
 0x273   : > { %v4999_v23 = vor.u32 %v5267_v38, %v4996_v11  ;;  %v699_v10 = vadd.f32 1.0, %v612_v2 }
 0x274   : > { %v2543_v28 = vpop.f32.mrf.mxu2  ;;  %v2592_v36 = vpop.f32.mrf.mxu3  ;;  %3213 = vmatpush.bf16.msrb.mxu2 %v4995_v17 }
 0x275   : > { %v3513_v44 = vmul.f32 %v2543_v28, %v6834_v56  ;;  %v2447_v63 = vpop.f32.mrf.mxu0  ;;  %v3514_v34 = vmul.f32 %v2592_v36, %v6834_v56  ;;  %v2496_v37 = vpop.f32.mrf.mxu1  ;;  %3262 = vmatpush.bf16.msrb.mxu3 %v4999_v23  ;;  %5469 = vrcp.f32 %v699_v10  ;;  %v6906_v36 = vmul.f32 %v5466_v62, %v889_v22  ;;  %v5264_v62 = vld [vmem:[%s5782_s8 + $0x504] sm:$0xf0] }
 0x276   : > { %v3517_v46 = vmul.f32 %v2447_v63, %v6855_v4  ;;  %v3518_v8 = vmul.f32 %v2496_v37, %v6855_v4  ;;  %v5468_v28 = vpop.eup %5467  ;;  %v5266_v37 = vld [vmem:[%s5782_s8 + $0x51c] sm:$0xf]  ;;  %5471 = vrcp.f32 %v700_v32 }
 0x277   : > { %3897 = vst [vmem:[%s6018_s14 + $0x670] sm:$0xff] %v3513_v44  ;;  %v524_v44 = vunpack.c.h.bf16 %v459_v0  ;;  %v826_v63 = vmul.f32 %v5468_v28, %v698_v12  ;;  %v4991_v7 = vor.u32 %v5266_v37, %v4988_v49  ;;  %v5261_v0 = vld [vmem:[%s5782_s8 + $0x4f4] sm:$0xf]  ;;  %v6951_v37 = vld [vmem:[%s5790_s5 + $0xe0] sm:$0xff] }
 0x278   : > { %3898 = vst [vmem:[%s6018_s14 + $0x678] sm:$0xff] %v3514_v34  ;;  %v4986_v34 = vld [vmem:[%s5782_s8 + $0x518] sm:$0xf]  ;;  %v4975_v40 = vor.u32 %v5261_v0, %v4972_v1 }
 0x279   : > { %3901 = vst [vmem:[%s6018_s14 + $0x690] sm:$0xff] %v3517_v46  ;;  %v4987_v46 = vor.u32 %v5269_v54, %v4986_v34  ;;  %645 = vadd.xlane.f32.xlu0 %v524_v44  ;;  %v890_v48 = vsub.f32 2.0, %v826_v63  ;;  %3164 = vmatpush.bf16.msrb.mxu1 %v4991_v7  ;;  %v4964_v44 = vld [vmem:[%s5782_s8 + $0x500] sm:$0xf0] }
 0x27a   : > { %3902 = vst [vmem:[%s6018_s14 + $0x698] sm:$0xff] %v3518_v8  ;;  %3263 = vmatpush.bf16.msrb.mxu3 %v4975_v40  ;;  %v618_v22 = vpop.xlane.xlu1 %617 }
 0x27b   : > { %3115 = vmatpush.bf16.msrb.mxu0 %v4987_v46  ;;  %v6927_v14 = vmul.f32 %v5468_v28, %v890_v48  ;;  %v702_v49 = vadd.f32 1.0, %v618_v22  ;;  %v463_v48 = vld [vmem:[%s5790_s5 + $0xf0] sm:$0xff]  }
 0x27c   : > { %v2545_v51 = vpop.f32.mrf.mxu2  ;;  %v2594_v20 = vpop.f32.mrf.mxu3  ;;  %v4940_v22 = vld [vmem:[%s5782_s8 + $0x4d0] sm:$0xf0] }
 0x27d   : > { %v3519_v52 = vmul.f32 %v2545_v51, %v6855_v4  ;;  %v2450_v43 = vpop.f32.mrf.mxu0  ;;  %v3520_v59 = vmul.f32 %v2594_v20, %v6855_v4  ;;  %v2499_v60 = vpop.f32.mrf.mxu1 }
 0x27e   : > { %v3523_v26 = vmul.f32 %v2450_v43, %v6870_v58  ;;  %v3524_v16 = vmul.f32 %v2499_v60, %v6870_v58  ;;  %v461_v43 = vld [vmem:[%s5790_s5 + $0xe8] sm:$0xff]   ;;  %v4970_v60 = vld [vmem:[%s5782_s8 + $0x4f0] sm:$0xf] }
 0x27f   : > { %3903 = vst [vmem:[%s6018_s14 + $0x6a0] sm:$0xff] %v3519_v52  ;;  %2645 = vmatmul.bf16.gmra.mxu0 %v6618_v25  ;;  %v5470_v52 = vpop.eup %5469  ;;  %v525_v12 = vunpack.c.l.bf16 %v461_v43 }
 0x280   : > { %3904 = vst [vmem:[%s6018_s14 + $0x6a8] sm:$0xff] %v3520_v59  ;;  %2694 = vmatmul.bf16.gmra.mxu1 %v6618_v25  ;;  %v827_v59 = vmul.f32 %v5470_v52, %v699_v10 }
 0x281   : > { %3907 = vst [vmem:[%s6018_s14 + $0x6c0] sm:$0xff] %v3523_v26  ;;  %3031 = vmatmul.bf16.gmra.mxu2 %v6879_v61  ;;  %3080 = vmatmul.bf16.gmra.mxu3 %v6879_v61 }
 0x282   : > { %3908 = vst [vmem:[%s6018_s14 + $0x6c8] sm:$0xff] %v3524_v16  ;;  %v616_v26 = vpop.xlane.xlu0 %615  ;;  %v4971_v16 = vor.u32 %v5264_v62, %v4970_v60  ;;  %647 = vadd.xlane.f32.xlu1 %v525_v12  ;;  %v891_v11 = vsub.f32 2.0, %v827_v59  ;;  %v5255_v59 = vld [vmem:[%s5782_s8 + $0x4c4] sm:$0xf] }
 0x283   : > { %v701_v17 = vadd.f32 1.0, %v616_v26  ;;  %v4948_v26 = vld [vmem:[%s5782_s8 + $0x4d8] sm:$0xf0] }
 0x284   : > { %v2548_v25 = vpop.f32.mrf.mxu2  ;;  %v2597_v35 = vpop.f32.mrf.mxu3  ;;  %3214 = vmatpush.bf16.msrb.mxu2 %v4971_v16  ;;  %v6942_v10 = vmul.f32 %v5470_v52, %v891_v11  ;;  %v4951_v60 = vor.u32 %v5255_v59, %v4948_v26 }
 0x285   : > { %v3525_v13 = vmul.f32 %v2548_v25, %v6870_v58  ;;  %v2452_v30 = vpop.f32.mrf.mxu0  ;;  %v3526_v31 = vmul.f32 %v2597_v35, %v6870_v58  ;;  %v2501_v39 = vpop.f32.mrf.mxu1  ;;  %5473 = vrcp.f32 %v701_v17 }
 0x286   : > { %v3529_v24 = vmul.f32 %v2452_v30, %v6891_v15  ;;  %v3530_v27 = vmul.f32 %v2501_v39, %v6891_v15  ;;  %v526_v30 = vunpack.c.h.bf16 %v461_v43  ;;  %v5263_v39 = vld [vmem:[%s5782_s8 + $0x4fc] sm:$0xf0]  ;;  %5475 = vrcp.f32 %v702_v49  ;;  %v5258_v43 = vld [vmem:[%s5782_s8 + $0x4d4] sm:$0xf0]  ;;  %3264 = vmatpush.bf16.msrb.mxu3 %v4951_v60 }
 0x287   : > { %3909 = vst [vmem:[%s6018_s14 + $0x6d0] sm:$0xff] %v3525_v13  ;;  %v5472_v13 = vpop.eup %5471 }
 0x288   : > { %3910 = vst [vmem:[%s6018_s14 + $0x6d8] sm:$0xff] %v3526_v31  ;;  %v828_v31 = vmul.f32 %v5472_v13, %v700_v32  ;;  %649 = vadd.xlane.f32.xlu2 %v526_v30 }
 0x289   : > { %3913 = vst [vmem:[%s6018_s14 + $0x6f0] sm:$0xff] %v3529_v24  ;;  %v4962_v24 = vld [vmem:[%s5782_s8 + $0x4e8] sm:$0xf] }
 0x28a   : > { %3914 = vst [vmem:[%s6018_s14 + $0x6f8] sm:$0xff] %v3530_v27  ;;  %v4963_v28 = vor.u32 %v5263_v39, %v4962_v24  ;;  %v5260_v27 = vld [vmem:[%s5782_s8 + $0x4ec] sm:$0xf] }
 0x28b   : > { %v4967_v41 = vor.u32 %v5260_v27, %v4964_v44 }
 0x28c   : > { %v2550_v8 = vpop.f32.mrf.mxu2  ;;  %v2599_v57 = vpop.f32.mrf.mxu3  ;;  %3116 = vmatpush.bf16.msrb.mxu0 %v4963_v28 }
 0x28d   : > { %v3531_v42 = vmul.f32 %v2550_v8, %v6891_v15  ;;  %v2455_v45 = vpop.f32.mrf.mxu0  ;;  %v3532_v50 = vmul.f32 %v2599_v57, %v6891_v15  ;;  %v2504_v53 = vpop.f32.mrf.mxu1  ;;  %v892_v8 = vsub.f32 2.0, %v828_v31  ;;  %3165 = vmatpush.bf16.msrb.mxu1 %v4967_v41  ;;  %v5254_v31 = vld [vmem:[%s5782_s8 + $0x4bc] sm:$0xf] }
 0x28e   : > { %v3535_v51 = vmul.f32 %v2455_v45, %v6906_v36  ;;  %v3536_v20 = vmul.f32 %v2504_v53, %v6906_v36  ;;  %v5474_v45 = vpop.eup %5473  ;;  %v4943_v39 = vor.u32 %v5254_v31, %v4940_v22 }
 0x28f   : > { %3915 = vst [vmem:[%s6018_s14 + $0x700] sm:$0xff] %v3531_v42  ;;  %2650 = vmatmul.bf16.gmra.mxu0 %v6650_v21  ;;  %v829_v53 = vmul.f32 %v5474_v45, %v701_v17 }
 0x290   : > { %3916 = vst [vmem:[%s6018_s14 + $0x708] sm:$0xff] %v3532_v50  ;;  %2699 = vmatmul.bf16.gmra.mxu1 %v6650_v21  ;;  %v527_v50 = vunpack.c.l.bf16 %v463_v48 }
 0x291   : > { %3919 = vst [vmem:[%s6018_s14 + $0x720] sm:$0xff] %v3535_v51  ;;  %3036 = vmatmul.bf16.gmra.mxu2 %v6915_v47  ;;  %3085 = vmatmul.bf16.gmra.mxu3 %v6915_v47  ;;  %v6963_v51 = vmul.f32 %v5472_v13, %v892_v8  ;;  %v893_v40 = vsub.f32 2.0, %v829_v53  ;;  %v4938_v13 = vld [vmem:[%s5782_s8 + $0x4b8] sm:$0xf]  ;;  %v5252_v53 = vld [vmem:[%s5782_s8 + $0x4a4] sm:$0xf0] }
 0x292   : > { %3920 = vst [vmem:[%s6018_s14 + $0x728] sm:$0xff] %v3536_v20  ;;  %v620_v52 = vpop.xlane.xlu2 %619  ;;  %v4946_v20 = vld [vmem:[%s5782_s8 + $0x4c0] sm:$0xf]  ;;  %651 = vadd.xlane.f32.xlu0 %v527_v50  ;;  %3166 = vmatpush.bf16.msrb.mxu1 %v4943_v39  ;;  %v4922_v50 = vld [vmem:[%s5782_s8 + $0x490] sm:$0xf] }
 0x293   : > { %v4947_v12 = vor.u32 %v5258_v43, %v4946_v20  ;;  %v703_v1 = vadd.f32 1.0, %v620_v52  ;;  %v6978_v11 = vmul.f32 %v5474_v45, %v893_v40  ;;  %v4923_v52 = vor.u32 %v5252_v53, %v4922_v50  ;;  %v5249_v20 = vld [vmem:[%s5782_s8 + $0x494] sm:$0xf]  ;;  %v4924_v43 = vld [vmem:[%s5782_s8 + $0x4a8] sm:$0xf0] }
 0x294   : > { %v2553_v21 = vpop.f32.mrf.mxu2  ;;  %v2602_v3 = vpop.f32.mrf.mxu3 }
 0x295   : > { %v3537_v2 = vmul.f32 %v2553_v21, %v6906_v36  ;;  %v2457_v33 = vpop.f32.mrf.mxu0  ;;  %v3538_v38 = vmul.f32 %v2602_v3, %v6906_v36  ;;  %v2506_v23 = vpop.f32.mrf.mxu1  ;;  %3215 = vmatpush.bf16.msrb.mxu2 %v4947_v12  ;;  %5477 = vrcp.f32 %v703_v1  ;;  %v4927_v12 = vor.u32 %v5249_v20, %v4924_v43 }
 0x296   : > { %v3541_v25 = vmul.f32 %v2457_v33, %v6927_v14  ;;  %v3542_v35 = vmul.f32 %v2506_v23, %v6927_v14  ;;  %v5476_v33 = vpop.eup %5475  ;;  %v622_v23 = vpop.xlane.xlu0 %621 }
 0x297   : > { %3921 = vst [vmem:[%s6018_s14 + $0x730] sm:$0xff] %v3537_v2  ;;  %v704_v41 = vadd.f32 1.0, %v622_v23  ;;  %3265 = vmatpush.bf16.msrb.mxu3 %v4927_v12 }
 0x298   : > { %3922 = vst [vmem:[%s6018_s14 + $0x738] sm:$0xff] %v3538_v38  ;;  %v528_v38 = vunpack.c.h.bf16 %v463_v48 }
 0x299   : > { %3925 = vst [vmem:[%s6018_s14 + $0x750] sm:$0xff] %v3541_v25  ;;  %v830_v25 = vmul.f32 %v5476_v33, %v702_v49  ;;  %5479 = vrcp.f32 %v704_v41  ;;  %3216 = vmatpush.bf16.msrb.mxu2 %v4923_v52 }
 0x29a   : > { %3926 = vst [vmem:[%s6018_s14 + $0x758] sm:$0xff] %v3542_v35  ;;  %v5257_v35 = vld [vmem:[%s5782_s8 + $0x4cc] sm:$0xf0]  ;;  %653 = vadd.xlane.f32.xlu1 %v528_v38  ;;  %v4914_v38 = vld [vmem:[%s5782_s8 + $0x488] sm:$0xf] }
 0x29b   : > { %v4939_v30 = vor.u32 %v5257_v35, %v4938_v13  ;;  %v5478_v8 = vpop.eup %5477  ;;  %v5248_v13 = vld [vmem:[%s5782_s8 + $0x48c] sm:$0xf]  ;;  %v4916_v35 = vld [vmem:[%s5782_s8 + $0x4a0] sm:$0xf0] }
 0x29c   : > { %v2555_v63 = vpop.f32.mrf.mxu2  ;;  %v2604_v54 = vpop.f32.mrf.mxu3  ;;  %v4919_v31 = vor.u32 %v5248_v13, %v4916_v35 }
 0x29d   : > { %v3543_v34 = vmul.f32 %v2555_v63, %v6927_v14  ;;  %v2460_v46 = vpop.f32.mrf.mxu0  ;;  %v3544_v7 = vmul.f32 %v2604_v54, %v6927_v14  ;;  %v2509_v57 = vpop.f32.mrf.mxu1  ;;  %v6987_v63 = vld [vmem:[%s5790_s5 + $0xe8] sm:$0xff]  ;;  %3117 = vmatpush.bf16.msrb.mxu0 %v4939_v30 }
 0x29e   : > { %v3547_v42 = vmul.f32 %v2460_v46, %v6942_v10  ;;  %v3548_v32 = vmul.f32 %v2509_v57, %v6942_v10  ;;  %3167 = vmatpush.bf16.msrb.mxu1 %v4919_v31 }
 0x29f   : > { %3927 = vst [vmem:[%s6018_s14 + $0x760] sm:$0xff] %v3543_v34  ;;  %2655 = vmatmul.bf16.gmra.mxu0 %v6682_v9  ;;  %v894_v34 = vsub.f32 2.0, %v830_v25  ;;  %v5251_v25 = vld [vmem:[%s5782_s8 + $0x49c] sm:$0xf0] }
 0x2a0   : > { %3928 = vst [vmem:[%s6018_s14 + $0x768] sm:$0xff] %v3544_v7  ;;  %2704 = vmatmul.bf16.gmra.mxu1 %v6682_v9  ;;  %v4915_v23 = vor.u32 %v5251_v25, %v4914_v38 }
 0x2a1   : > { %3931 = vst [vmem:[%s6018_s14 + $0x780] sm:$0xff] %v3547_v42  ;;  %3041 = vmatmul.bf16.gmra.mxu2 %v6951_v37  ;;  %3090 = vmatmul.bf16.gmra.mxu3 %v6951_v37  ;;  %v465_v42 = vld [vmem:[%s5790_s5 + $0xf8] sm:$0xff]   ;;  %v6999_v45 = vmul.f32 %v5476_v33, %v894_v34 }
 0x2a2   : > { %3932 = vst [vmem:[%s6018_s14 + $0x788] sm:$0xff] %v3548_v32  ;;  %v529_v57 = vunpack.c.l.bf16 %v465_v42  ;;  %v831_v32 = vmul.f32 %v5478_v8, %v703_v1  ;;  %v624_v48 = vpop.xlane.xlu1 %623  ;;  %3118 = vmatpush.bf16.msrb.mxu0 %v4915_v23 }
 0x2a3   : > { %v705_v60 = vadd.f32 1.0, %v624_v48 }
 0x2a4   : > { %v2558_v9 = vpop.f32.mrf.mxu2  ;;  %v2607_v16 = vpop.f32.mrf.mxu3  ;;  %655 = vadd.xlane.f32.xlu2 %v529_v57 }
 0x2a5   : > { %v3549_v62 = vmul.f32 %v2558_v9, %v6942_v10  ;;  %v2462_v0 = vpop.f32.mrf.mxu0  ;;  %v3550_v21 = vmul.f32 %v2607_v16, %v6942_v10  ;;  %v2511_v3 = vpop.f32.mrf.mxu1  ;;  %v895_v16 = vsub.f32 2.0, %v831_v32  ;;  %5481 = vrcp.f32 %v705_v60 }
 0x2a6   : > { %v3553_v2 = vmul.f32 %v2462_v0, %v6963_v51  ;;  %v3554_v17 = vmul.f32 %v2511_v3, %v6963_v51 }
 0x2a7   : > { %3933 = vst [vmem:[%s6018_s14 + $0x790] sm:$0xff] %v3549_v62  ;;  %v7014_v3 = vmul.f32 %v5478_v8, %v895_v16  ;;  %v5518_v8 = vld [vmem:[%s5790_s5 + $0xb0] sm:$0xff] }
 0x2a8   : > { %3934 = vst [vmem:[%s6018_s14 + $0x798] sm:$0xff] %v3550_v21  ;;  %v5480_v21 = vpop.eup %5479 }
 0x2a9   : > { %3937 = vst [vmem:[%s6018_s14 + $0x7b0] sm:$0xff] %v3553_v2  ;;  %v530_v2 = vunpack.c.h.bf16 %v465_v42  ;;  %v832_v33 = vmul.f32 %v5480_v21, %v704_v41 }
 0x2aa   : > { %3938 = vst [vmem:[%s6018_s14 + $0x7b8] sm:$0xff] %v3554_v17  ;;  %v626_v17 = vpop.xlane.xlu2 %625  ;;  %v630_v25 = vpop.xlane.xlu1 %629 }
 0x2ab   : > { %657 = vadd.xlane.f32.xlu0 %v530_v2  ;;  %v708_v35 = vadd.f32 1.0, %v630_v25 }
 0x2ac   : > { %v2560_v24 = vpop.f32.mrf.mxu2  ;;  %v2609_v27 = vpop.f32.mrf.mxu3 }
 0x2ad   : > { %v3555_v28 = vmul.f32 %v2560_v24, %v6963_v51  ;;  %v2465_v44 = vpop.f32.mrf.mxu0  ;;  %v3556_v54 = vmul.f32 %v2609_v27, %v6963_v51  ;;  %v2514_v49 = vpop.f32.mrf.mxu1  ;;  %v706_v27 = vadd.f32 1.0, %v626_v17 }
 0x2ae   : > { %v3559_v46 = vmul.f32 %v2465_v44, %v6978_v11  ;;  %v3560_v7 = vmul.f32 %v2514_v49, %v6978_v11  ;;  %v896_v44 = vsub.f32 2.0, %v832_v33 }
 0x2af   : > { %3939 = vst [vmem:[%s6018_s14 + $0x7c0] sm:$0xff] %v3555_v28  ;;  %2660 = vmatmul.bf16.gmra.mxu0 %v6714_v6  ;;  %v7023_v28 = vld [vmem:[%s5790_s5 + $0xf0] sm:$0xff]  ;;  %5483 = vrcp.f32 %v706_v27 }
 0x2b0   : > { %3940 = vst [vmem:[%s6018_s14 + $0x7c8] sm:$0xff] %v3556_v54  ;;  %2709 = vmatmul.bf16.gmra.mxu1 %v6714_v6 }
 0x2b1   : > { %3943 = vst [vmem:[%s6018_s14 + $0x7e0] sm:$0xff] %v3559_v46  ;;  %3046 = vmatmul.bf16.gmra.mxu2 %v6987_v63  ;;  %3095 = vmatmul.bf16.gmra.mxu3 %v6987_v63  ;;  %v5482_v46 = vpop.eup %5481 }
 0x2b2   : > { %3944 = vst [vmem:[%s6018_s14 + $0x7e8] sm:$0xff] %v3560_v7  ;;  %v7033_v7 = vmul.f32 %v5480_v21, %v896_v44  ;;  %v833_v42 = vmul.f32 %v5482_v46, %v705_v60  ;;  %v7049_v21 = vld [vmem:[%s5790_s5 + $0xf8] sm:$0xff] }
 0x2b4   : > { %v2563_v6 = vpop.f32.mrf.mxu2  ;;  %v2612_v26 = vpop.f32.mrf.mxu3  ;;  %v897_v52 = vsub.f32 2.0, %v833_v42 }
 0x2b5   : > { %v3561_v59 = vmul.f32 %v2563_v6, %v6978_v11  ;;  %v2467_v9 = vpop.f32.mrf.mxu0  ;;  %v3562_v62 = vmul.f32 %v2612_v26, %v6978_v11  ;;  %v2516_v1 = vpop.f32.mrf.mxu1 }
 0x2b6   : > { %v3565_v0 = vmul.f32 %v2467_v9, %v6999_v45  ;;  %v3566_v40 = vmul.f32 %v2516_v1, %v6999_v45  ;;  %v5484_v6 = vpop.eup %5483  ;;  %v7044_v26 = vmul.f32 %v5482_v46, %v897_v52 }
 0x2b7   : > { %3945 = vst [vmem:[%s6018_s14 + $0x7f0] sm:$0xff] %v3561_v59  ;;  %v628_v59 = vpop.xlane.xlu0 %627  ;;  %v834_v9 = vmul.f32 %v5484_v6, %v706_v27 }
 0x2b8   : > { %3946 = vst [vmem:[%s6018_s14 + $0x7f8] sm:$0xff] %v3562_v62  ;;  %v707_v62 = vadd.f32 1.0, %v628_v59 }
 0x2b9   : > { %3949 = vst [vmem:[%s6018_s14 + $0x810] sm:$0xff] %v3565_v0 }
 0x2ba   : > { %3950 = vst [vmem:[%s6018_s14 + $0x818] sm:$0xff] %v3566_v40  ;;  %v898_v40 = vsub.f32 2.0, %v834_v9  ;;  %5485 = vrcp.f32 %v707_v62 }
 0x2bb   : > { %5487 = vrcp.f32 %v708_v35 }
 0x2bc   : > { %v2565_v30 = vpop.f32.mrf.mxu2  ;;  %v2614_v24 = vpop.f32.mrf.mxu3  ;;  %v7060_v23 = vmul.f32 %v5484_v6, %v898_v40 }
 0x2bd   : > { %v3567_v22 = vmul.f32 %v2565_v30, %v6999_v45  ;;  %v2470_v39 = vpop.f32.mrf.mxu0  ;;  %v3568_v41 = vmul.f32 %v2614_v24, %v6999_v45  ;;  %v2519_v54 = vpop.f32.mrf.mxu1 }
 0x2be   : > { %v3571_v34 = vmul.f32 %v2470_v39, %v7014_v3  ;;  %v3572_v49 = vmul.f32 %v2519_v54, %v7014_v3 }
 0x2bf   : > { %3951 = vst [vmem:[%s6018_s14 + $0x820] sm:$0xff] %v3567_v22  ;;  %2665 = vmatmul.bf16.gmra.mxu0 %v5518_v8  ;;  %v634_v6 = vpop.xlane.xlu0 %633 }
 0x2c0   : > { %3952 = vst [vmem:[%s6018_s14 + $0x828] sm:$0xff] %v3568_v41  ;;  %2714 = vmatmul.bf16.gmra.mxu1 %v5518_v8  ;;  %v5486_v24 = vpop.eup %5485 }
 0x2c1   : > { %3955 = vst [vmem:[%s6018_s14 + $0x840] sm:$0xff] %v3571_v34  ;;  %3051 = vmatmul.bf16.gmra.mxu2 %v7023_v28  ;;  %3100 = vmatmul.bf16.gmra.mxu3 %v7023_v28  ;;  %v835_v41 = vmul.f32 %v5486_v24, %v707_v62 }
 0x2c2   : > { %3956 = vst [vmem:[%s6018_s14 + $0x848] sm:$0xff] %v3572_v49  ;;  %v632_v34 = vpop.xlane.xlu2 %631 }
 0x2c3   : > { %v709_v46 = vadd.f32 1.0, %v632_v34  ;;  %v899_v49 = vsub.f32 2.0, %v835_v41 }
 0x2c4   : > { %v2568_v57 = vpop.f32.mrf.mxu2  ;;  %v2617_v48 = vpop.f32.mrf.mxu3 }
 0x2c5   : > { %v3573_v32 = vmul.f32 %v2568_v57, %v7014_v3  ;;  %v2472_v50 = vpop.f32.mrf.mxu0  ;;  %v3574_v53 = vmul.f32 %v2617_v48, %v7014_v3  ;;  %v2521_v43 = vpop.f32.mrf.mxu1  ;;  %5489 = vrcp.f32 %v709_v46 }
 0x2c6   : > { %v3577_v20 = vmul.f32 %v2472_v50, %v7033_v7  ;;  %v3578_v12 = vmul.f32 %v2521_v43, %v7033_v7 }
 0x2c7   : > { %3957 = vst [vmem:[%s6018_s14 + $0x850] sm:$0xff] %v3573_v32  ;;  %v5488_v32 = vpop.eup %5487 }
 0x2c8   : > { %3958 = vst [vmem:[%s6018_s14 + $0x858] sm:$0xff] %v3574_v53  ;;  %v836_v43 = vmul.f32 %v5488_v32, %v708_v35 }
 0x2c9   : > { %3961 = vst [vmem:[%s6018_s14 + $0x870] sm:$0xff] %v3577_v20  ;;  %v7079_v20 = vmul.f32 %v5486_v24, %v899_v49 }
 0x2ca   : > { %3962 = vst [vmem:[%s6018_s14 + $0x878] sm:$0xff] %v3578_v12  ;;  %v900_v59 = vsub.f32 2.0, %v836_v43  ;;  %v638_v41 = vpop.xlane.xlu2 %637 }
 0x2cc   : > { %v2570_v60 = vpop.f32.mrf.mxu2  ;;  %v2619_v0 = vpop.f32.mrf.mxu3 }
 0x2cd   : > { %v3579_v16 = vmul.f32 %v2570_v60, %v7033_v7  ;;  %v2475_v1 = vpop.f32.mrf.mxu0  ;;  %v3580_v2 = vmul.f32 %v2619_v0, %v7033_v7  ;;  %v2524_v17 = vpop.f32.mrf.mxu1 }
 0x2ce   : > { %v3583_v33 = vmul.f32 %v2475_v1, %v7044_v26  ;;  %v3584_v38 = vmul.f32 %v2524_v17, %v7044_v26 }
 0x2cf   : > { %3963 = vst [vmem:[%s6018_s14 + $0x880] sm:$0xff] %v3579_v16  ;;  %2670 = vmatmul.bf16.gmra.mxu0 %v6772_v29  ;;  %v5490_v16 = vpop.eup %5489 }
 0x2d0   : > { %3964 = vst [vmem:[%s6018_s14 + $0x888] sm:$0xff] %v3580_v2  ;;  %2719 = vmatmul.bf16.gmra.mxu1 %v6772_v29 }
 0x2d1   : > { %3967 = vst [vmem:[%s6018_s14 + $0x8a0] sm:$0xff] %v3583_v33  ;;  %3056 = vmatmul.bf16.gmra.mxu2 %v7049_v21  ;;  %3105 = vmatmul.bf16.gmra.mxu3 %v7049_v21  ;;  %v837_v33 = vmul.f32 %v5490_v16, %v709_v46 }
 0x2d2   : > { %3968 = vst [vmem:[%s6018_s14 + $0x8a8] sm:$0xff] %v3584_v38  ;;  %v636_v17 = vpop.xlane.xlu1 %635 }
 0x2d3   : > { %v711_v25 = vadd.f32 1.0, %v636_v17 }
 0x2d4   : > { %v2573_v13 = vpop.f32.mrf.mxu2  ;;  %v2622_v31 = vpop.f32.mrf.mxu3 }
 0x2d5   : > { %v3585_v30 = vmul.f32 %v2573_v13, %v7044_v26  ;;  %v2477_v22 = vpop.f32.mrf.mxu0  ;;  %v3586_v29 = vmul.f32 %v2622_v31, %v7044_v26  ;;  %v2526_v27 = vpop.f32.mrf.mxu1  ;;  %v901_v13 = vsub.f32 2.0, %v837_v33 }
 0x2d6   : > { %v3589_v39 = vmul.f32 %v2477_v22, %v7060_v23  ;;  %v3590_v44 = vmul.f32 %v2526_v27, %v7060_v23 }
 0x2d7   : > { %3969 = vst [vmem:[%s6018_s14 + $0x8b0] sm:$0xff] %v3585_v30  ;;  %v7103_v27 = vmul.f32 %v5490_v16, %v901_v13 }
 0x2d8   : > { %3970 = vst [vmem:[%s6018_s14 + $0x8b8] sm:$0xff] %v3586_v29 }
 0x2d9   : > { %3973 = vst [vmem:[%s6018_s14 + $0x8d0] sm:$0xff] %v3589_v39 }
 0x2da   : > { %3974 = vst [vmem:[%s6018_s14 + $0x8d8] sm:$0xff] %v3590_v44 }
 0x2dc   : > { %v2575_v54 = vpop.f32.mrf.mxu2  ;;  %v2624_v42 = vpop.f32.mrf.mxu3 }
 0x2dd   : > { %v3591_v8 = vmul.f32 %v2575_v54, %v7060_v23  ;;  %v2636_v57 = vpop.f32.mrf.mxu0  ;;  %v3592_v48 = vmul.f32 %v2624_v42, %v7060_v23  ;;  %v2685_v53 = vpop.f32.mrf.mxu1 }
 0x2de   : > { %v3503_v50 = vmul.f32 %v2636_v57, %v6798_v5  ;;  %v3504_v52 = vmul.f32 %v2685_v53, %v6798_v5  ;;  %v710_v5 = vadd.f32 1.0, %v634_v6 }
 0x2df   : > { %3975 = vst [vmem:[%s6018_s14 + $0x8e0] sm:$0xff] %v3591_v8  ;;  %3119 = vmatmul.bf16.vlgmr.msrb.gmra.mxu0 %v6807_v18 }
 0x2e0   : > { %3976 = vst [vmem:[%s6018_s14 + $0x8e8] sm:$0xff] %v3592_v48  ;;  %3168 = vmatmul.bf16.vlgmr.msrb.gmra.mxu1 %v6807_v18  ;;  %5491 = vrcp.f32 %v710_v5 }
 0x2e1   : > { %3887 = vst [vmem:[%s6018_s14 + $0x620] sm:$0xff] %v3503_v50  ;;  %3217 = vmatmul.bf16.vlgmr.msrb.gmra.mxu2 %v6807_v18  ;;  %3266 = vmatmul.bf16.vlgmr.msrb.gmra.mxu3 %v6807_v18  ;;  %v7092_v18 = vmul.f32 %v5488_v32, %v900_v59  ;;  %5493 = vrcp.f32 %v711_v25 }
 0x2e2   : > { %3888 = vst [vmem:[%s6018_s14 + $0x628] sm:$0xff] %v3504_v52  ;;  %v640_v52 = vpop.xlane.xlu0 %639 }
 0x2e3   : > { %v713_v6 = vadd.f32 1.0, %v640_v52 }
 0x2e4   : > { %v3022_v12 = vpop.f32.mrf.mxu2  ;;  %v3071_v60 = vpop.f32.mrf.mxu3 }
 0x2e5   : > { %v3595_v9 = vmul.f32 %v3022_v12, %v7079_v20  ;;  %v2638_v62 = vpop.f32.mrf.mxu0  ;;  %v3596_v0 = vmul.f32 %v3071_v60, %v7079_v20  ;;  %v2687_v40 = vpop.f32.mrf.mxu1 }
 0x2e6   : > { %v3509_v1 = vmul.f32 %v2638_v62, %v6819_v55  ;;  %v3510_v2 = vmul.f32 %v2687_v40, %v6819_v55  ;;  %v5492_v55 = vpop.eup %5491 }
 0x2e7   : > { %3979 = vst [vmem:[%s6018_s14 + $0x900] sm:$0xff] %v3595_v9  ;;  %v838_v44 = vmul.f32 %v5492_v55, %v710_v5  ;;  %v5494_v42 = vpop.eup %5493 }
 0x2e8   : > { %3980 = vst [vmem:[%s6018_s14 + $0x908] sm:$0xff] %v3596_v0  ;;  %v839_v53 = vmul.f32 %v5494_v42, %v711_v25 }
 0x2e9   : > { %3893 = vst [vmem:[%s6018_s14 + $0x650] sm:$0xff] %v3509_v1  ;;  %v902_v54 = vsub.f32 2.0, %v838_v44 }
 0x2ea   : > { %3894 = vst [vmem:[%s6018_s14 + $0x658] sm:$0xff] %v3510_v2  ;;  %v903_v12 = vsub.f32 2.0, %v839_v53  ;;  %v642_v2 = vpop.xlane.xlu1 %641 }
 0x2ec   : > { %v3024_v38 = vpop.f32.mrf.mxu2  ;;  %v3073_v30 = vpop.f32.mrf.mxu3  ;;  %v7127_v1 = vmul.f32 %v5494_v42, %v903_v12 }
 0x2ed   : > { %v3601_v35 = vmul.f32 %v3024_v38, %v7092_v18  ;;  %v2641_v31 = vpop.f32.mrf.mxu0  ;;  %v3602_v22 = vmul.f32 %v3073_v30, %v7092_v18  ;;  %v2690_v29 = vpop.f32.mrf.mxu1 }
 0x2ee   : > { %v3515_v24 = vmul.f32 %v2641_v31, %v6834_v56  ;;  %v3516_v39 = vmul.f32 %v2690_v29, %v6834_v56  ;;  %v712_v56 = vadd.f32 1.0, %v638_v41  ;;  %v644_v29 = vpop.xlane.xlu2 %643 }
 0x2ef   : > { %3985 = vst [vmem:[%s6018_s14 + $0x930] sm:$0xff] %v3601_v35  ;;  %3124 = vmatmul.bf16.gmra.mxu0 %v6843_v19  ;;  %v715_v44 = vadd.f32 1.0, %v644_v29 }
 0x2f0   : > { %3986 = vst [vmem:[%s6018_s14 + $0x938] sm:$0xff] %v3602_v22  ;;  %3173 = vmatmul.bf16.gmra.mxu1 %v6843_v19  ;;  %5495 = vrcp.f32 %v712_v56 }
 0x2f1   : > { %3899 = vst [vmem:[%s6018_s14 + $0x680] sm:$0xff] %v3515_v24  ;;  %3222 = vmatmul.bf16.gmra.mxu2 %v6843_v19  ;;  %3271 = vmatmul.bf16.gmra.mxu3 %v6843_v19  ;;  %v7116_v19 = vmul.f32 %v5492_v55, %v902_v54  ;;  %5497 = vrcp.f32 %v713_v6 }
 0x2f2   : > { %3900 = vst [vmem:[%s6018_s14 + $0x688] sm:$0xff] %v3516_v39 }
 0x2f4   : > { %v3027_v34 = vpop.f32.mrf.mxu2  ;;  %v3076_v49 = vpop.f32.mrf.mxu3 }
 0x2f5   : > { %v3607_v46 = vmul.f32 %v3027_v34, %v7103_v27  ;;  %v2643_v8 = vpop.f32.mrf.mxu0  ;;  %v3608_v57 = vmul.f32 %v3076_v49, %v7103_v27  ;;  %v2692_v48 = vpop.f32.mrf.mxu1 }
 0x2f6   : > { %v3521_v32 = vmul.f32 %v2643_v8, %v6855_v4  ;;  %v3522_v50 = vmul.f32 %v2692_v48, %v6855_v4  ;;  %v5496_v4 = vpop.eup %5495  ;;  %v646_v48 = vpop.xlane.xlu0 %645 }
 0x2f7   : > { %3991 = vst [vmem:[%s6018_s14 + $0x960] sm:$0xff] %v3607_v46  ;;  %v840_v40 = vmul.f32 %v5496_v4, %v712_v56  ;;  %v5498_v35 = vpop.eup %5497 }
 0x2f8   : > { %3992 = vst [vmem:[%s6018_s14 + $0x968] sm:$0xff] %v3608_v57  ;;  %v841_v24 = vmul.f32 %v5498_v35, %v713_v6 }
 0x2f9   : > { %3905 = vst [vmem:[%s6018_s14 + $0x6b0] sm:$0xff] %v3521_v32  ;;  %v904_v17 = vsub.f32 2.0, %v840_v40 }
 0x2fa   : > { %3906 = vst [vmem:[%s6018_s14 + $0x6b8] sm:$0xff] %v3522_v50  ;;  %v905_v41 = vsub.f32 2.0, %v841_v24 }
 0x2fc   : > { %v3029_v43 = vpop.f32.mrf.mxu2  ;;  %v3078_v59 = vpop.f32.mrf.mxu3  ;;  %v7151_v57 = vmul.f32 %v5498_v35, %v905_v41 }
 0x2fd   : > { %v3613_v5 = vmul.f32 %v3029_v43, %v7116_v19  ;;  %v2646_v9 = vpop.f32.mrf.mxu0  ;;  %v3614_v60 = vmul.f32 %v3078_v59, %v7116_v19  ;;  %v2695_v16 = vpop.f32.mrf.mxu1 }
 0x2fe   : > { %v3527_v62 = vmul.f32 %v2646_v9, %v6870_v58  ;;  %v3528_v0 = vmul.f32 %v2695_v16, %v6870_v58  ;;  %v714_v58 = vadd.f32 1.0, %v642_v2 }
 0x2ff   : > { %3997 = vst [vmem:[%s6018_s14 + $0x990] sm:$0xff] %v3613_v5  ;;  %3129 = vmatmul.bf16.gmra.mxu0 %v6879_v61 }
 0x300   : > { %3998 = vst [vmem:[%s6018_s14 + $0x998] sm:$0xff] %v3614_v60  ;;  %3178 = vmatmul.bf16.gmra.mxu1 %v6879_v61  ;;  %5499 = vrcp.f32 %v714_v58 }
 0x301   : > { %3911 = vst [vmem:[%s6018_s14 + $0x6e0] sm:$0xff] %v3527_v62  ;;  %3227 = vmatmul.bf16.gmra.mxu2 %v6879_v61  ;;  %3276 = vmatmul.bf16.gmra.mxu3 %v6879_v61  ;;  %v7140_v61 = vmul.f32 %v5496_v4, %v904_v17  ;;  %5501 = vrcp.f32 %v715_v44  ;;  %v648_v62 = vpop.xlane.xlu1 %647 }
 0x302   : > { %3912 = vst [vmem:[%s6018_s14 + $0x6e8] sm:$0xff] %v3528_v0  ;;  %v717_v0 = vadd.f32 1.0, %v648_v62 }
 0x304   : > { %v3032_v33 = vpop.f32.mrf.mxu2  ;;  %v3081_v25 = vpop.f32.mrf.mxu3 }
 0x305   : > { %v3619_v38 = vmul.f32 %v3032_v33, %v7127_v1  ;;  %v2648_v13 = vpop.f32.mrf.mxu0  ;;  %v3620_v30 = vmul.f32 %v3081_v25, %v7127_v1  ;;  %v2697_v55 = vpop.f32.mrf.mxu1 }
 0x306   : > { %v3533_v31 = vmul.f32 %v2648_v13, %v6891_v15  ;;  %v3534_v22 = vmul.f32 %v2697_v55, %v6891_v15  ;;  %v5500_v15 = vpop.eup %5499 }
 0x307   : > { %4003 = vst [vmem:[%s6018_s14 + $0x9c0] sm:$0xff] %v3619_v38  ;;  %v842_v32 = vmul.f32 %v5500_v15, %v714_v58  ;;  %v5502_v12 = vpop.eup %5501 }
 0x308   : > { %4004 = vst [vmem:[%s6018_s14 + $0x9c8] sm:$0xff] %v3620_v30  ;;  %v843_v60 = vmul.f32 %v5502_v12, %v715_v44 }
 0x309   : > { %3917 = vst [vmem:[%s6018_s14 + $0x710] sm:$0xff] %v3533_v31  ;;  %v906_v53 = vsub.f32 2.0, %v842_v32  ;;  %v650_v31 = vpop.xlane.xlu2 %649 }
 0x30a   : > { %3918 = vst [vmem:[%s6018_s14 + $0x718] sm:$0xff] %v3534_v22  ;;  %v907_v40 = vsub.f32 2.0, %v843_v60 }
 0x30c   : > { %v3034_v39 = vpop.f32.mrf.mxu2  ;;  %v3083_v56 = vpop.f32.mrf.mxu3  ;;  %v7175_v35 = vmul.f32 %v5502_v12, %v907_v40 }
 0x30d   : > { %v3625_v34 = vmul.f32 %v3034_v39, %v7140_v61  ;;  %v2651_v54 = vpop.f32.mrf.mxu0  ;;  %v3626_v46 = vmul.f32 %v3083_v56, %v7140_v61  ;;  %v2700_v8 = vpop.f32.mrf.mxu1 }
 0x30e   : > { %v3539_v49 = vmul.f32 %v2651_v54, %v6906_v36  ;;  %v3540_v42 = vmul.f32 %v2700_v8, %v6906_v36  ;;  %v716_v36 = vadd.f32 1.0, %v646_v48 }
 0x30f   : > { %4009 = vst [vmem:[%s6018_s14 + $0x9f0] sm:$0xff] %v3625_v34  ;;  %3134 = vmatmul.bf16.gmra.mxu0 %v6915_v47 }
 0x310   : > { %4010 = vst [vmem:[%s6018_s14 + $0x9f8] sm:$0xff] %v3626_v46  ;;  %3183 = vmatmul.bf16.gmra.mxu1 %v6915_v47  ;;  %5503 = vrcp.f32 %v716_v36  ;;  %v652_v46 = vpop.xlane.xlu0 %651 }
 0x311   : > { %3923 = vst [vmem:[%s6018_s14 + $0x740] sm:$0xff] %v3539_v49  ;;  %3232 = vmatmul.bf16.gmra.mxu2 %v6915_v47  ;;  %3281 = vmatmul.bf16.gmra.mxu3 %v6915_v47  ;;  %v7164_v47 = vmul.f32 %v5500_v15, %v906_v53  ;;  %5505 = vrcp.f32 %v717_v0  ;;  %v719_v8 = vadd.f32 1.0, %v652_v46 }
 0x312   : > { %3924 = vst [vmem:[%s6018_s14 + $0x748] sm:$0xff] %v3540_v42 }
 0x314   : > { %v3037_v50 = vpop.f32.mrf.mxu2  ;;  %v3086_v43 = vpop.f32.mrf.mxu3 }
 0x315   : > { %v3631_v52 = vmul.f32 %v3037_v50, %v7151_v57  ;;  %v2653_v6 = vpop.f32.mrf.mxu0  ;;  %v3632_v5 = vmul.f32 %v3086_v43, %v7151_v57  ;;  %v2702_v9 = vpop.f32.mrf.mxu1 }
 0x316   : > { %v3545_v59 = vmul.f32 %v2653_v6, %v6927_v14  ;;  %v3546_v4 = vmul.f32 %v2702_v9, %v6927_v14  ;;  %v5504_v14 = vpop.eup %5503 }
 0x317   : > { %4015 = vst [vmem:[%s6018_s14 + $0xa20] sm:$0xff] %v3631_v52  ;;  %v844_v30 = vmul.f32 %v5504_v14, %v716_v36  ;;  %v5506_v44 = vpop.eup %5505 }
 0x318   : > { %4016 = vst [vmem:[%s6018_s14 + $0xa28] sm:$0xff] %v3632_v5  ;;  %v845_v15 = vmul.f32 %v5506_v44, %v717_v0  ;;  %v654_v5 = vpop.xlane.xlu1 %653 }
 0x319   : > { %3929 = vst [vmem:[%s6018_s14 + $0x770] sm:$0xff] %v3545_v59  ;;  %v908_v22 = vsub.f32 2.0, %v844_v30 }
 0x31a   : > { %3930 = vst [vmem:[%s6018_s14 + $0x778] sm:$0xff] %v3546_v4  ;;  %v909_v42 = vsub.f32 2.0, %v845_v15 }
 0x31c   : > { %v3039_v16 = vpop.f32.mrf.mxu2  ;;  %v3088_v33 = vpop.f32.mrf.mxu3  ;;  %v7199_v6 = vmul.f32 %v5506_v44, %v909_v42 }
 0x31d   : > { %v3637_v2 = vmul.f32 %v3039_v16, %v7164_v47  ;;  %v2656_v58 = vpop.f32.mrf.mxu0  ;;  %v3638_v17 = vmul.f32 %v3088_v33, %v7164_v47  ;;  %v2705_v25 = vpop.f32.mrf.mxu1 }
 0x31e   : > { %v3551_v38 = vmul.f32 %v2656_v58, %v6942_v10  ;;  %v3552_v13 = vmul.f32 %v2705_v25, %v6942_v10  ;;  %v718_v10 = vadd.f32 1.0, %v650_v31  ;;  %v658_v44 = vpop.xlane.xlu0 %657 }
 0x31f   : > { %4021 = vst [vmem:[%s6018_s14 + $0xa50] sm:$0xff] %v3637_v2  ;;  %3139 = vmatmul.bf16.gmra.mxu0 %v6951_v37 }
 0x320   : > { %4022 = vst [vmem:[%s6018_s14 + $0xa58] sm:$0xff] %v3638_v17  ;;  %3188 = vmatmul.bf16.gmra.mxu1 %v6951_v37  ;;  %5507 = vrcp.f32 %v718_v10 }
 0x321   : > { %3935 = vst [vmem:[%s6018_s14 + $0x7a0] sm:$0xff] %v3551_v38  ;;  %3237 = vmatmul.bf16.gmra.mxu2 %v6951_v37  ;;  %3286 = vmatmul.bf16.gmra.mxu3 %v6951_v37  ;;  %v7188_v37 = vmul.f32 %v5504_v14, %v908_v22  ;;  %5509 = vrcp.f32 %v719_v8  ;;  %v656_v14 = vpop.xlane.xlu2 %655 }
 0x322   : > { %3936 = vst [vmem:[%s6018_s14 + $0x7a8] sm:$0xff] %v3552_v13  ;;  %v721_v38 = vadd.f32 1.0, %v656_v14 }
 0x324   : > { %v3042_v55 = vpop.f32.mrf.mxu2  ;;  %v3091_v29 = vpop.f32.mrf.mxu3 }
 0x325   : > { %v3643_v24 = vmul.f32 %v3042_v55, %v7175_v35  ;;  %v2658_v39 = vpop.f32.mrf.mxu0  ;;  %v3644_v41 = vmul.f32 %v3091_v29, %v7175_v35  ;;  %v2707_v56 = vpop.f32.mrf.mxu1 }
 0x326   : > { %v3557_v34 = vmul.f32 %v2658_v39, %v6963_v51  ;;  %v3558_v54 = vmul.f32 %v2707_v56, %v6963_v51  ;;  %v5508_v51 = vpop.eup %5507 }
 0x327   : > { %4027 = vst [vmem:[%s6018_s14 + $0xa80] sm:$0xff] %v3643_v24  ;;  %v846_v12 = vmul.f32 %v5508_v51, %v718_v10  ;;  %v5510_v16 = vpop.eup %5509 }
 0x328   : > { %4028 = vst [vmem:[%s6018_s14 + $0xa88] sm:$0xff] %v3644_v41  ;;  %v847_v58 = vmul.f32 %v5510_v16, %v719_v8 }
 0x329   : > { %3941 = vst [vmem:[%s6018_s14 + $0x7d0] sm:$0xff] %v3557_v34  ;;  %v910_v9 = vsub.f32 2.0, %v846_v12 }
 0x32a   : > { %3942 = vst [vmem:[%s6018_s14 + $0x7d8] sm:$0xff] %v3558_v54  ;;  %v911_v25 = vsub.f32 2.0, %v847_v58 }
 0x32c   : > { %v3044_v49 = vpop.f32.mrf.mxu2  ;;  %v3093_v48 = vpop.f32.mrf.mxu3  ;;  %v7223_v29 = vmul.f32 %v5510_v16, %v911_v25 }
 0x32d   : > { %v3649_v32 = vmul.f32 %v3044_v49, %v7188_v37  ;;  %v2661_v50 = vpop.f32.mrf.mxu0  ;;  %v3650_v36 = vmul.f32 %v3093_v48, %v7188_v37  ;;  %v2710_v52 = vpop.f32.mrf.mxu1 }
 0x32e   : > { %v3563_v53 = vmul.f32 %v2661_v50, %v6978_v11  ;;  %v3564_v43 = vmul.f32 %v2710_v52, %v6978_v11  ;;  %v720_v11 = vadd.f32 1.0, %v654_v5 }
 0x32f   : > { %4033 = vst [vmem:[%s6018_s14 + $0xab0] sm:$0xff] %v3649_v32  ;;  %3144 = vmatmul.bf16.gmra.mxu0 %v6987_v63 }
 0x330   : > { %4034 = vst [vmem:[%s6018_s14 + $0xab8] sm:$0xff] %v3650_v36  ;;  %3193 = vmatmul.bf16.gmra.mxu1 %v6987_v63  ;;  %5511 = vrcp.f32 %v720_v11 }
 0x331   : > { %3947 = vst [vmem:[%s6018_s14 + $0x800] sm:$0xff] %v3563_v53  ;;  %3242 = vmatmul.bf16.gmra.mxu2 %v6987_v63  ;;  %3291 = vmatmul.bf16.gmra.mxu3 %v6987_v63  ;;  %v7212_v63 = vmul.f32 %v5508_v51, %v910_v9  ;;  %5513 = vrcp.f32 %v721_v38 }
 0x332   : > { %3948 = vst [vmem:[%s6018_s14 + $0x808] sm:$0xff] %v3564_v43 }
 0x334   : > { %v3047_v59 = vpop.f32.mrf.mxu2  ;;  %v3096_v60 = vpop.f32.mrf.mxu3 }
 0x335   : > { %v3655_v4 = vmul.f32 %v3047_v59, %v7199_v6  ;;  %v2663_v62 = vpop.f32.mrf.mxu0  ;;  %v3656_v0 = vmul.f32 %v3096_v60, %v7199_v6  ;;  %v2712_v2 = vpop.f32.mrf.mxu1 }
 0x336   : > { %v3569_v40 = vmul.f32 %v2663_v62, %v6999_v45  ;;  %v3570_v33 = vmul.f32 %v2712_v2, %v6999_v45  ;;  %v5512_v45 = vpop.eup %5511 }
 0x337   : > { %4039 = vst [vmem:[%s6018_s14 + $0xae0] sm:$0xff] %v3655_v4  ;;  %v848_v39 = vmul.f32 %v5512_v45, %v720_v11  ;;  %v5514_v46 = vpop.eup %5513 }
 0x338   : > { %4040 = vst [vmem:[%s6018_s14 + $0xae8] sm:$0xff] %v3656_v0  ;;  %v849_v48 = vmul.f32 %v5514_v46, %v721_v38 }
 0x339   : > { %3953 = vst [vmem:[%s6018_s14 + $0x830] sm:$0xff] %v3569_v40  ;;  %v912_v34 = vsub.f32 2.0, %v848_v39 }
 0x33a   : > { %3954 = vst [vmem:[%s6018_s14 + $0x838] sm:$0xff] %v3570_v33  ;;  %v913_v51 = vsub.f32 2.0, %v849_v48 }
 0x33c   : > { %v3049_v17 = vpop.f32.mrf.mxu2  ;;  %v3098_v30 = vpop.f32.mrf.mxu3  ;;  %v7247_v11 = vmul.f32 %v5514_v46, %v913_v51 }
 0x33d   : > { %v3661_v13 = vmul.f32 %v3049_v17, %v7212_v63  ;;  %v2666_v31 = vpop.f32.mrf.mxu0  ;;  %v3662_v55 = vmul.f32 %v3098_v30, %v7212_v63  ;;  %v2715_v22 = vpop.f32.mrf.mxu1 }
 0x33e   : > { %v3575_v10 = vmul.f32 %v2666_v31, %v7014_v3  ;;  %v3576_v24 = vmul.f32 %v2715_v22, %v7014_v3  ;;  %v722_v3 = vadd.f32 1.0, %v658_v44 }
 0x33f   : > { %4045 = vst [vmem:[%s6018_s14 + $0xb10] sm:$0xff] %v3661_v13  ;;  %3149 = vmatmul.bf16.gmra.mxu0 %v7023_v28 }
 0x340   : > { %4046 = vst [vmem:[%s6018_s14 + $0xb18] sm:$0xff] %v3662_v55  ;;  %3198 = vmatmul.bf16.gmra.mxu1 %v7023_v28  ;;  %5515 = vrcp.f32 %v722_v3 }
 0x341   : > { %3959 = vst [vmem:[%s6018_s14 + $0x860] sm:$0xff] %v3575_v10  ;;  %3247 = vmatmul.bf16.gmra.mxu2 %v7023_v28  ;;  %3296 = vmatmul.bf16.gmra.mxu3 %v7023_v28  ;;  %v7236_v28 = vmul.f32 %v5512_v45, %v912_v34 }
 0x342   : > { %3960 = vst [vmem:[%s6018_s14 + $0x868] sm:$0xff] %v3576_v24 }
 0x344   : > { %v3052_v41 = vpop.f32.mrf.mxu2  ;;  %v3101_v54 = vpop.f32.mrf.mxu3 }
 0x345   : > { %v3667_v56 = vmul.f32 %v3052_v41, %v7223_v29  ;;  %v2668_v15 = vpop.f32.mrf.mxu0  ;;  %v3668_v49 = vmul.f32 %v3101_v54, %v7223_v29  ;;  %v2717_v42 = vpop.f32.mrf.mxu1 }
 0x346   : > { %v3581_v8 = vmul.f32 %v2668_v15, %v7033_v7  ;;  %v3582_v32 = vmul.f32 %v2717_v42, %v7033_v7  ;;  %v5516_v43 = vpop.eup %5515 }
 0x347   : > { %4051 = vst [vmem:[%s6018_s14 + $0xb40] sm:$0xff] %v3667_v56  ;;  %v850_v9 = vmul.f32 %v5516_v43, %v722_v3 }
 0x348   : > { %4052 = vst [vmem:[%s6018_s14 + $0xb48] sm:$0xff] %v3668_v49 }
 0x349   : > { %3965 = vst [vmem:[%s6018_s14 + $0x890] sm:$0xff] %v3581_v8 }
 0x34a   : > { %3966 = vst [vmem:[%s6018_s14 + $0x898] sm:$0xff] %v3582_v32 }
 0x34c   : > { %v3054_v50 = vpop.f32.mrf.mxu2  ;;  %v3103_v53 = vpop.f32.mrf.mxu3 }
 0x34d   : > { %v3673_v36 = vmul.f32 %v3054_v50, %v7236_v28  ;;  %v2671_v52 = vpop.f32.mrf.mxu0  ;;  %v3674_v7 = vmul.f32 %v3103_v53, %v7236_v28  ;;  %v2720_v5 = vpop.f32.mrf.mxu1 }
 0x34e   : > { %v3587_v12 = vmul.f32 %v2671_v52, %v7044_v26  ;;  %v3588_v59 = vmul.f32 %v2720_v5, %v7044_v26  ;;  %v914_v26 = vsub.f32 2.0, %v850_v9 }
 0x34f   : > { %4057 = vst [vmem:[%s6018_s14 + $0xb70] sm:$0xff] %v3673_v36  ;;  %3154 = vmatmul.bf16.gmra.mxu0 %v7049_v21 }
 0x350   : > { %4058 = vst [vmem:[%s6018_s14 + $0xb78] sm:$0xff] %v3674_v7  ;;  %3203 = vmatmul.bf16.gmra.mxu1 %v7049_v21 }
 0x351   : > { %3971 = vst [vmem:[%s6018_s14 + $0x8c0] sm:$0xff] %v3587_v12  ;;  %3252 = vmatmul.bf16.gmra.mxu2 %v7049_v21  ;;  %3301 = vmatmul.bf16.gmra.mxu3 %v7049_v21  ;;  %v7260_v21 = vmul.f32 %v5516_v43, %v914_v26 }
 0x352   : > { %3972 = vst [vmem:[%s6018_s14 + $0x8c8] sm:$0xff] %v3588_v59 }
 0x354   : > { %v3057_v4 = vpop.f32.mrf.mxu2  ;;  %v3106_v62 = vpop.f32.mrf.mxu3 }
 0x355   : > { %v3679_v60 = vmul.f32 %v3057_v4, %v7247_v11  ;;  %v2673_v16 = vpop.f32.mrf.mxu0  ;;  %v3680_v0 = vmul.f32 %v3106_v62, %v7247_v11  ;;  %v2722_v2 = vpop.f32.mrf.mxu1 }
 0x356   : > { %v3593_v40 = vmul.f32 %v2673_v16, %v7060_v23  ;;  %v3594_v33 = vmul.f32 %v2722_v2, %v7060_v23 }
 0x357   : > { %4063 = vst [vmem:[%s6018_s14 + $0xba0] sm:$0xff] %v3679_v60 }
 0x358   : > { %4064 = vst [vmem:[%s6018_s14 + $0xba8] sm:$0xff] %v3680_v0 }
 0x359   : > { %3977 = vst [vmem:[%s6018_s14 + $0x8f0] sm:$0xff] %v3593_v40 }
 0x35a   : > { %3978 = vst [vmem:[%s6018_s14 + $0x8f8] sm:$0xff] %v3594_v33 }
 0x35c   : > { %v3059_v58 = vpop.f32.mrf.mxu2  ;;  %v3108_v17 = vpop.f32.mrf.mxu3 }
 0x35d   : > { %v3685_v14 = vmul.f32 %v3059_v58, %v7260_v21  ;;  %v3120_v38 = vpop.f32.mrf.mxu0  ;;  %v3686_v25 = vmul.f32 %v3108_v17, %v7260_v21  ;;  %v3169_v30 = vpop.f32.mrf.mxu1 }
 0x35e   : > { %v3597_v13 = vmul.f32 %v3120_v38, %v7079_v20  ;;  %v3598_v23 = vmul.f32 %v3169_v30, %v7079_v20 }
 0x35f   : > { %4069 = vst [vmem:[%s6018_s14 + $0xbd0] sm:$0xff] %v3685_v14 }
 0x360   : > { %4070 = vst [vmem:[%s6018_s14 + $0xbd8] sm:$0xff] %v3686_v25 }
 0x361   : > { %3981 = vst [vmem:[%s6018_s14 + $0x910] sm:$0xff] %v3597_v13 }
 0x362   : > { %3982 = vst [vmem:[%s6018_s14 + $0x918] sm:$0xff] %v3598_v23 }
 0x364   : > { %v3218_v31 = vpop.f32.mrf.mxu2  ;;  %v3267_v55 = vpop.f32.mrf.mxu3 }
 0x365   : > { %v3599_v45 = vmul.f32 %v3218_v31, %v7079_v20  ;;  %v3122_v10 = vpop.f32.mrf.mxu0  ;;  %v3600_v22 = vmul.f32 %v3267_v55, %v7079_v20  ;;  %v3171_v39 = vpop.f32.mrf.mxu1 }
 0x366   : > { %v3603_v24 = vmul.f32 %v3122_v10, %v7092_v18  ;;  %v3604_v44 = vmul.f32 %v3171_v39, %v7092_v18 }
 0x367   : > { %3983 = vst [vmem:[%s6018_s14 + $0x920] sm:$0xff] %v3599_v45 }
 0x368   : > { %3984 = vst [vmem:[%s6018_s14 + $0x928] sm:$0xff] %v3600_v22 }
 0x369   : > { %3987 = vst [vmem:[%s6018_s14 + $0x940] sm:$0xff] %v3603_v24 }
 0x36a   : > { %3988 = vst [vmem:[%s6018_s14 + $0x948] sm:$0xff] %v3604_v44 }
 0x36c   : > { %v3220_v41 = vpop.f32.mrf.mxu2  ;;  %v3269_v34 = vpop.f32.mrf.mxu3 }
 0x36d   : > { %v3605_v3 = vmul.f32 %v3220_v41, %v7092_v18  ;;  %v3125_v56 = vpop.f32.mrf.mxu0  ;;  %v3606_v20 = vmul.f32 %v3269_v34, %v7092_v18  ;;  %v3174_v15 = vpop.f32.mrf.mxu1 }
 0x36e   : > { %v3609_v54 = vmul.f32 %v3125_v56, %v7103_v27  ;;  %v3610_v46 = vmul.f32 %v3174_v15, %v7103_v27 }
 0x36f   : > { %3989 = vst [vmem:[%s6018_s14 + $0x950] sm:$0xff] %v3605_v3 }
 0x370   : > { %3990 = vst [vmem:[%s6018_s14 + $0x958] sm:$0xff] %v3606_v20 }
 0x371   : > { %3993 = vst [vmem:[%s6018_s14 + $0x970] sm:$0xff] %v3609_v54 }
 0x372   : > { %3994 = vst [vmem:[%s6018_s14 + $0x978] sm:$0xff] %v3610_v46 }
 0x374   : > { %v3223_v49 = vpop.f32.mrf.mxu2  ;;  %v3272_v42 = vpop.f32.mrf.mxu3 }
 0x375   : > { %v3611_v8 = vmul.f32 %v3223_v49, %v7103_v27  ;;  %v3127_v32 = vpop.f32.mrf.mxu0  ;;  %v3612_v18 = vmul.f32 %v3272_v42, %v7103_v27  ;;  %v3176_v50 = vpop.f32.mrf.mxu1 }
 0x376   : > { %v3615_v48 = vmul.f32 %v3127_v32, %v7116_v19  ;;  %v3616_v51 = vmul.f32 %v3176_v50, %v7116_v19 }
 0x377   : > { %3995 = vst [vmem:[%s6018_s14 + $0x980] sm:$0xff] %v3611_v8 }
 0x378   : > { %3996 = vst [vmem:[%s6018_s14 + $0x988] sm:$0xff] %v3612_v18 }
 0x379   : > { %3999 = vst [vmem:[%s6018_s14 + $0x9a0] sm:$0xff] %v3615_v48 }
 0x37a   : > { %4000 = vst [vmem:[%s6018_s14 + $0x9a8] sm:$0xff] %v3616_v51 }
 0x37c   : > { %v3225_v36 = vpop.f32.mrf.mxu2  ;;  %v3274_v52 = vpop.f32.mrf.mxu3 }
 0x37d   : > { %v3617_v53 = vmul.f32 %v3225_v36, %v7116_v19  ;;  %v3130_v43 = vpop.f32.mrf.mxu0  ;;  %v3618_v27 = vmul.f32 %v3274_v52, %v7116_v19  ;;  %v3179_v12 = vpop.f32.mrf.mxu1 }
 0x37e   : > { %v3621_v7 = vmul.f32 %v3130_v43, %v7127_v1  ;;  %v3622_v5 = vmul.f32 %v3179_v12, %v7127_v1 }
 0x37f   : > { %4001 = vst [vmem:[%s6018_s14 + $0x9b0] sm:$0xff] %v3617_v53 }
 0x380   : > { %4002 = vst [vmem:[%s6018_s14 + $0x9b8] sm:$0xff] %v3618_v27 }
 0x381   : > { %4005 = vst [vmem:[%s6018_s14 + $0x9d0] sm:$0xff] %v3621_v7 }
 0x382   : > { %4006 = vst [vmem:[%s6018_s14 + $0x9d8] sm:$0xff] %v3622_v5 }
 0x384   : > { %v3228_v59 = vpop.f32.mrf.mxu2  ;;  %v3277_v4 = vpop.f32.mrf.mxu3 }
 0x385   : > { %v3623_v9 = vmul.f32 %v3228_v59, %v7127_v1  ;;  %v3132_v26 = vpop.f32.mrf.mxu0  ;;  %v3624_v19 = vmul.f32 %v3277_v4, %v7127_v1  ;;  %v3181_v62 = vpop.f32.mrf.mxu1 }
 0x386   : > { %v3627_v60 = vmul.f32 %v3132_v26, %v7140_v61  ;;  %v3628_v16 = vmul.f32 %v3181_v62, %v7140_v61 }
 0x387   : > { %4007 = vst [vmem:[%s6018_s14 + $0x9e0] sm:$0xff] %v3623_v9 }
 0x388   : > { %4008 = vst [vmem:[%s6018_s14 + $0x9e8] sm:$0xff] %v3624_v19 }
 0x389   : > { %4011 = vst [vmem:[%s6018_s14 + $0xa00] sm:$0xff] %v3627_v60 }
 0x38a   : > { %4012 = vst [vmem:[%s6018_s14 + $0xa08] sm:$0xff] %v3628_v16 }
 0x38c   : > { %v3230_v0 = vpop.f32.mrf.mxu2  ;;  %v3279_v2 = vpop.f32.mrf.mxu3 }
 0x38d   : > { %v3629_v40 = vmul.f32 %v3230_v0, %v7140_v61  ;;  %v3135_v33 = vpop.f32.mrf.mxu0  ;;  %v3630_v1 = vmul.f32 %v3279_v2, %v7140_v61  ;;  %v3184_v14 = vpop.f32.mrf.mxu1 }
 0x38e   : > { %v3633_v58 = vmul.f32 %v3135_v33, %v7151_v57  ;;  %v3634_v17 = vmul.f32 %v3184_v14, %v7151_v57 }
 0x38f   : > { %4013 = vst [vmem:[%s6018_s14 + $0xa10] sm:$0xff] %v3629_v40 }
 0x390   : > { %4014 = vst [vmem:[%s6018_s14 + $0xa18] sm:$0xff] %v3630_v1 }
 0x391   : > { %4017 = vst [vmem:[%s6018_s14 + $0xa30] sm:$0xff] %v3633_v58 }
 0x392   : > { %4018 = vst [vmem:[%s6018_s14 + $0xa38] sm:$0xff] %v3634_v17 }
 0x394   : > { %v3233_v38 = vpop.f32.mrf.mxu2  ;;  %v3282_v13 = vpop.f32.mrf.mxu3 }
 0x395   : > { %v3635_v25 = vmul.f32 %v3233_v38, %v7151_v57  ;;  %v3137_v30 = vpop.f32.mrf.mxu0  ;;  %v3636_v61 = vmul.f32 %v3282_v13, %v7151_v57  ;;  %v3186_v31 = vpop.f32.mrf.mxu1 }
 0x396   : > { %v3639_v23 = vmul.f32 %v3137_v30, %v7164_v47  ;;  %v3640_v45 = vmul.f32 %v3186_v31, %v7164_v47 }
 0x397   : > { %4019 = vst [vmem:[%s6018_s14 + $0xa40] sm:$0xff] %v3635_v25 }
 0x398   : > { %4020 = vst [vmem:[%s6018_s14 + $0xa48] sm:$0xff] %v3636_v61 }
 0x399   : > { %4023 = vst [vmem:[%s6018_s14 + $0xa60] sm:$0xff] %v3639_v23 }
 0x39a   : > { %4024 = vst [vmem:[%s6018_s14 + $0xa68] sm:$0xff] %v3640_v45 }
 0x39c   : > { %v3235_v55 = vpop.f32.mrf.mxu2  ;;  %v3284_v22 = vpop.f32.mrf.mxu3 }
 0x39d   : > { %v3641_v10 = vmul.f32 %v3235_v55, %v7164_v47  ;;  %v3140_v24 = vpop.f32.mrf.mxu0  ;;  %v3642_v57 = vmul.f32 %v3284_v22, %v7164_v47  ;;  %v3189_v44 = vpop.f32.mrf.mxu1 }
 0x39e   : > { %v3645_v39 = vmul.f32 %v3140_v24, %v7175_v35  ;;  %v3646_v41 = vmul.f32 %v3189_v44, %v7175_v35 }
 0x39f   : > { %4025 = vst [vmem:[%s6018_s14 + $0xa70] sm:$0xff] %v3641_v10 }
 0x3a0   : > { %4026 = vst [vmem:[%s6018_s14 + $0xa78] sm:$0xff] %v3642_v57 }
 0x3a1   : > { %4029 = vst [vmem:[%s6018_s14 + $0xa90] sm:$0xff] %v3645_v39 }
 0x3a2   : > { %4030 = vst [vmem:[%s6018_s14 + $0xa98] sm:$0xff] %v3646_v41 }
 0x3a4   : > { %v3238_v3 = vpop.f32.mrf.mxu2  ;;  %v3287_v56 = vpop.f32.mrf.mxu3 }
 0x3a5   : > { %v3647_v34 = vmul.f32 %v3238_v3, %v7175_v35  ;;  %v3142_v20 = vpop.f32.mrf.mxu0  ;;  %v3648_v47 = vmul.f32 %v3287_v56, %v7175_v35  ;;  %v3191_v15 = vpop.f32.mrf.mxu1 }
 0x3a6   : > { %v3651_v54 = vmul.f32 %v3142_v20, %v7188_v37  ;;  %v3652_v46 = vmul.f32 %v3191_v15, %v7188_v37 }
 0x3a7   : > { %4031 = vst [vmem:[%s6018_s14 + $0xaa0] sm:$0xff] %v3647_v34 }
 0x3a8   : > { %4032 = vst [vmem:[%s6018_s14 + $0xaa8] sm:$0xff] %v3648_v47 }
 0x3a9   : > { %4035 = vst [vmem:[%s6018_s14 + $0xac0] sm:$0xff] %v3651_v54 }
 0x3aa   : > { %4036 = vst [vmem:[%s6018_s14 + $0xac8] sm:$0xff] %v3652_v46 }
 0x3ac   : > { %v3240_v49 = vpop.f32.mrf.mxu2  ;;  %v3289_v42 = vpop.f32.mrf.mxu3 }
 0x3ad   : > { %v3653_v8 = vmul.f32 %v3240_v49, %v7188_v37  ;;  %v3145_v32 = vpop.f32.mrf.mxu0  ;;  %v3654_v35 = vmul.f32 %v3289_v42, %v7188_v37  ;;  %v3194_v48 = vpop.f32.mrf.mxu1 }
 0x3ae   : > { %v3657_v18 = vmul.f32 %v3145_v32, %v7199_v6  ;;  %v3658_v50 = vmul.f32 %v3194_v48, %v7199_v6 }
 0x3af   : > { %4037 = vst [vmem:[%s6018_s14 + $0xad0] sm:$0xff] %v3653_v8 }
 0x3b0   : > { %4038 = vst [vmem:[%s6018_s14 + $0xad8] sm:$0xff] %v3654_v35 }
 0x3b1   : > { %4041 = vst [vmem:[%s6018_s14 + $0xaf0] sm:$0xff] %v3657_v18 }
 0x3b2   : > { %4042 = vst [vmem:[%s6018_s14 + $0xaf8] sm:$0xff] %v3658_v50 }
 0x3b4   : > { %v3243_v51 = vpop.f32.mrf.mxu2  ;;  %v3292_v53 = vpop.f32.mrf.mxu3 }
 0x3b5   : > { %v3659_v36 = vmul.f32 %v3243_v51, %v7199_v6  ;;  %v3147_v52 = vpop.f32.mrf.mxu0  ;;  %v3660_v37 = vmul.f32 %v3292_v53, %v7199_v6  ;;  %v3196_v27 = vpop.f32.mrf.mxu1 }
 0x3b6   : > { %v3663_v43 = vmul.f32 %v3147_v52, %v7212_v63  ;;  %v3664_v7 = vmul.f32 %v3196_v27, %v7212_v63 }
 0x3b7   : > { %4043 = vst [vmem:[%s6018_s14 + $0xb00] sm:$0xff] %v3659_v36 }
 0x3b8   : > { %4044 = vst [vmem:[%s6018_s14 + $0xb08] sm:$0xff] %v3660_v37 }
 0x3b9   : > { %4047 = vst [vmem:[%s6018_s14 + $0xb20] sm:$0xff] %v3663_v43 }
 0x3ba   : > { %4048 = vst [vmem:[%s6018_s14 + $0xb28] sm:$0xff] %v3664_v7 }
 0x3bc   : > { %v3245_v12 = vpop.f32.mrf.mxu2  ;;  %v3294_v59 = vpop.f32.mrf.mxu3 }
 0x3bd   : > { %v3665_v5 = vmul.f32 %v3245_v12, %v7212_v63  ;;  %v3150_v9 = vpop.f32.mrf.mxu0  ;;  %v3666_v6 = vmul.f32 %v3294_v59, %v7212_v63  ;;  %v3199_v26 = vpop.f32.mrf.mxu1 }
 0x3be   : > { %v3669_v4 = vmul.f32 %v3150_v9, %v7223_v29  ;;  %v3670_v19 = vmul.f32 %v3199_v26, %v7223_v29 }
 0x3bf   : > { %4049 = vst [vmem:[%s6018_s14 + $0xb30] sm:$0xff] %v3665_v5 }
 0x3c0   : > { %4050 = vst [vmem:[%s6018_s14 + $0xb38] sm:$0xff] %v3666_v6 }
 0x3c1   : > { %4053 = vst [vmem:[%s6018_s14 + $0xb50] sm:$0xff] %v3669_v4 }
 0x3c2   : > { %4054 = vst [vmem:[%s6018_s14 + $0xb58] sm:$0xff] %v3670_v19 }
 0x3c4   : > { %v3248_v60 = vpop.f32.mrf.mxu2  ;;  %v3297_v16 = vpop.f32.mrf.mxu3 }
 0x3c5   : > { %v3671_v62 = vmul.f32 %v3248_v60, %v7223_v29  ;;  %v3152_v0 = vpop.f32.mrf.mxu0  ;;  %v3672_v63 = vmul.f32 %v3297_v16, %v7223_v29  ;;  %v3201_v2 = vpop.f32.mrf.mxu1 }
 0x3c6   : > { %v3675_v40 = vmul.f32 %v3152_v0, %v7236_v28  ;;  %v3676_v33 = vmul.f32 %v3201_v2, %v7236_v28 }
 0x3c7   : > { %4055 = vst [vmem:[%s6018_s14 + $0xb60] sm:$0xff] %v3671_v62 }
 0x3c8   : > { %4056 = vst [vmem:[%s6018_s14 + $0xb68] sm:$0xff] %v3672_v63 }
 0x3c9   : > { %4059 = vst [vmem:[%s6018_s14 + $0xb80] sm:$0xff] %v3675_v40 }
 0x3ca   : > { %4060 = vst [vmem:[%s6018_s14 + $0xb88] sm:$0xff] %v3676_v33 }
 0x3cc   : > { %v3250_v1 = vpop.f32.mrf.mxu2  ;;  %v3299_v14 = vpop.f32.mrf.mxu3 }
 0x3cd   : > { %v3677_v58 = vmul.f32 %v3250_v1, %v7236_v28  ;;  %v3155_v17 = vpop.f32.mrf.mxu0  ;;  %v3678_v29 = vmul.f32 %v3299_v14, %v7236_v28  ;;  %v3204_v25 = vpop.f32.mrf.mxu1 }
 0x3ce   : > { %v3681_v38 = vmul.f32 %v3155_v17, %v7247_v11  ;;  %v3682_v13 = vmul.f32 %v3204_v25, %v7247_v11 }
 0x3cf   : > { %4061 = vst [vmem:[%s6018_s14 + $0xb90] sm:$0xff] %v3677_v58 }
 0x3d0   : > { %4062 = vst [vmem:[%s6018_s14 + $0xb98] sm:$0xff] %v3678_v29 }
 0x3d1   : > { %4065 = vst [vmem:[%s6018_s14 + $0xbb0] sm:$0xff] %v3681_v38 }
 0x3d2   : > { %4066 = vst [vmem:[%s6018_s14 + $0xbb8] sm:$0xff] %v3682_v13 }
 0x3d4   : > { %v3253_v30 = vpop.f32.mrf.mxu2  ;;  %v3302_v23 = vpop.f32.mrf.mxu3 }
 0x3d5   : > { %v3683_v61 = vmul.f32 %v3253_v30, %v7247_v11  ;;  %v3157_v28 = vpop.f32.mrf.mxu0  ;;  %v3684_v31 = vmul.f32 %v3302_v23, %v7247_v11  ;;  %v3206_v55 = vpop.f32.mrf.mxu1 }
 0x3d6   : > { %v3687_v45 = vmul.f32 %v3157_v28, %v7260_v21  ;;  %v3688_v10 = vmul.f32 %v3206_v55, %v7260_v21 }
 0x3d7   : > { %4067 = vst [vmem:[%s6018_s14 + $0xbc0] sm:$0xff] %v3683_v61 }
 0x3d8   : > { %4068 = vst [vmem:[%s6018_s14 + $0xbc8] sm:$0xff] %v3684_v31 }
 0x3d9   : > { %4071 = vst [vmem:[%s6018_s14 + $0xbe0] sm:$0xff] %v3687_v45 }
 0x3da   : > { %4072 = vst [vmem:[%s6018_s14 + $0xbe8] sm:$0xff] %v3688_v10 }
 0x3dc   : > { %v3255_v11 = vpop.f32.mrf.mxu2  ;;  %v3304_v24 = vpop.f32.mrf.mxu3 }
 0x3dd   : > { %v3689_v22 = vmul.f32 %v3255_v11, %v7260_v21  ;;  %v3690_v57 = vmul.f32 %v3304_v24, %v7260_v21 }
 0x3df   : > { %4073 = vst [vmem:[%s6018_s14 + $0xbf0] sm:$0xff] %v3689_v22 }
 0x3e0   : > { %4074 = vst [vmem:[%s6018_s14 + $0xbf8] sm:$0xff] %v3690_v57 }
 0x3e1   : > { %5606 = shalt.err (!%p5603_p5)
}
 0x3e2   : > { %s5655_s30 = smov 768   ;;  %s5656_s28 = smov 48  }
 0x3e3   : > { %5336 = dma.vmem_to_hbm [thread:$0]  (%p5718_p11), %s4090_s4, 49152, %s4092_s17, %s4076_s23, %s5655_s30, %s5655_s30, %s5656_s28  }
 0x3e4 PF: > { %s4106_s26 = sand.u32 1, %s5637_s9   ;;  %p5346_p7 = pnand %p4190_p9, %p5722_p12 }
 0x3e5   : > { %s4107_s5 = scalar_lea.sflag [#allocation4], %s4106_s26 }
 0x3e6   : > { %p5347_p8 = pneg %p5346_p7 }
 0x3e8   : > { %5632 = dma.done.wait (%p5347_p8), %s4107_s5, 49152  }
 0x3e9   : > { %5634 = vsyncadd (%p5347_p8), %s4107_s5, 4294918144  ;;  %p18_p10 = scmp.ge.s32.totalorder %s5697_s15, 4   ;;  %s7438_s9 = smov %s5641_s10 }
 0x3ea   : > { %s7439_s10 = smov %s5645_s11  ;;  %s7440_s11 = smov %s5709_s18 }
 0x3eb   : > { %s7441_s12 = smov %s5697_s15  ;;  %20 = sbr.rel (!%p18_p10) target bundleno = 7 (0x7), region = 86 }
 0x3f0   :  { %4113 = vsyncpa [#allocation3], 1 }
 0x3f1   :  { %4115 = vsyncpa [#allocation3 + $0x1], 1 }
 0x3f2   :  { %4116 = vsyncpa [#allocation6], 1 }
 0x3f3   :  { %4118 = vsyncpa [#allocation6 + $0x1], 1 }
 0x3f4   :  { %4119 = vsyncpa [#allocation4], 1 }
 0x3f5   :  { %4121 = vsyncpa [#allocation4 + $0x1], 1 }

</bundles_post_ra>
